<compile_context>
chip_gen: v7x
topology: tpu7x:2x2x1
jax: 0.10.0
libtpu: 0.0.40
codegen_flags: <defaults>
</compile_context>

<pallas_src>
import numpy as np
import jax
import jax.numpy as jnp
from jax import lax
from jax.experimental import pallas as pl
from jax.experimental.pallas import tpu as pltpu

SEQ_LEN = 138            # forced by Linear(544, 128):  32 * 17 == 544
L1, L2, L3 = 69, 35, 17  # conv output lengths
BN_EPS = 1e-5
LANE = 128


# ----------------------------- host-side folding -----------------------------

def _round_up(x, m):
    return (x + m - 1) // m * m


def _conv_out_len(l_in, k, stride, pad):
    return (l_in + 2 * pad - k) // stride + 1


def _tap_matrices_np(l_in, k, stride, pad):
    """Constant 0/1 matrices T_j s.t. (x @ T_j)[c, l] = x_pad[c, l*stride + j]."""
    l_out = _conv_out_len(l_in, k, stride, pad)
    t = np.zeros((k, l_in, l_out), np.float32)
    for j in range(k):
        for l in range(l_out):
            i = l * stride + j - pad
            if 0 <= i < l_in:
                t[j, i, l] = 1.0
    return t


def _conv_as_dense(w, b, l_in, stride, pad, bn_scale=None, bn_shift=None):
    """Fold Conv1d (+ optional per-channel affine) into y_flat = x_flat @ D + c.

    Per-sample flattening is channel-major (c*L + l), matching nn.Flatten.
    w: (Cout, Cin, K), b: (Cout,).  Returns D (Cin*Lin, Cout*Lout), c (1, Cout*Lout).
    """
    cout, cin, k = w.shape
    l_out = _conv_out_len(l_in, k, stride, pad)
    taps = jnp.asarray(_tap_matrices_np(l_in, k, stride, pad))        # (K, Lin, Lout)
    d = jnp.einsum('oij,jab->iaob', w, taps).reshape(cin * l_in, cout * l_out)
    c = jnp.repeat(b, l_out)
    if bn_scale is not None:
        d = d * jnp.repeat(bn_scale, l_out)[None, :]
        c = c * jnp.repeat(bn_scale, l_out) + jnp.repeat(bn_shift, l_out)
    return d, c[None, :]


def prepare_params(p):
    """One-time folding of conv/BN/linear weights into lane-padded dense mats.

    Runs OUTSIDE the jitted forward so the per-call hot path is a single
    pallas_call (no per-step re-folding / HBM round trips).
    """
    # TODO(synk): nn.BatchNorm1d is folded with eval-mode running stats;
    # train-mode batch statistics would couple samples across tiles.
    inv_std = 1.0 / jnp.sqrt(p["bn_var"] + BN_EPS)
    bn_scale = p["bn_gamma"] * inv_std
    bn_shift = p["bn_beta"] - p["bn_mean"] * bn_scale

    d1, c1 = _conv_as_dense(p["w1"], p["b1"], SEQ_LEN, 2, 1)                  # (138, 552)
    d2, c2 = _conv_as_dense(p["w2"], p["b2"], L1, 2, 1, bn_scale, bn_shift)   # (552, 560)
    d3, c3 = _conv_as_dense(p["w3"], p["b3"], L2, 2, 0)                       # (560, 544)
    wl1, bl1 = p["wl1"].T, p["bl1"][None, :]                                  # (544, 128)
    wl2, bl2 = p["wl2"].T, p["bl2"][None, :]                                  # (128, enc)

    def pad_to(a, rows, cols):
        return jnp.zeros((rows, cols), jnp.float32).at[:a.shape[0], :a.shape[1]].set(a)

    k0 = _round_up(SEQ_LEN, LANE)            # 138 -> 256   (matmul-1 K)
    n1 = _round_up(d1.shape[1], LANE)        # 552 -> 640
    n2 = _round_up(d2.shape[1], LANE)        # 560 -> 640
    n3 = _round_up(d3.shape[1], LANE)        # 544 -> 640
    n4 = _round_up(wl1.shape[1], LANE)       # 128 -> 128
    n5 = _round_up(wl2.shape[1], LANE)       # enc_dim -> 128 (lane-dense output)

    return dict(
        d1=pad_to(d1, k0, n1),  c1=pad_to(c1, 1, n1),
        d2=pad_to(d2, n1, n2),  c2=pad_to(c2, 1, n2),
        d3=pad_to(d3, n2, n3),  c3=pad_to(c3, 1, n3),
        wl1=pad_to(wl1, n3, n4), bl1=pad_to(bl1, 1, n4),
        wl2=pad_to(wl2, n4, n5), bl2=pad_to(bl2, 1, n5),
    )


# ------------------------------- Pallas kernel -------------------------------

def encoder_fused_kernel(x_ref, d1_ref, c1_ref, d2_ref, c2_ref, d3_ref, c3_ref,
                         wl1_ref, bl1_ref, wl2_ref, bl2_ref, o_ref):
    # x_ref: (TB, 256)  -> five batch-major MXU matmuls, bias+ReLU epilogue on the VPU.
    h = jnp.maximum(jnp.dot(x_ref[...], d1_ref[...],
                            preferred_element_type=jnp.float32) + c1_ref[...], 0.0)
    h = jnp.maximum(jnp.dot(h, d2_ref[...],
                            preferred_element_type=jnp.float32) + c2_ref[...], 0.0)
    h = jnp.maximum(jnp.dot(h, d3_ref[...],
                            preferred_element_type=jnp.float32) + c3_ref[...], 0.0)
    h = jnp.maximum(jnp.dot(h, wl1_ref[...],
                            preferred_element_type=jnp.float32) + bl1_ref[...], 0.0)
    o_ref[...] = jnp.dot(h, wl2_ref[...],
                         preferred_element_type=jnp.float32) + bl2_ref[...]


# ------------------------------- forward pass --------------------------------

def _pick_tb(b, requested):
    """Batch tile: big (amortize per-step overhead), sublane-aligned for tiny B,
    and >= 2 grid steps once the batch is large enough so both v7x TCs work."""
    bp8 = _round_up(b, 8)
    tb = min(requested, bp8)
    if bp8 >= 2 * LANE:                                   # enough rows for 2 cores
        tb = min(tb, _round_up((bp8 + 1) // 2, LANE))     # guarantee >= 2 steps
    return max(tb, 8)


def encoder_cnn_forward(x, fp, *, enc_dim, tb=512):
    B, L, cin = x.shape
    assert L == SEQ_LEN and cin == 1
    k_pad = fp["d1"].shape[0]        # 256
    n_out = fp["wl2"].shape[1]       # lane-dense padded output width

    # torch x.transpose(1, 2) then channel-major flatten; Cin == 1 -> squeeze.
    x_flat = x[:, :, 0]                                   # (B, 138)

    tb = _pick_tb(B, tb)
    bp = _round_up(B, tb)
    # Single pad: batch rows to the tile grid, K columns to the 128-aligned width.
    x_flat = jnp.pad(x_flat, ((0, bp - B), (0, k_pad - SEQ_LEN)))

    def resident(a):
        # Constant-index block, never re-fetched across grid steps -> single buffer.
        return pl.BlockSpec(a.shape, lambda b, n=a.ndim: (0,) * n,
                            pipeline_mode=pl.Buffered(1))

    out = pl.pallas_call(
        encoder_fused_kernel,
        out_shape=jax.ShapeDtypeStruct((bp, n_out), jnp.float32),
        grid_spec=pltpu.PrefetchScalarGridSpec(
            num_scalar_prefetch=0,
            grid=(bp // tb,),
            in_specs=[
                pl.BlockSpec((tb, k_pad), lambda b: (b, 0)),
                resident(fp["d1"]), resident(fp["c1"]),
                resident(fp["d2"]), resident(fp["c2"]),
                resident(fp["d3"]), resident(fp["c3"]),
                resident(fp["wl1"]), resident(fp["bl1"]),
                resident(fp["wl2"]), resident(fp["bl2"]),
            ],
            out_specs=pl.BlockSpec((tb, n_out), lambda b: (b, 0)),
        ),
        compiler_params=pltpu.CompilerParams(
            dimension_semantics=("parallel",),            # shard batch tiles across TCs
            vmem_limit_bytes=32 * 1024 * 1024),           # headroom above v5e's 16 MiB default
    )(x_flat, fp["d1"], fp["c1"], fp["d2"], fp["c2"], fp["d3"], fp["c3"],
      fp["wl1"], fp["bl1"], fp["wl2"], fp["bl2"])

    return out[:B, :enc_dim]


# ---------------------------- params & reference -----------------------------

def init_params(key, encoded_space_dim):
    ks = jax.random.split(key, 10)

    def u(k, shape, fan_in):
        bound = 1.0 / np.sqrt(fan_in)
        return jax.random.uniform(k, shape, jnp.float32, -bound, bound)

    return dict(
        w1=u(ks[0], (8, 1, 3), 3),        b1=u(ks[1], (8,), 3),
        w2=u(ks[2], (16, 8, 3), 24),      b2=u(ks[3], (16,), 24),
        w3=u(ks[4], (32, 16, 3), 48),     b3=u(ks[5], (32,), 48),
        bn_gamma=jnp.ones((16,), jnp.float32), bn_beta=jnp.zeros((16,), jnp.float32),
        bn_mean=jnp.zeros((16,), jnp.float32), bn_var=jnp.ones((16,), jnp.float32),
        wl1=u(ks[6], (128, 544), 544),    bl1=u(ks[7], (128,), 544),
        wl2=u(ks[8], (encoded_space_dim, 128), 128),
        bl2=u(ks[9], (encoded_space_dim,), 128),
    )


def reference_forward(x, p):
    xt = jnp.transpose(x, (0, 2, 1))
    dn = ("NCH", "OIH", "NCH")
    h = lax.conv_general_dilated(xt, p["w1"], (2,), [(1, 1)], dimension_numbers=dn)
    h = jax.nn.relu(h + p["b1"][None, :, None])
    h = lax.conv_general_dilated(h, p["w2"], (2,), [(1, 1)], dimension_numbers=dn)
    h = h + p["b2"][None, :, None]
    h = (h - p["bn_mean"][None, :, None]) / jnp.sqrt(p["bn_var"][None, :, None] + BN_EPS)
    h = jax.nn.relu(h * p["bn_gamma"][None, :, None] + p["bn_beta"][None, :, None])
    h = lax.conv_general_dilated(h, p["w3"], (2,), [(0, 0)], dimension_numbers=dn)
    h = jax.nn.relu(h + p["b3"][None, :, None])
    h = h.reshape(x.shape[0], -1)
    h = jax.nn.relu(h @ p["wl1"].T + p["bl1"])
    return h @ p["wl2"].T + p["bl2"]


if __name__ == "__main__":
    key = jax.random.PRNGKey(0)
    k_x, k_x2, k_p = jax.random.split(key, 3)
    ENC_DIM = 32
    params = init_params(k_p, ENC_DIM)
    folded = prepare_params(params)           # one-time host-side folding

    fwd = jax.jit(encoder_cnn_forward, static_argnames=("enc_dim", "tb"))

    # Small batch (single sublane-aligned tile).
    B = 4
    x = jax.random.normal(k_x, (B, SEQ_LEN, 1), jnp.float32)
    out = jax.block_until_ready(fwd(x, folded, enc_dim=ENC_DIM))
    assert out.shape == (B, ENC_DIM), out.shape
    ref = jax.block_until_ready(reference_forward(x, params))
    err = float(jnp.max(jnp.abs(out - ref)))
    assert err < 2e-3, f"mismatch vs reference (B={B}): {err}"

    # Larger batch exercising the >=2-step parallel grid (both TCs on v7x).
    B2 = 260
    x2 = jax.random.normal(k_x2, (B2, SEQ_LEN, 1), jnp.float32)
    out2 = jax.block_until_ready(fwd(x2, folded, enc_dim=ENC_DIM))
    assert out2.shape == (B2, ENC_DIM), out2.shape
    ref2 = jax.block_until_ready(reference_forward(x2, params))
    err2 = float(jnp.max(jnp.abs(out2 - ref2)))
    assert err2 < 2e-3, f"mismatch vs reference (B={B2}): {err2}"

    print("KERNEL_OK")
</pallas_src>

<mosaic_0001>
module attributes {stable_mosaic.version = 11 : i64} {
  func.func @encoder_fused_kernel(%arg0: i32, %arg1: memref<8x256xf32, #tpu.memory_space<vmem>>, %arg2: memref<256x640xf32, #tpu.memory_space<vmem>>, %arg3: memref<1x640xf32, #tpu.memory_space<vmem>>, %arg4: memref<640x640xf32, #tpu.memory_space<vmem>>, %arg5: memref<1x640xf32, #tpu.memory_space<vmem>>, %arg6: memref<640x640xf32, #tpu.memory_space<vmem>>, %arg7: memref<1x640xf32, #tpu.memory_space<vmem>>, %arg8: memref<640x128xf32, #tpu.memory_space<vmem>>, %arg9: memref<1x128xf32, #tpu.memory_space<vmem>>, %arg10: memref<128x128xf32, #tpu.memory_space<vmem>>, %arg11: memref<1x128xf32, #tpu.memory_space<vmem>>, %arg12: memref<8x128xf32, #tpu.memory_space<vmem>>) attributes {dimension_semantics = [#tpu.dimension_semantics<parallel>], iteration_bounds = array<i64: 1>, scalar_prefetch = 0 : i64, scratch_operands = 0 : i64, tpu.core_type = #tpu.core_type<tc>, window_params = [{transform_indices = @transform_0, window_bounds = array<i64: 8, 256>}, {pipeline_mode = #tpu.pipeline_mode<synchronous>, transform_indices = @transform_1, window_bounds = array<i64: 256, 640>}, {pipeline_mode = #tpu.pipeline_mode<synchronous>, transform_indices = @transform_2, window_bounds = array<i64: 1, 640>}, {pipeline_mode = #tpu.pipeline_mode<synchronous>, transform_indices = @transform_3, window_bounds = array<i64: 640, 640>}, {pipeline_mode = #tpu.pipeline_mode<synchronous>, transform_indices = @transform_4, window_bounds = array<i64: 1, 640>}, {pipeline_mode = #tpu.pipeline_mode<synchronous>, transform_indices = @transform_5, window_bounds = array<i64: 640, 640>}, {pipeline_mode = #tpu.pipeline_mode<synchronous>, transform_indices = @transform_6, window_bounds = array<i64: 1, 640>}, {pipeline_mode = #tpu.pipeline_mode<synchronous>, transform_indices = @transform_7, window_bounds = array<i64: 640, 128>}, {pipeline_mode = #tpu.pipeline_mode<synchronous>, transform_indices = @transform_8, window_bounds = array<i64: 1, 128>}, {pipeline_mode = #tpu.pipeline_mode<synchronous>, transform_indices = @transform_9, window_bounds = array<i64: 128, 128>}, {pipeline_mode = #tpu.pipeline_mode<synchronous>, transform_indices = @transform_10, window_bounds = array<i64: 1, 128>}, {transform_indices = @transform_11, window_bounds = array<i64: 8, 128>}]} {
    %c0 = arith.constant 0 : index
    %c0_0 = arith.constant 0 : index
    %0 = vector.load %arg1[%c0, %c0_0] : memref<8x256xf32, #tpu.memory_space<vmem>>, vector<8x256xf32>
    %c0_1 = arith.constant 0 : index
    %c0_2 = arith.constant 0 : index
    %1 = vector.load %arg2[%c0_1, %c0_2] : memref<256x640xf32, #tpu.memory_space<vmem>>, vector<256x640xf32>
    %cst = arith.constant dense<0.000000e+00> : vector<8x640xf32>
    %2 = tpu.matmul %0, %1, %cst {dimension_numbers = #tpu.dot_dimension_numbers<[1], [0], [0], [1], [0, 0, 1, 1], [], []>} : vector<8x256xf32>, vector<256x640xf32>, vector<8x640xf32> -> vector<8x640xf32>
    %c0_3 = arith.constant 0 : index
    %c0_4 = arith.constant 0 : index
    %3 = vector.load %arg3[%c0_3, %c0_4] : memref<1x640xf32, #tpu.memory_space<vmem>>, vector<1x640xf32>
    %4 = vector.broadcast %3 : vector<1x640xf32> to vector<8x640xf32>
    %5 = arith.addf %2, %4 : vector<8x640xf32>
    %cst_5 = arith.constant 0.000000e+00 : f32
    %6 = vector.broadcast %cst_5 : f32 to vector<8x640xf32>
    %7 = arith.maximumf %5, %6 : vector<8x640xf32>
    %c0_6 = arith.constant 0 : index
    %c0_7 = arith.constant 0 : index
    %8 = vector.load %arg4[%c0_6, %c0_7] : memref<640x640xf32, #tpu.memory_space<vmem>>, vector<640x640xf32>
    %cst_8 = arith.constant dense<0.000000e+00> : vector<8x640xf32>
    %9 = tpu.matmul %7, %8, %cst_8 {dimension_numbers = #tpu.dot_dimension_numbers<[1], [0], [0], [1], [0, 0, 1, 1], [], []>} : vector<8x640xf32>, vector<640x640xf32>, vector<8x640xf32> -> vector<8x640xf32>
    %c0_9 = arith.constant 0 : index
    %c0_10 = arith.constant 0 : index
    %10 = vector.load %arg5[%c0_9, %c0_10] : memref<1x640xf32, #tpu.memory_space<vmem>>, vector<1x640xf32>
    %11 = vector.broadcast %10 : vector<1x640xf32> to vector<8x640xf32>
    %12 = arith.addf %9, %11 : vector<8x640xf32>
    %cst_11 = arith.constant 0.000000e+00 : f32
    %13 = vector.broadcast %cst_11 : f32 to vector<8x640xf32>
    %14 = arith.maximumf %12, %13 : vector<8x640xf32>
    %c0_12 = arith.constant 0 : index
    %c0_13 = arith.constant 0 : index
    %15 = vector.load %arg6[%c0_12, %c0_13] : memref<640x640xf32, #tpu.memory_space<vmem>>, vector<640x640xf32>
    %cst_14 = arith.constant dense<0.000000e+00> : vector<8x640xf32>
    %16 = tpu.matmul %14, %15, %cst_14 {dimension_numbers = #tpu.dot_dimension_numbers<[1], [0], [0], [1], [0, 0, 1, 1], [], []>} : vector<8x640xf32>, vector<640x640xf32>, vector<8x640xf32> -> vector<8x640xf32>
    %c0_15 = arith.constant 0 : index
    %c0_16 = arith.constant 0 : index
    %17 = vector.load %arg7[%c0_15, %c0_16] : memref<1x640xf32, #tpu.memory_space<vmem>>, vector<1x640xf32>
    %18 = vector.broadcast %17 : vector<1x640xf32> to vector<8x640xf32>
    %19 = arith.addf %16, %18 : vector<8x640xf32>
    %cst_17 = arith.constant 0.000000e+00 : f32
    %20 = vector.broadcast %cst_17 : f32 to vector<8x640xf32>
    %21 = arith.maximumf %19, %20 : vector<8x640xf32>
    %c0_18 = arith.constant 0 : index
    %c0_19 = arith.constant 0 : index
    %22 = vector.load %arg8[%c0_18, %c0_19] : memref<640x128xf32, #tpu.memory_space<vmem>>, vector<640x128xf32>
    %cst_20 = arith.constant dense<0.000000e+00> : vector<8x128xf32>
    %23 = tpu.matmul %21, %22, %cst_20 {dimension_numbers = #tpu.dot_dimension_numbers<[1], [0], [0], [1], [0, 0, 1, 1], [], []>} : vector<8x640xf32>, vector<640x128xf32>, vector<8x128xf32> -> vector<8x128xf32>
    %c0_21 = arith.constant 0 : index
    %c0_22 = arith.constant 0 : index
    %24 = vector.load %arg9[%c0_21, %c0_22] : memref<1x128xf32, #tpu.memory_space<vmem>>, vector<1x128xf32>
    %25 = vector.broadcast %24 : vector<1x128xf32> to vector<8x128xf32>
    %26 = arith.addf %23, %25 : vector<8x128xf32>
    %cst_23 = arith.constant 0.000000e+00 : f32
    %27 = vector.broadcast %cst_23 : f32 to vector<8x128xf32>
    %28 = arith.maximumf %26, %27 : vector<8x128xf32>
    %c0_24 = arith.constant 0 : index
    %c0_25 = arith.constant 0 : index
    %29 = vector.load %arg10[%c0_24, %c0_25] : memref<128x128xf32, #tpu.memory_space<vmem>>, vector<128x128xf32>
    %cst_26 = arith.constant dense<0.000000e+00> : vector<8x128xf32>
    %30 = tpu.matmul %28, %29, %cst_26 {dimension_numbers = #tpu.dot_dimension_numbers<[1], [0], [0], [1], [0, 0, 1, 1], [], []>} : vector<8x128xf32>, vector<128x128xf32>, vector<8x128xf32> -> vector<8x128xf32>
    %c0_27 = arith.constant 0 : index
    %c0_28 = arith.constant 0 : index
    %31 = vector.load %arg11[%c0_27, %c0_28] : memref<1x128xf32, #tpu.memory_space<vmem>>, vector<1x128xf32>
    %32 = vector.broadcast %31 : vector<1x128xf32> to vector<8x128xf32>
    %33 = arith.addf %30, %32 : vector<8x128xf32>
    %c0_29 = arith.constant 0 : index
    %c0_30 = arith.constant 0 : index
    %34 = vector.load %arg12[%c0_29, %c0_30] : memref<8x128xf32, #tpu.memory_space<vmem>>, vector<8x128xf32>
    tpu.vector_store %arg12[%c0_29, %c0_30], %33 {strides = array<i32>} : memref<8x128xf32, #tpu.memory_space<vmem>>, vector<8x128xf32>,
    return
  }
  func.func @transform_0(%arg0: i32) -> (i32, i32) {
    %c0_i32 = arith.constant 0 : i32
    %c0_i32_0 = arith.constant 0 : i32
    return %arg0, %c0_i32 : i32, i32
  }
  func.func @transform_1(%arg0: i32) -> (i32, i32) {
    %c0_i32 = arith.constant 0 : i32
    %c0_i32_0 = arith.constant 0 : i32
    %c0_i32_1 = arith.constant 0 : i32
    return %c0_i32, %c0_i32_0 : i32, i32
  }
  func.func @transform_2(%arg0: i32) -> (i32, i32) {
    %c0_i32 = arith.constant 0 : i32
    %c0_i32_0 = arith.constant 0 : i32
    %c0_i32_1 = arith.constant 0 : i32
    return %c0_i32, %c0_i32_0 : i32, i32
  }
  func.func @transform_3(%arg0: i32) -> (i32, i32) {
    %c0_i32 = arith.constant 0 : i32
    %c0_i32_0 = arith.constant 0 : i32
    %c0_i32_1 = arith.constant 0 : i32
    return %c0_i32, %c0_i32_0 : i32, i32
  }
  func.func @transform_4(%arg0: i32) -> (i32, i32) {
    %c0_i32 = arith.constant 0 : i32
    %c0_i32_0 = arith.constant 0 : i32
    %c0_i32_1 = arith.constant 0 : i32
    return %c0_i32, %c0_i32_0 : i32, i32
  }
  func.func @transform_5(%arg0: i32) -> (i32, i32) {
    %c0_i32 = arith.constant 0 : i32
    %c0_i32_0 = arith.constant 0 : i32
    %c0_i32_1 = arith.constant 0 : i32
    return %c0_i32, %c0_i32_0 : i32, i32
  }
  func.func @transform_6(%arg0: i32) -> (i32, i32) {
    %c0_i32 = arith.constant 0 : i32
    %c0_i32_0 = arith.constant 0 : i32
    %c0_i32_1 = arith.constant 0 : i32
    return %c0_i32, %c0_i32_0 : i32, i32
  }
  func.func @transform_7(%arg0: i32) -> (i32, i32) {
    %c0_i32 = arith.constant 0 : i32
    %c0_i32_0 = arith.constant 0 : i32
    %c0_i32_1 = arith.constant 0 : i32
    return %c0_i32, %c0_i32_0 : i32, i32
  }
  func.func @transform_8(%arg0: i32) -> (i32, i32) {
    %c0_i32 = arith.constant 0 : i32
    %c0_i32_0 = arith.constant 0 : i32
    %c0_i32_1 = arith.constant 0 : i32
    return %c0_i32, %c0_i32_0 : i32, i32
  }
  func.func @transform_9(%arg0: i32) -> (i32, i32) {
    %c0_i32 = arith.constant 0 : i32
    %c0_i32_0 = arith.constant 0 : i32
    %c0_i32_1 = arith.constant 0 : i32
    return %c0_i32, %c0_i32_0 : i32, i32
  }
  func.func @transform_10(%arg0: i32) -> (i32, i32) {
    %c0_i32 = arith.constant 0 : i32
    %c0_i32_0 = arith.constant 0 : i32
    %c0_i32_1 = arith.constant 0 : i32
    return %c0_i32, %c0_i32_0 : i32, i32
  }
  func.func @transform_11(%arg0: i32) -> (i32, i32) {
    %c0_i32 = arith.constant 0 : i32
    %c0_i32_0 = arith.constant 0 : i32
    return %arg0, %c0_i32 : i32, i32
  }
}

</mosaic_0001>

<bundles_post_ra>
// kernel: encoder_cnn_forward.1
= control target key start
LH: loop header
LB: loop body
LE: loop exit
PB: predicated region body
PF: predicated region fallthrough
CT: control target
= control target key end

     0   :  { %16 = vsyncpa [#allocation3], 0  ;;  %s5311_s0 = inlined_call_operand.vmem [shape: f32[8,256], index: 0, kind: input, shape index: {}]   ;;  %s5312_s1 = inlined_call_operand.hbm [shape: f32[256,640], index: 1, kind: input, shape index: {}]   ;;  %s5313_s2 = inlined_call_operand.hbm [shape: f32[1,640], index: 2, kind: input, shape index: {}]   ;;  %s5314_s3 = inlined_call_operand.hbm [shape: f32[640,640], index: 3, kind: input, shape index: {}]   ;;  %s5315_s4 = inlined_call_operand.hbm [shape: f32[1,640], index: 4, kind: input, shape index: {}]   ;;  %s5316_s5 = inlined_call_operand.hbm [shape: f32[640,640], index: 5, kind: input, shape index: {}]   ;;  %s5317_s6 = inlined_call_operand.hbm [shape: f32[1,640], index: 6, kind: input, shape index: {}]   ;;  %s5318_s7 = inlined_call_operand.hbm [shape: f32[640,128], index: 7, kind: input, shape index: {}]   ;;  %s5319_s8 = inlined_call_operand.hbm [shape: f32[1,128], index: 8, kind: input, shape index: {}]   ;;  %s5320_s9 = inlined_call_operand.hbm [shape: f32[128,128], index: 9, kind: input, shape index: {}]   ;;  %s5321_s10 = inlined_call_operand.hbm [shape: f32[1,128], index: 10, kind: input, shape index: {}]   ;;  %s5322_s11 = inlined_call_operand.vmem [shape: f32[8,128], index: 11, kind: output, shape index: {}]  }
   0x1   :  { %17 = vsyncpa [#allocation5], 0 }
   0x2   :  { %18 = vsyncpa [#allocation8], 0 }
   0x3   :  { %19 = vsyncpa [#allocation11], 0 }
   0x4   :  { %20 = vsyncpa [#allocation14], 0 }
   0x5   :  { %21 = vsyncpa [#allocation17], 0  ;;  %s4924_s17 = smov [#allocation4]   ;;  %s4925_s19 = smov [#allocation7]  }
   0x6   :  { %s42_s18 = sshll.u32 %s4924_s17, 4  ;;  %s64_s20 = sshll.u32 %s4925_s19, 4  ;;  %s43_s18 = int_to_ptr.vmem [resolvable:$true] %s42_s18  ;;  %s65_s20 = int_to_ptr.vmem [resolvable:$true] %s64_s20 }
   0x7   :  { %s4692_s23 = scalar_lea.hbm %s5313_s2, 80 }
   0x8   :  { %p4693_p0 = scmp.ne.s32.totalorder %s5313_s2, %s4692_s23  ;;  %p4696_p1 = scmp.lt.u32.totalorder %s4692_s23, %s5313_s2 }
   0xa   :  { %p4698_p2 = pnand %p4696_p1, %p4693_p0 }
   0xc   :  { %4701 = shalt.err (!%p4698_p2)
}
   0xd   :  { %s4702_s28 = scalar_lea.vmem %s43_s18, 80  ;;  %s4706_s29 = scalar_lea.vmem %s43_s18, 96 }
   0xe   :  { %p4703_p3 = scmp.ne.s32.totalorder %s43_s18, %s4702_s28  ;;  %p4707_p4 = scmp.lt.s32.totalorder %s43_s18, %s43_s18 }
   0xf   :  { %p4708_p5 = scmp.lt.s32.totalorder %s4706_s29, %s4702_s28 }
  0x11   :  { %p4709_p6 = por %p4708_p5, %p4707_p4 }
  0x13   :  { %p4710_p7 = pnand %p4709_p6, %p4703_p3 }
  0x15   :  { %4713 = shalt.err (!%p4710_p7)
}
  0x16   :  { %45 = dma.hbm_to_vmem [thread:$0]  %s5313_s2, 80, %s43_s18, [#allocation5]  }
  0x17   :  { %s4714_s15 = scalar_lea.hbm %s5315_s4, 80 }
  0x18   :  { %p4715_p8 = scmp.ne.s32.totalorder %s5315_s4, %s4714_s15  ;;  %p4718_p9 = scmp.lt.u32.totalorder %s4714_s15, %s5315_s4 }
  0x1a   :  { %p4720_p10 = pnand %p4718_p9, %p4715_p8 }
  0x1c   :  { %4723 = shalt.err (!%p4720_p10)
}
  0x1d   :  { %s4724_s22 = scalar_lea.vmem %s65_s20, 80  ;;  %s4728_s23 = scalar_lea.vmem %s65_s20, 96 }
  0x1e   :  { %p4725_p11 = scmp.ne.s32.totalorder %s65_s20, %s4724_s22  ;;  %p4729_p12 = scmp.lt.s32.totalorder %s65_s20, %s65_s20 }
  0x1f   :  { %p4730_p13 = scmp.lt.s32.totalorder %s4728_s23, %s4724_s22 }
  0x21   :  { %p4731_p0 = por %p4730_p13, %p4729_p12 }
  0x23   :  { %p4732_p1 = pnand %p4731_p0, %p4725_p11 }
  0x25   :  { %4735 = shalt.err (!%p4732_p1)
}
  0x26   :  { %67 = dma.hbm_to_vmem [thread:$0]  %s5315_s4, 80, %s65_s20, [#allocation8]  }
  0x27   :  { %s4926_s24 = smov [#allocation10]   ;;  %s4927_s26 = smov [#allocation13]  }
  0x28   :  { %s86_s25 = sshll.u32 %s4926_s24, 4  ;;  %s108_s27 = sshll.u32 %s4927_s26, 4  ;;  %s87_s25 = int_to_ptr.vmem [resolvable:$true] %s86_s25  ;;  %s109_s27 = int_to_ptr.vmem [resolvable:$true] %s108_s27 }
  0x29   :  { %s4736_s30 = scalar_lea.hbm %s5317_s6, 80 }
  0x2a   :  { %p4737_p2 = scmp.ne.s32.totalorder %s5317_s6, %s4736_s30  ;;  %p4740_p3 = scmp.lt.u32.totalorder %s4736_s30, %s5317_s6 }
  0x2c   :  { %p4742_p4 = pnand %p4740_p3, %p4737_p2 }
  0x2e   :  { %4745 = shalt.err (!%p4742_p4)
}
  0x2f   :  { %s4746_s4 = scalar_lea.vmem %s87_s25, 80  ;;  %s4750_s20 = scalar_lea.vmem %s87_s25, 96 }
  0x30   :  { %p4747_p5 = scmp.ne.s32.totalorder %s87_s25, %s4746_s4  ;;  %p4751_p6 = scmp.lt.s32.totalorder %s87_s25, %s87_s25 }
  0x31   :  { %p4752_p7 = scmp.lt.s32.totalorder %s4750_s20, %s4746_s4 }
  0x33   :  { %p4753_p8 = por %p4752_p7, %p4751_p6 }
  0x35   :  { %p4754_p9 = pnand %p4753_p8, %p4747_p5 }
  0x37   :  { %4757 = shalt.err (!%p4754_p9)
}
  0x38   :  { %89 = dma.hbm_to_vmem [thread:$0]  %s5317_s6, 80, %s87_s25, [#allocation11]  }
  0x39   :  { %s4758_s22 = scalar_lea.hbm %s5319_s8, 16 }
  0x3a   :  { %p4759_p10 = scmp.ne.s32.totalorder %s5319_s8, %s4758_s22  ;;  %p4762_p11 = scmp.lt.u32.totalorder %s4758_s22, %s5319_s8 }
  0x3c   :  { %p4764_p12 = pnand %p4762_p11, %p4759_p10 }
  0x3e   :  { %4767 = shalt.err (!%p4764_p12)
}
  0x3f   :  { %s4768_s26 = scalar_lea.vmem %s109_s27, 16  ;;  %s4772_s28 = scalar_lea.vmem %s109_s27, 32 }
  0x40   :  { %p4769_p13 = scmp.ne.s32.totalorder %s109_s27, %s4768_s26  ;;  %p4773_p0 = scmp.lt.s32.totalorder %s109_s27, %s109_s27 }
  0x41   :  { %p4774_p1 = scmp.lt.s32.totalorder %s4772_s28, %s4768_s26 }
  0x43   :  { %p4775_p2 = por %p4774_p1, %p4773_p0 }
  0x45   :  { %p4776_p3 = pnand %p4775_p2, %p4769_p13 }
  0x47   :  { %4779 = shalt.err (!%p4776_p3)
}
  0x48   :  { %111 = dma.hbm_to_vmem [thread:$0]  %s5319_s8, 16, %s109_s27, [#allocation14]  }
  0x49   :  { %s4928_s29 = smov [#allocation2]   ;;  %s4780_s14 = scalar_lea.hbm %s5312_s1, 20480 }
  0x4a   :  { %s29_s30 = sshll.u32 %s4928_s29, 4  ;;  %p4781_p4 = scmp.ne.s32.totalorder %s5312_s1, %s4780_s14  ;;  %s30_s30 = int_to_ptr.vmem [resolvable:$true] %s29_s30 }
  0x4b   :  { %p4784_p5 = scmp.lt.u32.totalorder %s4780_s14, %s5312_s1 }
  0x4d   :  { %p4786_p6 = pnand %p4784_p5, %p4781_p4 }
  0x4f   :  { %4789 = shalt.err (!%p4786_p6)
}
  0x50   :  { %s4790_s17 = scalar_lea.vmem %s30_s30, 20480  ;;  %p4795_p8 = scmp.lt.s32.totalorder %s30_s30, %s30_s30 }
  0x51   :  { %p4791_p7 = scmp.ne.s32.totalorder %s30_s30, %s4790_s17  ;;  %p4796_p9 = scmp.lt.s32.totalorder %s4790_s17, %s4790_s17 }
  0x53   :  { %p4797_p10 = por %p4796_p9, %p4795_p8 }
  0x55   :  { %p4798_p11 = pnand %p4797_p10, %p4791_p7 }
  0x57   :  { %4801 = shalt.err (!%p4798_p11)
}
  0x58   :  { %s4929_s8 = smov 640   ;;  %s4930_s27 = smov 40  }
  0x59   :  { %35 = dma.hbm_to_vmem [thread:$0]  %s5312_s1, 20480, %s30_s30, [#allocation3], %s4929_s8, %s4929_s8, %s4930_s27  }
  0x5a   :  { %s4931_s22 = smov [#allocation6]   ;;  %s4932_s2 = smov [#allocation9]  }
  0x5b   :  { %s51_s23 = sshll.u32 %s4931_s22, 4  ;;  %s73_s18 = sshll.u32 %s4932_s2, 4  ;;  %s52_s23 = int_to_ptr.vmem [resolvable:$true] %s51_s23  ;;  %s74_s18 = int_to_ptr.vmem [resolvable:$true] %s73_s18 }
  0x5c   :  { %s4802_s28 = scalar_lea.hbm %s5314_s3, 51200 }
  0x5d   :  { %p4803_p12 = scmp.ne.s32.totalorder %s5314_s3, %s4802_s28  ;;  %p4806_p13 = scmp.lt.u32.totalorder %s4802_s28, %s5314_s3 }
  0x5f   :  { %p4808_p0 = pnand %p4806_p13, %p4803_p12 }
  0x61   :  { %4811 = shalt.err (!%p4808_p0)
}
  0x62   :  { %s4812_s1 = scalar_lea.vmem %s52_s23, 51200  ;;  %p4817_p2 = scmp.lt.s32.totalorder %s52_s23, %s52_s23 }
  0x63   :  { %p4813_p1 = scmp.ne.s32.totalorder %s52_s23, %s4812_s1  ;;  %p4818_p3 = scmp.lt.s32.totalorder %s4812_s1, %s4812_s1 }
  0x65   :  { %p4819_p4 = por %p4818_p3, %p4817_p2 }
  0x67   :  { %p4820_p5 = pnand %p4819_p4, %p4813_p1 }
  0x69   :  { %4823 = shalt.err (!%p4820_p5)
}
  0x6a   :  { %57 = dma.hbm_to_vmem [thread:$0]  %s5314_s3, 51200, %s52_s23, [#allocation5], %s4929_s8, %s4929_s8, %s4930_s27  }
  0x6b   :  { %s4824_s4 = scalar_lea.hbm %s5316_s5, 51200 }
  0x6c   :  { %p4825_p6 = scmp.ne.s32.totalorder %s5316_s5, %s4824_s4  ;;  %p4828_p7 = scmp.lt.u32.totalorder %s4824_s4, %s5316_s5 }
  0x6e   :  { %p4830_p8 = pnand %p4828_p7, %p4825_p6 }
  0x70   :  { %4833 = shalt.err (!%p4830_p8)
}
  0x71   :  { %s4834_s21 = scalar_lea.vmem %s74_s18, 51200  ;;  %p4839_p10 = scmp.lt.s32.totalorder %s74_s18, %s74_s18 }
  0x72   :  { %p4835_p9 = scmp.ne.s32.totalorder %s74_s18, %s4834_s21  ;;  %p4840_p11 = scmp.lt.s32.totalorder %s4834_s21, %s4834_s21 }
  0x74   :  { %p4841_p12 = por %p4840_p11, %p4839_p10 }
  0x76   :  { %p4842_p13 = pnand %p4841_p12, %p4835_p9 }
  0x78   :  { %4845 = shalt.err (!%p4842_p13)
}
  0x79   :  { %79 = dma.hbm_to_vmem [thread:$0]  %s5316_s5, 51200, %s74_s18, [#allocation8], %s4929_s8, %s4929_s8, %s4930_s27  }
  0x7a   :  { %s4933_s23 = smov [#allocation12]   ;;  %s4846_s28 = scalar_lea.hbm %s5318_s7, 10240 }
  0x7b   :  { %s95_s2 = sshll.u32 %s4933_s23, 4  ;;  %p4847_p0 = scmp.ne.s32.totalorder %s5318_s7, %s4846_s28  ;;  %s96_s2 = int_to_ptr.vmem [resolvable:$true] %s95_s2 }
  0x7c   :  { %p4850_p1 = scmp.lt.u32.totalorder %s4846_s28, %s5318_s7 }
  0x7e   :  { %p4852_p2 = pnand %p4850_p1, %p4847_p0 }
  0x80   :  { %4855 = shalt.err (!%p4852_p2)
}
  0x81   :  { %s4856_s1 = scalar_lea.vmem %s96_s2, 10240  ;;  %p4861_p4 = scmp.lt.s32.totalorder %s96_s2, %s96_s2 }
  0x82   :  { %p4857_p3 = scmp.ne.s32.totalorder %s96_s2, %s4856_s1  ;;  %p4862_p5 = scmp.lt.s32.totalorder %s4856_s1, %s4856_s1 }
  0x84   :  { %p4863_p6 = por %p4862_p5, %p4861_p4 }
  0x86   :  { %p4864_p7 = pnand %p4863_p6, %p4857_p3 }
  0x88   :  { %4867 = shalt.err (!%p4864_p7)
}
  0x89   :  { %s4934_s5 = smov 128   ;;  %s4935_s8 = smov 8  }
  0x8a   :  { %101 = dma.hbm_to_vmem [thread:$0]  %s5318_s7, 10240, %s96_s2, [#allocation11], %s4934_s5, %s4934_s5, %s4935_s8  }
  0x8b   :  { %s4936_s30 = smov [#allocation15]   ;;  %s4937_s14 = smov [#allocation16]  }
  0x8c   :  { %s117_s13 = sshll.u32 %s4936_s30, 4  ;;  %s130_s15 = sshll.u32 %s4937_s14, 4  ;;  %s118_s13 = int_to_ptr.vmem [resolvable:$true] %s117_s13  ;;  %s131_s15 = int_to_ptr.vmem [resolvable:$true] %s130_s15 }
  0x8d   :  { %s4868_s16 = scalar_lea.hbm %s5320_s9, 2048 }
  0x8e   :  { %p4869_p8 = scmp.ne.s32.totalorder %s5320_s9, %s4868_s16  ;;  %p4872_p9 = scmp.lt.u32.totalorder %s4868_s16, %s5320_s9 }
  0x90   :  { %p4874_p10 = pnand %p4872_p9, %p4869_p8 }
  0x92   :  { %4877 = shalt.err (!%p4874_p10)
}
  0x93   :  { %s4878_s7 = scalar_lea.vmem %s118_s13, 2048  ;;  %p4883_p12 = scmp.lt.s32.totalorder %s118_s13, %s118_s13 }
  0x94   :  { %p4879_p11 = scmp.ne.s32.totalorder %s118_s13, %s4878_s7  ;;  %p4884_p13 = scmp.lt.s32.totalorder %s4878_s7, %s4878_s7 }
  0x96   :  { %p4885_p0 = por %p4884_p13, %p4883_p12 }
  0x98   :  { %p4886_p1 = pnand %p4885_p0, %p4879_p11 }
  0x9a   :  { %4889 = shalt.err (!%p4886_p1)
}
  0x9b   :  { %123 = dma.hbm_to_vmem [thread:$0]  %s5320_s9, 2048, %s118_s13, [#allocation14], %s4934_s5, %s4934_s5, %s4935_s8  }
  0x9c   :  { %s4890_s26 = scalar_lea.hbm %s5321_s10, 16 }
  0x9d   :  { %p4891_p2 = scmp.ne.s32.totalorder %s5321_s10, %s4890_s26  ;;  %p4894_p3 = scmp.lt.u32.totalorder %s4890_s26, %s5321_s10 }
  0x9f   :  { %p4896_p4 = pnand %p4894_p3, %p4891_p2 }
  0xa1   :  { %4899 = shalt.err (!%p4896_p4)
}
  0xa2   :  { %s4900_s12 = scalar_lea.vmem %s131_s15, 16  ;;  %s4904_s1 = scalar_lea.vmem %s131_s15, 32 }
  0xa3   :  { %p4901_p5 = scmp.ne.s32.totalorder %s131_s15, %s4900_s12  ;;  %p4905_p6 = scmp.lt.s32.totalorder %s131_s15, %s131_s15 }
  0xa4   :  { %p4906_p7 = scmp.lt.s32.totalorder %s4904_s1, %s4900_s12 }
  0xa6   :  { %p4907_p8 = por %p4906_p7, %p4905_p6 }
  0xa8   :  { %p4908_p9 = pnand %p4907_p8, %p4901_p5 }
  0xaa   :  { %4911 = shalt.err (!%p4908_p9)
}
  0xab   :  { %133 = dma.hbm_to_vmem [thread:$0]  %s5321_s10, 16, %s131_s15, [#allocation17]  }
  0xac   :  { %4912 = dma.done.wait [#allocation3], 20480  }
  0xad   :  { %4913 = vsyncadd [#allocation3], 4294946816 }
  0xae   :  { %4914 = dma.done.wait [#allocation5], 51280  }
  0xaf   :  { %4915 = vsyncadd [#allocation5], 4294916016 }
  0xb0   :  { %4916 = dma.done.wait [#allocation8], 51280  }
  0xb1   :  { %4917 = vsyncadd [#allocation8], 4294916016 }
  0xb2   :  { %4918 = dma.done.wait [#allocation11], 10320  }
  0xb3   :  { %4919 = vsyncadd [#allocation11], 4294956976 }
  0xb4   :  { %4920 = dma.done.wait [#allocation14], 2064  }
  0xb5   :  { %4921 = vsyncadd [#allocation14], 4294965232 }
  0xb6   :  { %4922 = dma.done.wait [#allocation17], 16  }
  0xb7   :  { %4923 = vsyncadd [#allocation17], 4294967280  ;;  %v167_v0 = vld [vmem:[#allocation2 + $0x8] sm:$0xff]  ;;  %v172_v1 = vld [vmem:[#allocation2 + $0x30] sm:$0xff]  ;;  %vm4940_vm0 = vmmov 0  }
  0xb8   :  { %v166_v2 = vld [vmem:[#allocation2] sm:$0xff]  ;;  %v3563_v3 = vpack.c.bf16 %v172_v1, %v167_v0  ;;  %v171_v4 = vld [vmem:[#allocation2 + $0x28] sm:$0xff]  ;;  %v177_v5 = vld [vmem:[#allocation2 + $0x58] sm:$0xff] }
  0xb9   :  { %v182_v6 = vld [vmem:[#allocation2 + $0x80] sm:$0xff]  ;;  %v3565_v7 = vpack.c.bf16 %v171_v4, %v166_v2  ;;  %v176_v9 = vld [vmem:[#allocation2 + $0x50] sm:$0xff]  ;;  %v181_v10 = vld [vmem:[#allocation2 + $0x78] sm:$0xff] }
  0xba   :  { %v3567_v8 = vpack.c.bf16 %v182_v6, %v177_v5  ;;  %v187_v11 = vld [vmem:[#allocation2 + $0xa8] sm:$0xff]  ;;  %3564 = vmatprep.subr.bf16.mxu0 %v3563_v3  ;;  %v192_v12 = vld [vmem:[#allocation2 + $0xd0] sm:$0xff]  ;;  %v3569_v13 = vpack.c.bf16 %v181_v10, %v176_v9  ;;  %v186_v15 = vld [vmem:[#allocation2 + $0xa0] sm:$0xff] }
  0xbb   :  { %3566 = vmatpush1.bf16.msra.mxu0 %v3565_v7  ;;  %v3571_v14 = vpack.c.bf16 %v192_v12, %v187_v11  ;;  %v191_v16 = vld [vmem:[#allocation2 + $0xc8] sm:$0xff]  ;;  %v197_v17 = vld [vmem:[#allocation2 + $0xf8] sm:$0xff]  ;;  %v202_v18 = vld [vmem:[#allocation2 + $0x120] sm:$0xff] }
  0xbc   :  { %3568 = vmatprep.subr.bf16.mxu0 %v3567_v8  ;;  %v3573_v19 = vpack.c.bf16 %v191_v16, %v186_v15  ;;  %v3575_v20 = vpack.c.bf16 %v202_v18, %v197_v17  ;;  %v196_v21 = vld [vmem:[#allocation2 + $0xf0] sm:$0xff]  ;;  %v201_v22 = vld [vmem:[#allocation2 + $0x118] sm:$0xff]  ;;  %v207_v23 = vld [vmem:[#allocation2 + $0x148] sm:$0xff] }
  0xbd   :  { %v212_v24 = vld [vmem:[#allocation2 + $0x170] sm:$0xff]  ;;  %v3577_v25 = vpack.c.bf16 %v201_v22, %v196_v21  ;;  %v206_v27 = vld [vmem:[#allocation2 + $0x140] sm:$0xff]  ;;  %v211_v28 = vld [vmem:[#allocation2 + $0x168] sm:$0xff] }
  0xbe   :  { %v3579_v26 = vpack.c.bf16 %v212_v24, %v207_v23  ;;  %v217_v29 = vld [vmem:[#allocation2 + $0x198] sm:$0xff]  ;;  %v222_v30 = vld [vmem:[#allocation2 + $0x1c0] sm:$0xff]  ;;  %v3581_v31 = vpack.c.bf16 %v211_v28, %v206_v27  ;;  %v216_v33 = vld [vmem:[#allocation2 + $0x190] sm:$0xff] }
  0xbf   :  { %3570 = vmatpush1.bf16.msra.mxu0 %v3569_v13  ;;  %v3583_v32 = vpack.c.bf16 %v222_v30, %v217_v29  ;;  %v221_v34 = vld [vmem:[#allocation2 + $0x1b8] sm:$0xff]  ;;  %v227_v35 = vld [vmem:[#allocation2 + $0x1e8] sm:$0xff]  ;;  %v232_v36 = vld [vmem:[#allocation2 + $0x210] sm:$0xff] }
  0xc0   :  { %3572 = vmatprep.subr.bf16.mxu0 %v3571_v14  ;;  %v3585_v37 = vpack.c.bf16 %v221_v34, %v216_v33  ;;  %v226_v38 = vld [vmem:[#allocation2 + $0x1e0] sm:$0xff]  ;;  %v231_v39 = vld [vmem:[#allocation2 + $0x208] sm:$0xff]  ;;  %v3587_v40 = vpack.c.bf16 %v232_v36, %v227_v35  ;;  %v237_v41 = vld [vmem:[#allocation2 + $0x238] sm:$0xff] }
  0xc1   :  { %v5133_v42 = vld [vmem:[%s5311_s0 + $0x8] sm:$0xff]  ;;  %v169_v43 = vld [vmem:[#allocation2 + $0x18] sm:$0xff]  ;;  %v242_v44 = vld [vmem:[#allocation2 + $0x260] sm:$0xff]  ;;  %v3589_v51 = vpack.c.bf16 %v231_v39, %v226_v38 }
  0xc2   :  { %417 = vmatprep.mubr.f32.mxu0 %v5133_v42  ;;  %v174_v45 = vld [vmem:[#allocation2 + $0x40] sm:$0xff]  ;;  %v168_v46 = vld [vmem:[#allocation2 + $0x10] sm:$0xff]  ;;  %488 = vmatprep.mubr.f32.mxu1 %v5133_v42  ;;  %v173_v48 = vld [vmem:[#allocation2 + $0x38] sm:$0xff]  ;;  %v3591_v57 = vpack.c.bf16 %v242_v44, %v237_v41 }
  0xc3   :  { %3574 = vmatpush1.bf16.msra.mxu0 %v3573_v19  ;;  %v3627_v47 = vpack.c.bf16 %v174_v45, %v169_v43  ;;  %v179_v49 = vld [vmem:[#allocation2 + $0x68] sm:$0xff]  ;;  %v184_v50 = vld [vmem:[#allocation2 + $0x90] sm:$0xff]  ;;  %v3629_v52 = vpack.c.bf16 %v173_v48, %v168_v46  ;;  %v178_v54 = vld [vmem:[#allocation2 + $0x60] sm:$0xff] }
  0xc4   :  { %3576 = vmatprep.subr.bf16.mxu0 %v3575_v20  ;;  %v3631_v53 = vpack.c.bf16 %v184_v50, %v179_v49  ;;  %v183_v55 = vld [vmem:[#allocation2 + $0x88] sm:$0xff]  ;;  %v189_v56 = vld [vmem:[#allocation2 + $0xb8] sm:$0xff]  ;;  %v236_v58 = vld [vmem:[#allocation2 + $0x230] sm:$0xff] }
  0xc5   :  { %v241_v59 = vld [vmem:[#allocation2 + $0x258] sm:$0xff]  ;;  %3628 = vmatprep.subr.bf16.mxu1 %v3627_v47  ;;  %v194_v60 = vld [vmem:[#allocation2 + $0xe0] sm:$0xff]  ;;  %v247_v61 = vld [vmem:[#allocation2 + $0x288] sm:$0xff]  ;;  %v3633_v63 = vpack.c.bf16 %v183_v55, %v178_v54 }
  0xc6   :  { %v252_v62 = vld [vmem:[#allocation2 + $0x2b0] sm:$0xff]  ;;  %3630 = vmatpush1.bf16.msra.mxu1 %v3629_v52  ;;  %v3635_v0 = vpack.c.bf16 %v194_v60, %v189_v56  ;;  %v193_v2 = vld [vmem:[#allocation2 + $0xd8] sm:$0xff]  ;;  %v3593_v3 = vpack.c.bf16 %v241_v59, %v236_v58  ;;  %v199_v4 = vld [vmem:[#allocation2 + $0x108] sm:$0xff] }
  0xc7   :  { %3578 = vmatpush1.bf16.msra.mxu0 %v3577_v25  ;;  %3632 = vmatprep.subr.bf16.mxu1 %v3631_v53  ;;  %v188_v1 = vld [vmem:[#allocation2 + $0xb0] sm:$0xff]  ;;  %v3595_v6 = vpack.c.bf16 %v252_v62, %v247_v61  ;;  %v246_v7 = vld [vmem:[#allocation2 + $0x280] sm:$0xff]  ;;  %v251_v8 = vld [vmem:[#allocation2 + $0x2a8] sm:$0xff] }
  0xc8   :  { %3580 = vmatprep.subr.bf16.mxu0 %v3579_v26  ;;  %v204_v5 = vld [vmem:[#allocation2 + $0x130] sm:$0xff]  ;;  %v257_v9 = vld [vmem:[#allocation2 + $0x2d8] sm:$0xff]  ;;  %v262_v10 = vld [vmem:[#allocation2 + $0x300] sm:$0xff]  ;;  %v3637_v11 = vpack.c.bf16 %v193_v2, %v188_v1  ;;  %v3597_v15 = vpack.c.bf16 %v251_v8, %v246_v7 }
  0xc9   :  { %v3639_v12 = vpack.c.bf16 %v204_v5, %v199_v4  ;;  %v198_v13 = vld [vmem:[#allocation2 + $0x100] sm:$0xff]  ;;  %v203_v14 = vld [vmem:[#allocation2 + $0x128] sm:$0xff]  ;;  %v209_v16 = vld [vmem:[#allocation2 + $0x158] sm:$0xff]  ;;  %v3599_v18 = vpack.c.bf16 %v262_v10, %v257_v9 }
  0xca   :  { %3634 = vmatpush1.bf16.msra.mxu1 %v3633_v63  ;;  %v214_v17 = vld [vmem:[#allocation2 + $0x180] sm:$0xff]  ;;  %v256_v19 = vld [vmem:[#allocation2 + $0x2d0] sm:$0xff]  ;;  %v261_v20 = vld [vmem:[#allocation2 + $0x2f8] sm:$0xff]  ;;  %v3641_v23 = vpack.c.bf16 %v203_v14, %v198_v13 }
  0xcb   :  { %3582 = vmatpush1.bf16.msra.mxu0 %v3581_v31  ;;  %3636 = vmatprep.subr.bf16.mxu1 %v3635_v0  ;;  %v267_v21 = vld [vmem:[#allocation2 + $0x328] sm:$0xff]  ;;  %v272_v22 = vld [vmem:[#allocation2 + $0x350] sm:$0xff]  ;;  %v3643_v24 = vpack.c.bf16 %v214_v17, %v209_v16  ;;  %v213_v26 = vld [vmem:[#allocation2 + $0x178] sm:$0xff]  ;;  %v3601_v27 = vpack.c.bf16 %v261_v20, %v256_v19 }
  0xcc   :  { %3584 = vmatprep.subr.bf16.mxu0 %v3583_v32  ;;  %v208_v25 = vld [vmem:[#allocation2 + $0x150] sm:$0xff]  ;;  %v219_v28 = vld [vmem:[#allocation2 + $0x1a8] sm:$0xff]  ;;  %v3603_v30 = vpack.c.bf16 %v272_v22, %v267_v21  ;;  %v266_v31 = vld [vmem:[#allocation2 + $0x320] sm:$0xff] }
  0xcd   :  { %v224_v29 = vld [vmem:[#allocation2 + $0x1d0] sm:$0xff]  ;;  %v271_v32 = vld [vmem:[#allocation2 + $0x348] sm:$0xff]  ;;  %v277_v33 = vld [vmem:[#allocation2 + $0x378] sm:$0xff]  ;;  %v3645_v35 = vpack.c.bf16 %v213_v26, %v208_v25 }
  0xce   :  { %3638 = vmatpush1.bf16.msra.mxu1 %v3637_v11  ;;  %v282_v34 = vld [vmem:[#allocation2 + $0x3a0] sm:$0xff]  ;;  %v3647_v36 = vpack.c.bf16 %v224_v29, %v219_v28  ;;  %v223_v38 = vld [vmem:[#allocation2 + $0x1c8] sm:$0xff]  ;;  %v3605_v39 = vpack.c.bf16 %v271_v32, %v266_v31  ;;  %v276_v44 = vld [vmem:[#allocation2 + $0x370] sm:$0xff] }
  0xcf   :  { %3586 = vmatpush1.bf16.msra.mxu0 %v3585_v37  ;;  %3640 = vmatprep.subr.bf16.mxu1 %v3639_v12  ;;  %v218_v37 = vld [vmem:[#allocation2 + $0x1a0] sm:$0xff]  ;;  %v3607_v43 = vpack.c.bf16 %v282_v34, %v277_v33  ;;  %v281_v45 = vld [vmem:[#allocation2 + $0x398] sm:$0xff]  ;;  %v287_v46 = vld [vmem:[#allocation2 + $0x3c8] sm:$0xff] }
  0xd0   :  { %3588 = vmatprep.subr.bf16.mxu0 %v3587_v40  ;;  %v229_v40 = vld [vmem:[#allocation2 + $0x1f8] sm:$0xff]  ;;  %v234_v41 = vld [vmem:[#allocation2 + $0x220] sm:$0xff]  ;;  %v292_v47 = vld [vmem:[#allocation2 + $0x3f0] sm:$0xff]  ;;  %v3649_v48 = vpack.c.bf16 %v223_v38, %v218_v37  ;;  %v3609_v52 = vpack.c.bf16 %v281_v45, %v276_v44 }
  0xd1   :  { %v3651_v49 = vpack.c.bf16 %v234_v41, %v229_v40  ;;  %v228_v50 = vld [vmem:[#allocation2 + $0x1f0] sm:$0xff]  ;;  %v239_v53 = vld [vmem:[#allocation2 + $0x248] sm:$0xff]  ;;  %v3611_v55 = vpack.c.bf16 %v292_v47, %v287_v46  ;;  %v286_v56 = vld [vmem:[#allocation2 + $0x3c0] sm:$0xff] }
  0xd2   :  { %3642 = vmatpush1.bf16.msra.mxu1 %v3641_v23  ;;  %v244_v54 = vld [vmem:[#allocation2 + $0x270] sm:$0xff]  ;;  %v297_v58 = vld [vmem:[#allocation2 + $0x418] sm:$0xff]  ;;  %v302_v59 = vld [vmem:[#allocation2 + $0x440] sm:$0xff] }
  0xd3   :  { %3590 = vmatpush1.bf16.msra.mxu0 %v3589_v51  ;;  %3644 = vmatprep.subr.bf16.mxu1 %v3643_v24  ;;  %v233_v51 = vld [vmem:[#allocation2 + $0x218] sm:$0xff]  ;;  %v3655_v61 = vpack.c.bf16 %v244_v54, %v239_v53  ;;  %v238_v62 = vld [vmem:[#allocation2 + $0x240] sm:$0xff]  ;;  %v243_v63 = vld [vmem:[#allocation2 + $0x268] sm:$0xff] }
  0xd4   :  { %3592 = vmatprep.subr.bf16.mxu0 %v3591_v57  ;;  %v291_v57 = vld [vmem:[#allocation2 + $0x3e8] sm:$0xff]  ;;  %v3653_v60 = vpack.c.bf16 %v233_v51, %v228_v50  ;;  %v249_v1 = vld [vmem:[#allocation2 + $0x298] sm:$0xff]  ;;  %v254_v2 = vld [vmem:[#allocation2 + $0x2c0] sm:$0xff]  ;;  %v3657_v8 = vpack.c.bf16 %v243_v63, %v238_v62 }
  0xd5   :  { %v3613_v0 = vpack.c.bf16 %v291_v57, %v286_v56  ;;  %v296_v4 = vld [vmem:[#allocation2 + $0x410] sm:$0xff]  ;;  %v301_v5 = vld [vmem:[#allocation2 + $0x438] sm:$0xff]  ;;  %v3659_v9 = vpack.c.bf16 %v254_v2, %v249_v1  ;;  %v259_v13 = vld [vmem:[#allocation2 + $0x2e8] sm:$0xff] }
  0xd6   :  { %3646 = vmatpush1.bf16.msra.mxu1 %v3645_v35  ;;  %v312_v7 = vld [vmem:[#allocation2 + $0x490] sm:$0xff]  ;;  %v253_v11 = vld [vmem:[#allocation2 + $0x2b8] sm:$0xff]  ;;  %v3617_v12 = vpack.c.bf16 %v301_v5, %v296_v4  ;;  %v306_v16 = vld [vmem:[#allocation2 + $0x460] sm:$0xff] }
  0xd7   :  { %3594 = vmatpush1.bf16.msra.mxu0 %v3593_v3  ;;  %3648 = vmatprep.subr.bf16.mxu1 %v3647_v36  ;;  %v3615_v3 = vpack.c.bf16 %v302_v59, %v297_v58  ;;  %v248_v10 = vld [vmem:[#allocation2 + $0x290] sm:$0xff]  ;;  %v311_v17 = vld [vmem:[#allocation2 + $0x488] sm:$0xff]  ;;  %v322_v19 = vld [vmem:[#allocation2 + $0x4e0] sm:$0xff] }
  0xd8   :  { %3596 = vmatprep.subr.bf16.mxu0 %v3595_v6  ;;  %v307_v6 = vld [vmem:[#allocation2 + $0x468] sm:$0xff]  ;;  %v264_v14 = vld [vmem:[#allocation2 + $0x310] sm:$0xff]  ;;  %v3661_v20 = vpack.c.bf16 %v253_v11, %v248_v10  ;;  %v258_v22 = vld [vmem:[#allocation2 + $0x2e0] sm:$0xff]  ;;  %v3621_v24 = vpack.c.bf16 %v311_v17, %v306_v16 }
  0xd9   :  { %v3663_v21 = vpack.c.bf16 %v264_v14, %v259_v13  ;;  %v263_v23 = vld [vmem:[#allocation2 + $0x308] sm:$0xff]  ;;  %v269_v25 = vld [vmem:[#allocation2 + $0x338] sm:$0xff]  ;;  %v274_v26 = vld [vmem:[#allocation2 + $0x360] sm:$0xff] }
  0xda   :  { %3650 = vmatpush1.bf16.msra.mxu1 %v3649_v48  ;;  %v316_v28 = vld [vmem:[#allocation2 + $0x4b0] sm:$0xff]  ;;  %v321_v29 = vld [vmem:[#allocation2 + $0x4d8] sm:$0xff]  ;;  %v250_v31 = vld [vmem:[#allocation2 + $0x2a0] sm:$0xff]  ;;  %v3667_v33 = vpack.c.bf16 %v274_v26, %v269_v25 }
  0xdb   :  { %3598 = vmatpush1.bf16.msra.mxu0 %v3597_v15  ;;  %3652 = vmatprep.subr.bf16.mxu1 %v3651_v49  ;;  %v3619_v15 = vpack.c.bf16 %v312_v7, %v307_v6  ;;  %v255_v32 = vld [vmem:[#allocation2 + $0x2c8] sm:$0xff]  ;;  %v268_v34 = vld [vmem:[#allocation2 + $0x330] sm:$0xff]  ;;  %v273_v35 = vld [vmem:[#allocation2 + $0x358] sm:$0xff]  ;;  %v3625_v36 = vpack.c.bf16 %v321_v29, %v316_v28 }
  0xdc   :  { %3600 = vmatprep.subr.bf16.mxu0 %v3599_v18  ;;  %v317_v18 = vld [vmem:[#allocation2 + $0x4b8] sm:$0xff]  ;;  %v279_v37 = vld [vmem:[#allocation2 + $0x388] sm:$0xff]  ;;  %v284_v38 = vld [vmem:[#allocation2 + $0x3b0] sm:$0xff] }
  0xdd   :  { %v170_v40 = vld [vmem:[#allocation2 + $0x20] sm:$0xff]  ;;  %v175_v41 = vld [vmem:[#allocation2 + $0x48] sm:$0xff]  ;;  %v260_v44 = vld [vmem:[#allocation2 + $0x2f0] sm:$0xff]  ;;  %v3671_v46 = vpack.c.bf16 %v284_v38, %v279_v37 }
  0xde   :  { %3654 = vmatpush1.bf16.msra.mxu1 %v3653_v60  ;;  %v265_v45 = vld [vmem:[#allocation2 + $0x318] sm:$0xff]  ;;  %v278_v47 = vld [vmem:[#allocation2 + $0x380] sm:$0xff]  ;;  %v283_v48 = vld [vmem:[#allocation2 + $0x3a8] sm:$0xff] }
  0xdf   :  { %3602 = vmatpush1.bf16.msra.mxu0 %v3601_v27  ;;  %3656 = vmatprep.subr.bf16.mxu1 %v3655_v61  ;;  %v3623_v27 = vpack.c.bf16 %v322_v19, %v317_v18  ;;  %v5140_v49 = vld [vmem:[%s5311_s0] sm:$0xff]  ;;  %v289_v50 = vld [vmem:[#allocation2 + $0x3d8] sm:$0xff]  ;;  %v3695_v53 = vpack.c.bf16 %v265_v45, %v260_v44  ;;  %v180_v54 = vld [vmem:[#allocation2 + $0x70] sm:$0xff]  ;;  %v3673_v56 = vpack.c.bf16 %v283_v48, %v278_v47 }
  0xe0   :  { %3604 = vmatprep.subr.bf16.mxu0 %v3603_v30  ;;  %v3665_v30 = vpack.c.bf16 %v263_v23, %v258_v22  ;;  %v294_v51 = vld [vmem:[#allocation2 + $0x400] sm:$0xff]  ;;  %v275_v58 = vld [vmem:[#allocation2 + $0x368] sm:$0xff]  ;;  %v288_v60 = vld [vmem:[#allocation2 + $0x3d0] sm:$0xff] }
  0xe1   :  { %v270_v57 = vld [vmem:[#allocation2 + $0x340] sm:$0xff]  ;;  %v3675_v59 = vpack.c.bf16 %v294_v51, %v289_v50  ;;  %v293_v61 = vld [vmem:[#allocation2 + $0x3f8] sm:$0xff]  ;;  %v299_v62 = vld [vmem:[#allocation2 + $0x428] sm:$0xff] }
  0xe2   :  { %3658 = vmatpush1.bf16.msra.mxu1 %v3657_v8  ;;  %v304_v63 = vld [vmem:[#allocation2 + $0x450] sm:$0xff]  ;;  %v3699_v1 = vpack.c.bf16 %v275_v58, %v270_v57  ;;  %v190_v2 = vld [vmem:[#allocation2 + $0xc0] sm:$0xff]  ;;  %v3677_v4 = vpack.c.bf16 %v293_v61, %v288_v60  ;;  %v285_v6 = vld [vmem:[#allocation2 + $0x3b8] sm:$0xff] }
  0xe3   :  { %3606 = vmatpush1.bf16.msra.mxu0 %v3605_v39  ;;  %3660 = vmatprep.subr.bf16.mxu1 %v3659_v9  ;;  %v3691_v39 = vpack.c.bf16 %v255_v32, %v250_v31  ;;  %v280_v5 = vld [vmem:[#allocation2 + $0x390] sm:$0xff]  ;;  %v3679_v7 = vpack.c.bf16 %v304_v63, %v299_v62  ;;  %v298_v8 = vld [vmem:[#allocation2 + $0x420] sm:$0xff]  ;;  %v303_v9 = vld [vmem:[#allocation2 + $0x448] sm:$0xff] }
  0xe4   :  { %3608 = vmatprep.subr.bf16.mxu0 %v3607_v43  ;;  %v3669_v43 = vpack.c.bf16 %v273_v35, %v268_v34  ;;  %v309_v10 = vld [vmem:[#allocation2 + $0x478] sm:$0xff]  ;;  %v314_v11 = vld [vmem:[#allocation2 + $0x4a0] sm:$0xff]  ;;  %v3703_v13 = vpack.c.bf16 %v285_v6, %v280_v5  ;;  %v200_v14 = vld [vmem:[#allocation2 + $0x110] sm:$0xff] }
  0xe5   :  { %v290_v16 = vld [vmem:[#allocation2 + $0x3e0] sm:$0xff]  ;;  %v295_v17 = vld [vmem:[#allocation2 + $0x408] sm:$0xff]  ;;  %v3683_v18 = vpack.c.bf16 %v314_v11, %v309_v10  ;;  %v308_v19 = vld [vmem:[#allocation2 + $0x470] sm:$0xff] }
  0xe6   :  { %3662 = vmatpush1.bf16.msra.mxu1 %v3661_v20  ;;  %v313_v20 = vld [vmem:[#allocation2 + $0x498] sm:$0xff]  ;;  %v324_v22 = vld [vmem:[#allocation2 + $0x4f0] sm:$0xff]  ;;  %v210_v25 = vld [vmem:[#allocation2 + $0x160] sm:$0xff] }
  0xe7   :  { %3610 = vmatpush1.bf16.msra.mxu0 %v3609_v52  ;;  %3664 = vmatprep.subr.bf16.mxu1 %v3663_v21  ;;  %v3693_v52 = vpack.c.bf16 %v175_v41, %v170_v40  ;;  %v319_v21 = vld [vmem:[#allocation2 + $0x4c8] sm:$0xff]  ;;  %v300_v28 = vld [vmem:[#allocation2 + $0x430] sm:$0xff]  ;;  %v305_v29 = vld [vmem:[#allocation2 + $0x458] sm:$0xff] }
  0xe8   :  { %3612 = vmatprep.subr.bf16.mxu0 %v3611_v55  ;;  %v185_v55 = vld [vmem:[#allocation2 + $0x98] sm:$0xff]  ;;  %v215_v26 = vld [vmem:[#allocation2 + $0x188] sm:$0xff]  ;;  %v318_v31 = vld [vmem:[#allocation2 + $0x4c0] sm:$0xff] }
  0xe9   :  { %v323_v32 = vld [vmem:[#allocation2 + $0x4e8] sm:$0xff]  ;;  %v576_v35 = vld [vmem:[#allocation6 + $0x30] sm:$0xff]  ;;  %v310_v40 = vld [vmem:[#allocation2 + $0x480] sm:$0xff] }
  0xea   :  { %3666 = vmatpush1.bf16.msra.mxu1 %v3665_v30  ;;  %v3687_v30 = vpack.c.bf16 %v324_v22, %v319_v21  ;;  %v571_v34 = vld [vmem:[#allocation6 + $0x8] sm:$0xff]  ;;  %v225_v38 = vld [vmem:[#allocation2 + $0x1d8] sm:$0xff]  ;;  %v570_v44 = vld [vmem:[#allocation6] sm:$0xff] }
  0xeb   :  { %3614 = vmatpush1.bf16.msra.mxu0 %v3613_v0  ;;  %3668 = vmatprep.subr.bf16.mxu1 %v3667_v33  ;;  %v3697_v0 = vpack.c.bf16 %v185_v55, %v180_v54  ;;  %v3709_v33 = vpack.c.bf16 %v215_v26, %v210_v25  ;;  %v220_v37 = vld [vmem:[#allocation2 + $0x1b0] sm:$0xff]  ;;  %v315_v41 = vld [vmem:[#allocation2 + $0x4a8] sm:$0xff]  ;;  %v581_v47 = vld [vmem:[#allocation6 + $0x58] sm:$0xff] }
  0xec   :  { %3616 = vmatprep.subr.bf16.mxu0 %v3615_v3  ;;  %v195_v3 = vld [vmem:[#allocation2 + $0xe8] sm:$0xff]  ;;  %v3715_v50 = vpack.c.bf16 %v315_v41, %v310_v40  ;;  %v230_v51 = vld [vmem:[#allocation2 + $0x200] sm:$0xff]  ;;  %v325_v54 = vld [vmem:[#allocation2 + $0x4f8] sm:$0xff] }
  0xed   :  { %v575_v45 = vld [vmem:[#allocation6 + $0x28] sm:$0xff]  ;;  %v586_v48 = vld [vmem:[#allocation6 + $0x80] sm:$0xff]  ;;  %v580_v57 = vld [vmem:[#allocation6 + $0x50] sm:$0xff] }
  0xee   :  { %3670 = vmatpush1.bf16.msra.mxu1 %v3669_v43  ;;  %v3723_v43 = vpack.c.bf16 %v576_v35, %v571_v34  ;;  %v3725_v55 = vpack.c.bf16 %v575_v45, %v570_v44  ;;  %v585_v58 = vld [vmem:[#allocation6 + $0x78] sm:$0xff]  ;;  %v591_v60 = vld [vmem:[#allocation6 + $0xa8] sm:$0xff]  ;;  %v596_v61 = vld [vmem:[#allocation6 + $0xd0] sm:$0xff] }
  0xef   :  { %3618 = vmatpush1.bf16.msra.mxu0 %v3617_v12  ;;  %3672 = vmatprep.subr.bf16.mxu1 %v3671_v46  ;;  %v3701_v12 = vpack.c.bf16 %v195_v3, %v190_v2  ;;  %v3713_v46 = vpack.c.bf16 %v225_v38, %v220_v37  ;;  %v240_v63 = vld [vmem:[#allocation2 + $0x250] sm:$0xff]  ;;  %v578_v2 = vld [vmem:[#allocation6 + $0x40] sm:$0xff]  ;;  %v3729_v3 = vpack.c.bf16 %v585_v58, %v580_v57  ;;  %v597_v35 = vld [vmem:[#allocation6 + $0xd8] sm:$0xff] }
  0xf0   :  { %3620 = vmatprep.subr.bf16.mxu0 %v3619_v15  ;;  %v3681_v15 = vpack.c.bf16 %v303_v9, %v298_v8  ;;  %v590_v5 = vld [vmem:[#allocation6 + $0xa0] sm:$0xff]  ;;  %v595_v6 = vld [vmem:[#allocation6 + $0xc8] sm:$0xff]  ;;  %v601_v8 = vld [vmem:[#allocation6 + $0xf8] sm:$0xff] }
  0xf1   :  { %v606_v9 = vld [vmem:[#allocation6 + $0x120] sm:$0xff]  ;;  %v572_v11 = vld [vmem:[#allocation6 + $0x10] sm:$0xff] }
  0xf2   :  { %3674 = vmatpush1.bf16.msra.mxu1 %v3673_v56  ;;  %v3727_v56 = vpack.c.bf16 %v586_v48, %v581_v47  ;;  %v582_v22 = vld [vmem:[#allocation6 + $0x60] sm:$0xff]  ;;  %v592_v34 = vld [vmem:[#allocation6 + $0xb0] sm:$0xff]  ;;  %v607_v47 = vld [vmem:[#allocation6 + $0x128] sm:$0xff] }
  0xf3   :  { %3622 = vmatpush1.bf16.msra.mxu0 %v3621_v24  ;;  %3676 = vmatprep.subr.bf16.mxu1 %v3675_v59  ;;  %v3707_v24 = vpack.c.bf16 %v295_v17, %v290_v16  ;;  %v600_v16 = vld [vmem:[#allocation6 + $0xf0] sm:$0xff]  ;;  %v605_v17 = vld [vmem:[#allocation6 + $0x118] sm:$0xff]  ;;  %v598_v25 = vld [vmem:[#allocation6 + $0xe0] sm:$0xff]  ;;  %v3893_v41 = vpack.c.bf16 %v597_v35, %v592_v34 }
  0xf4   :  { %3624 = vmatprep.subr.bf16.mxu0 %v3623_v27  ;;  %v3685_v27 = vpack.c.bf16 %v313_v20, %v308_v19  ;;  %v611_v19 = vld [vmem:[#allocation6 + $0x148] sm:$0xff]  ;;  %v616_v20 = vld [vmem:[#allocation6 + $0x170] sm:$0xff]  ;;  %v3737_v26 = vpack.c.bf16 %v605_v17, %v600_v16  ;;  %v613_v48 = vld [vmem:[#allocation6 + $0x158] sm:$0xff] }
  0xf5   :  { %v608_v37 = vld [vmem:[#allocation6 + $0x130] sm:$0xff]  ;;  %v646_v57 = vld [vmem:[#allocation6 + $0x260] sm:$0xff] }
  0xf6   :  { %3678 = vmatpush1.bf16.msra.mxu1 %v3677_v4  ;;  %v3731_v4 = vpack.c.bf16 %v596_v61, %v591_v60  ;;  %v620_v40 = vld [vmem:[#allocation6 + $0x190] sm:$0xff]  ;;  %v617_v60 = vld [vmem:[#allocation6 + $0x178] sm:$0xff]  ;;  %v623_v61 = vld [vmem:[#allocation6 + $0x1a8] sm:$0xff] }
  0xf7   :  { %3626 = vmatpush1.bf16.msra.mxu0 %v3625_v36  ;;  %3680 = vmatprep.subr.bf16.mxu1 %v3679_v7  ;;  %v3711_v36 = vpack.c.bf16 %v305_v29, %v300_v28  ;;  %v610_v28 = vld [vmem:[#allocation6 + $0x140] sm:$0xff]  ;;  %v615_v29 = vld [vmem:[#allocation6 + $0x168] sm:$0xff]  ;;  %v636_v44 = vld [vmem:[#allocation6 + $0x210] sm:$0xff] }
  0xf8   :  { %3692 = vmatprep.subr.bf16.mxu0 %v3691_v39  ;;  %v3689_v39 = vpack.c.bf16 %v323_v32, %v318_v31  ;;  %v621_v31 = vld [vmem:[#allocation6 + $0x198] sm:$0xff]  ;;  %v626_v32 = vld [vmem:[#allocation6 + $0x1c0] sm:$0xff]  ;;  %v3741_v38 = vpack.c.bf16 %v615_v29, %v610_v28  ;;  %v676_v28 = vld [vmem:[#allocation6 + $0x350] sm:$0xff] }
  0xf9   :  { %v666_v16 = vld [vmem:[#allocation6 + $0x300] sm:$0xff] }
  0xfa   :  { %418 = vmatmul.mubr.f32.vlgmr.msra.gmra.mrb[0].mxu0 %v5140_v49  ;;  %3682 = vmatpush1.bf16.msra.mxu1 %v3681_v15  ;;  %v3735_v15 = vpack.c.bf16 %v606_v9, %v601_v8  ;;  %v627_v8 = vld [vmem:[#allocation6 + $0x1c8] sm:$0xff]  ;;  %v633_v9 = vld [vmem:[#allocation6 + $0x1f8] sm:$0xff] }
  0xfb   :  { %3694 = vmatpush3.bf16.msra.mxu0 %v3693_v52  ;;  %559 = vmatprep.mubr.f32.mxu0 %v5133_v42  ;;  %v205_v42 = vld [vmem:[#allocation2 + $0x138] sm:$0xff]  ;;  %v235_v52 = vld [vmem:[#allocation2 + $0x228] sm:$0xff] }
  0xfc   :  { %3696 = vmatprep.subr.bf16.mxu0 %v3695_v53  ;;  %v3705_v23 = vpack.c.bf16 %v205_v42, %v200_v14  ;;  %3684 = vmatprep.subr.bf16.mxu1 %v3683_v18  ;;  %v320_v53 = vld [vmem:[#allocation2 + $0x4d0] sm:$0xff]  ;;  %v3717_v59 = vpack.c.bf16 %v235_v52, %v230_v51  ;;  %v3733_v42 = vpack.c.bf16 %v595_v6, %v590_v5 }
  0xfd   :  { %v3719_v62 = vpack.c.bf16 %v325_v54, %v320_v53  ;;  %v588_v14 = vld [vmem:[#allocation6 + $0x90] sm:$0xff]  ;;  %v630_v53 = vld [vmem:[#allocation6 + $0x1e0] sm:$0xff]  ;;  %v635_v54 = vld [vmem:[#allocation6 + $0x208] sm:$0xff] }
  0xfe   :  { %3686 = vmatpush1.bf16.msra.mxu1 %v3685_v27  ;;  %v3739_v27 = vpack.c.bf16 %v616_v20, %v611_v19  ;;  %v656_v5 = vld [vmem:[#allocation6 + $0x2b0] sm:$0xff]  ;;  %v637_v19 = vld [vmem:[#allocation6 + $0x218] sm:$0xff]  ;;  %v643_v20 = vld [vmem:[#allocation6 + $0x248] sm:$0xff] }
  0xff   :  { %3698 = vmatpush3.bf16.msra.mxu0 %v3697_v0  ;;  %3688 = vmatprep.subr.bf16.mxu1 %v3687_v30  ;;  %v245_v0 = vld [vmem:[#allocation2 + $0x278] sm:$0xff] }
 0x100   :  { %3700 = vmatprep.subr.bf16.mxu0 %v3699_v1  ;;  %v573_v1 = vld [vmem:[#allocation6 + $0x18] sm:$0xff]  ;;  %v3721_v7 = vpack.c.bf16 %v245_v0, %v240_v63  ;;  %v3749_v63 = vpack.c.bf16 %v635_v54, %v630_v53  ;;  %v696_v53 = vld [vmem:[#allocation6 + $0x3f0] sm:$0xff] }
 0x101   :  { %v3883_v10 = vpack.c.bf16 %v578_v2, %v573_v1  ;;  %v640_v1 = vld [vmem:[#allocation6 + $0x230] sm:$0xff]  ;;  %v645_v2 = vld [vmem:[#allocation6 + $0x258] sm:$0xff] }
 0x102   :  { %3690 = vmatpush1.bf16.msra.mxu1 %v3689_v39  ;;  %v3743_v39 = vpack.c.bf16 %v626_v32, %v621_v31  ;;  %v647_v31 = vld [vmem:[#allocation6 + $0x268] sm:$0xff]  ;;  %v653_v32 = vld [vmem:[#allocation6 + $0x298] sm:$0xff] }
 0x103   :  { %3702 = vmatpush3.bf16.msra.mxu0 %v3701_v12  ;;  %3724 = vmatprep.subr.bf16.mxu1 %v3723_v43  ;;  %v577_v12 = vld [vmem:[#allocation6 + $0x38] sm:$0xff]  ;;  %v631_v43 = vld [vmem:[#allocation6 + $0x1e8] sm:$0xff] }
 0x104   :  { %3704 = vmatprep.subr.bf16.mxu0 %v3703_v13  ;;  %v583_v13 = vld [vmem:[#allocation6 + $0x68] sm:$0xff]  ;;  %v3885_v18 = vpack.c.bf16 %v577_v12, %v572_v11  ;;  %v3747_v52 = vpack.c.bf16 %v636_v44, %v631_v43  ;;  %v3753_v11 = vpack.c.bf16 %v645_v2, %v640_v1  ;;  %v657_v43 = vld [vmem:[#allocation6 + $0x2b8] sm:$0xff]  ;;  %v706_v1 = vld [vmem:[#allocation6 + $0x440] sm:$0xff] }
 0x105   :  { %489 = vmatmul.mubr.f32.vlgmr.msra.gmra.mrb[0].mxu1 %v5140_v49  ;;  %v3887_v21 = vpack.c.bf16 %v588_v14, %v583_v13  ;;  %v650_v13 = vld [vmem:[#allocation6 + $0x280] sm:$0xff]  ;;  %v655_v14 = vld [vmem:[#allocation6 + $0x2a8] sm:$0xff] }
 0x106   :  { %3726 = vmatpush1.bf16.msra.mxu1 %v3725_v55  ;;  %v663_v44 = vld [vmem:[#allocation6 + $0x2e8] sm:$0xff] }
 0x107   :  { %3706 = vmatpush3.bf16.msra.mxu0 %v3705_v23  ;;  %3728 = vmatprep.subr.bf16.mxu1 %v3727_v56  ;;  %v587_v23 = vld [vmem:[#allocation6 + $0x88] sm:$0xff]  ;;  %v641_v56 = vld [vmem:[#allocation6 + $0x238] sm:$0xff] }
 0x108   :  { %3708 = vmatprep.subr.bf16.mxu0 %v3707_v24  ;;  %v593_v24 = vld [vmem:[#allocation6 + $0xb8] sm:$0xff]  ;;  %v3889_v30 = vpack.c.bf16 %v587_v23, %v582_v22  ;;  %v3751_v0 = vpack.c.bf16 %v646_v57, %v641_v56  ;;  %v3757_v22 = vpack.c.bf16 %v655_v14, %v650_v13  ;;  %v667_v56 = vld [vmem:[#allocation6 + $0x308] sm:$0xff]  ;;  %v716_v13 = vld [vmem:[#allocation6 + $0x490] sm:$0xff] }
 0x109   :  { %v673_v57 = vld [vmem:[#allocation6 + $0x338] sm:$0xff] }
 0x10a   :  { %3730 = vmatpush1.bf16.msra.mxu1 %v3729_v3 }
 0x10b   :  { %3710 = vmatpush3.bf16.msra.mxu0 %v3709_v33  ;;  %3732 = vmatprep.subr.bf16.mxu1 %v3731_v4  ;;  %v3891_v33 = vpack.c.bf16 %v598_v25, %v593_v24  ;;  %v651_v4 = vld [vmem:[#allocation6 + $0x288] sm:$0xff]  ;;  %v660_v24 = vld [vmem:[#allocation6 + $0x2d0] sm:$0xff]  ;;  %v665_v25 = vld [vmem:[#allocation6 + $0x2f8] sm:$0xff] }
 0x10c   :  { %3712 = vmatprep.subr.bf16.mxu0 %v3711_v36  ;;  %v603_v36 = vld [vmem:[#allocation6 + $0x108] sm:$0xff]  ;;  %v3755_v12 = vpack.c.bf16 %v656_v5, %v651_v4  ;;  %v3761_v34 = vpack.c.bf16 %v665_v25, %v660_v24  ;;  %v677_v4 = vld [vmem:[#allocation6 + $0x358] sm:$0xff]  ;;  %v692_v24 = vld [vmem:[#allocation6 + $0x3d0] sm:$0xff] }
 0x10d   :  { %v3895_v45 = vpack.c.bf16 %v608_v37, %v603_v36  ;;  %v670_v36 = vld [vmem:[#allocation6 + $0x320] sm:$0xff]  ;;  %v675_v37 = vld [vmem:[#allocation6 + $0x348] sm:$0xff]  ;;  %v697_v25 = vld [vmem:[#allocation6 + $0x3f8] sm:$0xff] }
 0x10e   :  { %3734 = vmatpush1.bf16.msra.mxu1 %v3733_v42  ;;  %v683_v5 = vld [vmem:[#allocation6 + $0x388] sm:$0xff] }
 0x10f   :  { %3714 = vmatpush3.bf16.msra.mxu0 %v3713_v46  ;;  %3736 = vmatprep.subr.bf16.mxu1 %v3735_v15  ;;  %v602_v46 = vld [vmem:[#allocation6 + $0x100] sm:$0xff]  ;;  %v661_v15 = vld [vmem:[#allocation6 + $0x2d8] sm:$0xff] }
 0x110   :  { %3716 = vmatprep.subr.bf16.mxu0 %v3715_v50  ;;  %v618_v50 = vld [vmem:[#allocation6 + $0x180] sm:$0xff]  ;;  %v3897_v55 = vpack.c.bf16 %v607_v47, %v602_v46  ;;  %v3759_v23 = vpack.c.bf16 %v666_v16, %v661_v15  ;;  %v3765_v46 = vpack.c.bf16 %v675_v37, %v670_v36  ;;  %v687_v15 = vld [vmem:[#allocation6 + $0x3a8] sm:$0xff]  ;;  %v693_v16 = vld [vmem:[#allocation6 + $0x3d8] sm:$0xff] }
 0x111   :  { %v3899_v58 = vpack.c.bf16 %v618_v50, %v613_v48  ;;  %v680_v48 = vld [vmem:[#allocation6 + $0x370] sm:$0xff]  ;;  %v685_v50 = vld [vmem:[#allocation6 + $0x398] sm:$0xff] }
 0x112   :  { %3738 = vmatpush1.bf16.msra.mxu1 %v3737_v26  ;;  %v712_v36 = vld [vmem:[#allocation6 + $0x470] sm:$0xff]  ;;  %v717_v37 = vld [vmem:[#allocation6 + $0x498] sm:$0xff] }
 0x113   :  { %3718 = vmatpush3.bf16.msra.mxu0 %v3717_v59  ;;  %3740 = vmatprep.subr.bf16.mxu1 %v3739_v27  ;;  %v612_v59 = vld [vmem:[#allocation6 + $0x150] sm:$0xff]  ;;  %v671_v27 = vld [vmem:[#allocation6 + $0x328] sm:$0xff] }
 0x114   :  { %3720 = vmatprep.subr.bf16.mxu0 %v3719_v62  ;;  %v628_v62 = vld [vmem:[#allocation6 + $0x1d0] sm:$0xff]  ;;  %v3901_v3 = vpack.c.bf16 %v617_v60, %v612_v59  ;;  %v3763_v35 = vpack.c.bf16 %v676_v28, %v671_v27  ;;  %v3769_v59 = vpack.c.bf16 %v685_v50, %v680_v48  ;;  %v722_v48 = vld [vmem:[#allocation6 + $0x4c0] sm:$0xff] }
 0x115   :  { %v3903_v6 = vpack.c.bf16 %v628_v62, %v623_v61  ;;  %v690_v61 = vld [vmem:[#allocation6 + $0x3c0] sm:$0xff]  ;;  %v695_v62 = vld [vmem:[#allocation6 + $0x3e8] sm:$0xff]  ;;  %v708_v27 = vld [vmem:[#allocation6 + $0x450] sm:$0xff] }
 0x116   :  { %3742 = vmatpush1.bf16.msra.mxu1 %v3741_v38 }
 0x117   :  { %3722 = vmatpush3.bf16.msra.mxu0 %v3721_v7  ;;  %3744 = vmatprep.subr.bf16.mxu1 %v3743_v39  ;;  %v622_v7 = vld [vmem:[#allocation6 + $0x1a0] sm:$0xff]  ;;  %v681_v39 = vld [vmem:[#allocation6 + $0x378] sm:$0xff] }
 0x118   :  { %3884 = vmatprep.subr.bf16.mxu0 %v3883_v10  ;;  %v638_v10 = vld [vmem:[#allocation6 + $0x220] sm:$0xff]  ;;  %v3905_v42 = vpack.c.bf16 %v627_v8, %v622_v7  ;;  %v3773_v7 = vpack.c.bf16 %v695_v62, %v690_v61  ;;  %v5151_v62 = vld [vmem:[#allocation4] sm:$0x1f] }
 0x119   :  { %v3907_v17 = vpack.c.bf16 %v638_v10, %v633_v9  ;;  %v700_v9 = vld [vmem:[#allocation6 + $0x410] sm:$0xff]  ;;  %v705_v10 = vld [vmem:[#allocation6 + $0x438] sm:$0xff] }
 0x11a   :  { %560 = vmatmul.mubr.f32.vlgmr.msra.gmra.mrb[2].mxu0 %v5140_v49  ;;  %v625_v49 = vld [vmem:[#allocation6 + $0x1b8] sm:$0xff] }
 0x11b   :  { %3886 = vmatpush1.bf16.msra.mxu0 %v3885_v18  ;;  %v3745_v51 = vpack.c.bf16 %v625_v49, %v620_v40  ;;  %v632_v18 = vld [vmem:[#allocation6 + $0x1f0] sm:$0xff]  ;;  %v686_v40 = vld [vmem:[#allocation6 + $0x3a0] sm:$0xff] }
 0x11c   :  { %3888 = vmatprep.subr.bf16.mxu0 %v3887_v21  ;;  %v648_v21 = vld [vmem:[#allocation6 + $0x270] sm:$0xff]  ;;  %v3909_v26 = vpack.c.bf16 %v637_v19, %v632_v18  ;;  %v3767_v47 = vpack.c.bf16 %v686_v40, %v681_v39  ;;  %v3777_v18 = vpack.c.bf16 %v705_v10, %v700_v9  ;;  %v721_v39 = vld [vmem:[#allocation6 + $0x4b8] sm:$0xff]  ;;  %v726_v40 = vld [vmem:[#allocation6 + $0x4e0] sm:$0xff] }
 0x11d   :  { %3746 = vmatpush1.bf16.msra.mxu1 %v3745_v51  ;;  %v3911_v29 = vpack.c.bf16 %v648_v21, %v643_v20  ;;  %v710_v20 = vld [vmem:[#allocation6 + $0x460] sm:$0xff]  ;;  %v715_v21 = vld [vmem:[#allocation6 + $0x488] sm:$0xff]  ;;  %v741_v9 = vld [vmem:[#allocation6 + $0x558] sm:$0xff] }
 0x11e   :  { %3748 = vmatprep.subr.bf16.mxu1 %v3747_v52  ;;  %v691_v52 = vld [vmem:[#allocation6 + $0x3c8] sm:$0xff]  ;;  %v3781_v28 = vpack.c.bf16 %v715_v21, %v710_v20  ;;  %v742_v21 = vld [vmem:[#allocation6 + $0x560] sm:$0xff] }
 0x11f   :  { %3890 = vmatpush1.bf16.msra.mxu0 %v3889_v30  ;;  %v642_v30 = vld [vmem:[#allocation6 + $0x240] sm:$0xff]  ;;  %v3771_v60 = vpack.c.bf16 %v696_v53, %v691_v52  ;;  %v731_v52 = vld [vmem:[#allocation6 + $0x508] sm:$0xff]  ;;  %v736_v53 = vld [vmem:[#allocation6 + $0x530] sm:$0xff] }
 0x120   :  { %3892 = vmatprep.subr.bf16.mxu0 %v3891_v33  ;;  %v658_v33 = vld [vmem:[#allocation6 + $0x2c0] sm:$0xff]  ;;  %v3913_v38 = vpack.c.bf16 %v647_v31, %v642_v30 }
 0x121   :  { %3750 = vmatpush1.bf16.msra.mxu1 %v3749_v63  ;;  %v3915_v49 = vpack.c.bf16 %v658_v33, %v653_v32  ;;  %v702_v31 = vld [vmem:[#allocation6 + $0x420] sm:$0xff]  ;;  %v707_v32 = vld [vmem:[#allocation6 + $0x448] sm:$0xff]  ;;  %v713_v33 = vld [vmem:[#allocation6 + $0x478] sm:$0xff] }
 0x122   :  { %3752 = vmatprep.subr.bf16.mxu1 %v3751_v0  ;;  %v701_v0 = vld [vmem:[#allocation6 + $0x418] sm:$0xff] }
 0x123   :  { %3894 = vmatpush1.bf16.msra.mxu0 %v3893_v41  ;;  %v652_v41 = vld [vmem:[#allocation6 + $0x290] sm:$0xff]  ;;  %v3775_v8 = vpack.c.bf16 %v706_v1, %v701_v0 }
 0x124   :  { %3896 = vmatprep.subr.bf16.mxu0 %v3895_v45  ;;  %v668_v45 = vld [vmem:[#allocation6 + $0x310] sm:$0xff]  ;;  %v3917_v51 = vpack.c.bf16 %v657_v43, %v652_v41  ;;  %v3783_v41 = vpack.c.bf16 %v726_v40, %v721_v39 }
 0x125   :  { %3754 = vmatpush1.bf16.msra.mxu1 %v3753_v11  ;;  %v3919_v54 = vpack.c.bf16 %v668_v45, %v663_v44  ;;  %v728_v43 = vld [vmem:[#allocation6 + $0x4f0] sm:$0xff]  ;;  %v725_v45 = vld [vmem:[#allocation6 + $0x4d8] sm:$0xff] }
 0x126   :  { %3756 = vmatprep.subr.bf16.mxu1 %v3755_v12  ;;  %v711_v12 = vld [vmem:[#allocation6 + $0x468] sm:$0xff]  ;;  %v720_v44 = vld [vmem:[#allocation6 + $0x4b0] sm:$0xff] }
 0x127   :  { %3898 = vmatpush1.bf16.msra.mxu0 %v3897_v55  ;;  %v662_v55 = vld [vmem:[#allocation6 + $0x2e0] sm:$0xff]  ;;  %v3779_v19 = vpack.c.bf16 %v716_v13, %v711_v12  ;;  %v743_v12 = vld [vmem:[#allocation6 + $0x568] sm:$0xff]  ;;  %v748_v13 = vld [vmem:[#allocation6 + $0x590] sm:$0xff] }
 0x128   :  { %3900 = vmatprep.subr.bf16.mxu0 %v3899_v58  ;;  %v678_v58 = vld [vmem:[#allocation6 + $0x360] sm:$0xff]  ;;  %v3921_v63 = vpack.c.bf16 %v667_v56, %v662_v55  ;;  %v733_v55 = vld [vmem:[#allocation6 + $0x518] sm:$0xff]  ;;  %v3951_v20 = vpack.c.bf16 %v748_v13, %v743_v12  ;;  %v787_v13 = vld [vmem:[#allocation6 + $0x6c8] sm:$0xff] }
 0x129   :  { %3758 = vmatpush1.bf16.msra.mxu1 %v3757_v22  ;;  %v3923_v2 = vpack.c.bf16 %v678_v58, %v673_v57  ;;  %v738_v56 = vld [vmem:[#allocation6 + $0x540] sm:$0xff] }
 0x12a   :  { %3760 = vmatprep.subr.bf16.mxu1 %v3759_v23  ;;  %v3947_v58 = vpack.c.bf16 %v738_v56, %v733_v55  ;;  %v775_v55 = vld [vmem:[#allocation6 + $0x668] sm:$0xff]  ;;  %v782_v12 = vld [vmem:[#allocation6 + $0x6a0] sm:$0xff] }
 0x12b   :  { %3902 = vmatpush1.bf16.msra.mxu0 %v3901_v3  ;;  %v672_v3 = vld [vmem:[#allocation6 + $0x330] sm:$0xff] }
 0x12c   :  { %3904 = vmatprep.subr.bf16.mxu0 %v3903_v6  ;;  %v688_v6 = vld [vmem:[#allocation6 + $0x3b0] sm:$0xff]  ;;  %v3925_v11 = vpack.c.bf16 %v677_v4, %v672_v3  ;;  %v730_v3 = vld [vmem:[#allocation6 + $0x500] sm:$0xff]  ;;  %v735_v4 = vld [vmem:[#allocation6 + $0x528] sm:$0xff] }
 0x12d   :  { %3762 = vmatpush1.bf16.msra.mxu1 %v3761_v34  ;;  %v3927_v14 = vpack.c.bf16 %v688_v6, %v683_v5  ;;  %v718_v34 = vld [vmem:[#allocation6 + $0x4a0] sm:$0xff] }
 0x12e   :  { %3764 = vmatprep.subr.bf16.mxu1 %v3763_v35  ;;  %v3937_v35 = vpack.c.bf16 %v707_v32, %v702_v31 }
 0x12f   :  { %3906 = vmatpush1.bf16.msra.mxu0 %v3905_v42  ;;  %v682_v42 = vld [vmem:[#allocation6 + $0x380] sm:$0xff] }
 0x130   :  { %3908 = vmatprep.subr.bf16.mxu0 %v3907_v17  ;;  %v698_v17 = vld [vmem:[#allocation6 + $0x400] sm:$0xff]  ;;  %v3929_v22 = vpack.c.bf16 %v687_v15, %v682_v42  ;;  %v3789_v42 = vpack.c.bf16 %v735_v4, %v730_v3  ;;  %v783_v3 = vld [vmem:[#allocation6 + $0x6a8] sm:$0xff]  ;;  %v788_v4 = vld [vmem:[#allocation6 + $0x6d0] sm:$0xff] }
 0x131   :  { %3766 = vmatpush1.bf16.msra.mxu1 %v3765_v46  ;;  %v3931_v23 = vpack.c.bf16 %v698_v17, %v693_v16  ;;  %v3785_v46 = vpack.c.bf16 %v725_v45, %v720_v44  ;;  %v740_v16 = vld [vmem:[#allocation6 + $0x550] sm:$0xff]  ;;  %v745_v17 = vld [vmem:[#allocation6 + $0x578] sm:$0xff]  ;;  %v762_v45 = vld [vmem:[#allocation6 + $0x600] sm:$0xff] }
 0x132   :  { %3768 = vmatprep.subr.bf16.mxu1 %v3767_v47  ;;  %v3941_v47 = vpack.c.bf16 %v717_v37, %v712_v36  ;;  %v766_v36 = vld [vmem:[#allocation6 + $0x620] sm:$0xff]  ;;  %v763_v37 = vld [vmem:[#allocation6 + $0x608] sm:$0xff] }
 0x133   :  { %3910 = vmatpush1.bf16.msra.mxu0 %v3909_v26  ;;  %v703_v26 = vld [vmem:[#allocation6 + $0x428] sm:$0xff] }
 0x134   :  { %3912 = vmatprep.subr.bf16.mxu0 %v3911_v29  ;;  %v3933_v29 = vpack.c.bf16 %v697_v25, %v692_v24  ;;  %v3935_v30 = vpack.c.bf16 %v708_v27, %v703_v26  ;;  %v756_v24 = vld [vmem:[#allocation6 + $0x5d0] sm:$0xff]  ;;  %v753_v25 = vld [vmem:[#allocation6 + $0x5b8] sm:$0xff]  ;;  %v758_v26 = vld [vmem:[#allocation6 + $0x5e0] sm:$0xff]  ;;  %v3793_v27 = vpack.c.bf16 %v745_v17, %v740_v16 }
 0x135   :  { %3770 = vmatpush1.bf16.msra.mxu1 %v3769_v59  ;;  %v328_v59 = vlaneseq  ;;  %v3955_v32 = vpack.c.bf16 %v758_v26, %v753_v25  ;;  %v793_v16 = vld [vmem:[#allocation6 + $0x6f8] sm:$0xff]  ;;  %v798_v17 = vld [vmem:[#allocation6 + $0x720] sm:$0xff] }
 0x136   :  { %3772 = vmatprep.subr.bf16.mxu1 %v3771_v60 }
 0x137   :  { %3914 = vmatpush1.bf16.msra.mxu0 %v3913_v38  ;;  %v3939_v38 = vpack.c.bf16 %v718_v34, %v713_v33  ;;  %v5146_v60 = vshrl.u32 %v328_v59, 7  ;;  %v752_v33 = vld [vmem:[#allocation6 + $0x5b0] sm:$0xff]  ;;  %v757_v34 = vld [vmem:[#allocation6 + $0x5d8] sm:$0xff] }
 0x138   :  { %3916 = vmatprep.subr.bf16.mxu0 %v3915_v49  ;;  %v723_v49 = vld [vmem:[#allocation6 + $0x4c8] sm:$0xff]  ;;  %v3957_v40 = vpack.c.bf16 %v757_v34, %v752_v33  ;;  %v772_v59 = vld [vmem:[#allocation6 + $0x650] sm:$0xff] }
 0x139   :  { %3774 = vmatpush1.bf16.msra.mxu1 %v3773_v7  ;;  %v3943_v50 = vpack.c.bf16 %v728_v43, %v723_v49  ;;  %v5149_v61 = vsub.s32 0, %v5146_v60  ;;  %v732_v7 = vld [vmem:[#allocation6 + $0x510] sm:$0xff]  ;;  %v5169_v56 = vsub.s32 3, %v5146_v60 }
 0x13a   :  { %3776 = vmatprep.subr.bf16.mxu1 %v3775_v8  ;;  %v737_v8 = vld [vmem:[#allocation6 + $0x538] sm:$0xff]  ;;  %v760_v49 = vld [vmem:[#allocation6 + $0x5f0] sm:$0xff] }
 0x13b   :  { %3918 = vmatpush1.bf16.msra.mxu0 %v3917_v51  ;;  %v727_v51 = vld [vmem:[#allocation6 + $0x4e8] sm:$0xff]  ;;  %v331_v0 = vrot.slane %v5151_v62, %v5149_v61  ;;  %v3949_v15 = vpack.c.bf16 %v737_v8, %v732_v7  ;;  %v780_v7 = vld [vmem:[#allocation6 + $0x690] sm:$0xff]  ;;  %v785_v8 = vld [vmem:[#allocation6 + $0x6b8] sm:$0xff] }
 0x13c   :  { %3920 = vmatprep.subr.bf16.mxu0 %v3919_v54  ;;  %v3787_v54 = vpack.c.bf16 %v736_v53, %v731_v52  ;;  %v3945_v57 = vpack.c.bf16 %v727_v51, %v722_v48  ;;  %v776_v48 = vld [vmem:[#allocation6 + $0x670] sm:$0xff]  ;;  %v778_v51 = vld [vmem:[#allocation6 + $0x680] sm:$0xff] }
 0x13d   :  { %3778 = vmatpush1.bf16.msra.mxu1 %v3777_v18  ;;  %v808_v33 = vld [vmem:[#allocation6 + $0x770] sm:$0xff] }
 0x13e   :  { %3780 = vmatprep.subr.bf16.mxu1 %v3779_v19 }
 0x13f   :  { %3922 = vmatpush1.bf16.msra.mxu0 %v3921_v63  ;;  %v5154_v63 = vsub.s32 1, %v5146_v60 }
 0x140   :  { %3924 = vmatprep.subr.bf16.mxu0 %v3923_v2 }
 0x141   :  { %3782 = vmatpush1.bf16.msra.mxu1 %v3781_v28  ;;  %v335_v1 = vrot.slane %v5151_v62, %v5154_v63 }
 0x142   :  { %3784 = vmatprep.subr.bf16.mxu1 %v3783_v41  ;;  %v765_v41 = vld [vmem:[#allocation6 + $0x618] sm:$0xff] }
 0x143   :  { %3926 = vmatpush1.bf16.msra.mxu0 %v3925_v11  ;;  %v746_v11 = vld [vmem:[#allocation6 + $0x580] sm:$0xff]  ;;  %v3801_v52 = vpack.c.bf16 %v765_v41, %v760_v49  ;;  %v807_v41 = vld [vmem:[#allocation6 + $0x768] sm:$0xff] }
 0x144   :  { %3928 = vmatprep.subr.bf16.mxu0 %v3927_v14  ;;  %v3791_v19 = vpack.c.bf16 %v746_v11, %v741_v9  ;;  %v343_v9 = vrot.slane %v5151_v62, %v5169_v56  ;;  %v3967_v11 = vpack.c.bf16 %v788_v4, %v783_v3  ;;  %v802_v49 = vld [vmem:[#allocation6 + $0x740] sm:$0xff] }
 0x145   :  { %3786 = vmatpush1.bf16.msra.mxu1 %v3785_v46  ;;  %v767_v46 = vld [vmem:[#allocation6 + $0x628] sm:$0xff] }
 0x146   :  { %3788 = vmatprep.subr.bf16.mxu1 %v3787_v54  ;;  %v3961_v53 = vpack.c.bf16 %v767_v46, %v762_v45  ;;  %v770_v54 = vld [vmem:[#allocation6 + $0x640] sm:$0xff]  ;;  %v813_v45 = vld [vmem:[#allocation6 + $0x798] sm:$0xff] }
 0x147   :  { %3930 = vmatpush1.bf16.msra.mxu0 %v3929_v22  ;;  %v747_v22 = vld [vmem:[#allocation6 + $0x588] sm:$0xff]  ;;  %v818_v46 = vld [vmem:[#allocation6 + $0x7c0] sm:$0xff] }
 0x148   :  { %3932 = vmatprep.subr.bf16.mxu0 %v3931_v23  ;;  %v751_v23 = vld [vmem:[#allocation6 + $0x5a8] sm:$0xff]  ;;  %v3953_v28 = vpack.c.bf16 %v747_v22, %v742_v21  ;;  %v3809_v21 = vpack.c.bf16 %v785_v8, %v780_v7  ;;  %v3969_v22 = vpack.c.bf16 %v787_v13, %v782_v12  ;;  %v825_v7 = vld [vmem:[#allocation6 + $0x7f8] sm:$0xff]  ;;  %v836_v13 = vld [vmem:[#allocation6 + $0x850] sm:$0xff] }
 0x149   :  { %v3795_v31 = vpack.c.bf16 %v756_v24, %v751_v23  ;;  %v790_v23 = vld [vmem:[#allocation6 + $0x6e0] sm:$0xff]  ;;  %v795_v24 = vld [vmem:[#allocation6 + $0x708] sm:$0xff] }
 0x14a   :  { %v831_v12 = vld [vmem:[#allocation6 + $0x828] sm:$0xff] }
 0x14b   :  { %3934 = vmatpush1.bf16.msra.mxu0 %v3933_v29  ;;  %v750_v29 = vld [vmem:[#allocation6 + $0x5a0] sm:$0xff] }
 0x14c   :  { %3936 = vmatprep.subr.bf16.mxu0 %v3935_v30  ;;  %v755_v30 = vld [vmem:[#allocation6 + $0x5c8] sm:$0xff] }
 0x14d   :  { %v3797_v39 = vpack.c.bf16 %v755_v30, %v750_v29  ;;  %v797_v29 = vld [vmem:[#allocation6 + $0x718] sm:$0xff] }
 0x14e   :  { %v801_v30 = vld [vmem:[#allocation6 + $0x738] sm:$0xff] }
 0x14f   :  { %3938 = vmatpush1.bf16.msra.mxu0 %v3937_v35  ;;  %v761_v35 = vld [vmem:[#allocation6 + $0x5f8] sm:$0xff] }
 0x150   :  { %3940 = vmatprep.subr.bf16.mxu0 %v3939_v38  ;;  %v768_v38 = vld [vmem:[#allocation6 + $0x630] sm:$0xff]  ;;  %v3799_v43 = vpack.c.bf16 %v766_v36, %v761_v35  ;;  %v3813_v35 = vpack.c.bf16 %v795_v24, %v790_v23 }
 0x151   :  { %v3959_v44 = vpack.c.bf16 %v768_v38, %v763_v37  ;;  %v800_v37 = vld [vmem:[#allocation6 + $0x730] sm:$0xff]  ;;  %v805_v38 = vld [vmem:[#allocation6 + $0x758] sm:$0xff] }
 0x152   :  { %v832_v24 = vld [vmem:[#allocation6 + $0x830] sm:$0xff] }
 0x153   :  { %3942 = vmatpush1.bf16.msra.mxu0 %v3941_v47  ;;  %v771_v47 = vld [vmem:[#allocation6 + $0x648] sm:$0xff] }
 0x154   :  { %3944 = vmatprep.subr.bf16.mxu0 %v3943_v50  ;;  %v773_v50 = vld [vmem:[#allocation6 + $0x658] sm:$0xff] }
 0x157   :  { %3946 = vmatpush1.bf16.msra.mxu0 %v3945_v57  ;;  %v3803_v57 = vpack.c.bf16 %v776_v48, %v771_v47  ;;  %v3817_v47 = vpack.c.bf16 %v805_v38, %v800_v37  ;;  %v3977_v48 = vpack.c.bf16 %v807_v41, %v802_v49  ;;  %v842_v37 = vld [vmem:[#allocation6 + $0x880] sm:$0xff]  ;;  %v847_v38 = vld [vmem:[#allocation6 + $0x8a8] sm:$0xff]  ;;  %v853_v49 = vld [vmem:[#allocation6 + $0x8d8] sm:$0xff] }
 0x158   :  { %3948 = vmatprep.subr.bf16.mxu0 %v3947_v58  ;;  %v3963_v58 = vpack.c.bf16 %v778_v51, %v773_v50  ;;  %v810_v50 = vld [vmem:[#allocation6 + $0x780] sm:$0xff]  ;;  %v815_v51 = vld [vmem:[#allocation6 + $0x7a8] sm:$0xff] }
 0x159   :  { %v3821_v4 = vpack.c.bf16 %v815_v51, %v810_v50  ;;  %v858_v41 = vld [vmem:[#allocation6 + $0x900] sm:$0xff]  ;;  %v852_v50 = vld [vmem:[#allocation6 + $0x8d0] sm:$0xff]  ;;  %v857_v51 = vld [vmem:[#allocation6 + $0x8f8] sm:$0xff] }
 0x1cd   :  { %v419_v2 = vpop.f32.mrb[0].mxu0 }
 0x1ce   :  { %v420_v5 = vadd.f32 %v419_v2, %v331_v0  ;;  %v421_v6 = vpop.f32.mrb[1].mxu0  ;;  %v777_v0 = vld [vmem:[#allocation6 + $0x678] sm:$0xff]  ;;  %v786_v2 = vld [vmem:[#allocation6 + $0x6c0] sm:$0xff] }
 0x1cf   :  { %v422_v10 = vadd.f32 %v421_v6, %v335_v1  ;;  %v781_v1 = vld [vmem:[#allocation6 + $0x698] sm:$0xff]  ;;  %v3965_v6 = vpack.c.bf16 %v777_v0, %v772_v59  ;;  %v826_v0 = vld [vmem:[#allocation6 + $0x800] sm:$0xff] }
 0x1d0   :  { %v5162_v18 = vmax.f32 %v420_v5, 0.0  ;;  %v3805_v5 = vpack.c.bf16 %v775_v55, %v770_v54  ;;  %v3979_v54 = vpack.c.bf16 %v818_v46, %v813_v45  ;;  %v812_v55 = vld [vmem:[#allocation6 + $0x790] sm:$0xff]  ;;  %v850_v45 = vld [vmem:[#allocation6 + $0x8c0] sm:$0xff]  ;;  %v855_v46 = vld [vmem:[#allocation6 + $0x8e8] sm:$0xff] }
 0x1d1   :  { %v5160_v14 = vmax.f32 %v422_v10, 0.0  ;;  %v3807_v10 = vpack.c.bf16 %v786_v2, %v781_v1  ;;  %v823_v1 = vld [vmem:[#allocation6 + $0x7e8] sm:$0xff]  ;;  %v828_v2 = vld [vmem:[#allocation6 + $0x810] sm:$0xff] }
 0x1d3   :  { %1061 = vmatprep.mubr.f32.mxu1 %v5160_v14  ;;  %1274 = vmatprep.mubr.f32.mxu0 %v5160_v14 }
 0x1d4   :  { %1062 = vmatmul.mubr.f32.vlgmr.msra.gmra.mrb[2].mxu1 %v5162_v18  ;;  %1275 = vmatmul.mubr.f32.vlgmr.msra.gmra.mrb[4].mxu0 %v5162_v18 }
 0x1d5   :  { %3790 = vmatpush1.bf16.msra.mxu1 %v3789_v42  ;;  %3950 = vmatpush1.bf16.msra.mxu0 %v3949_v15  ;;  %v791_v42 = vld [vmem:[#allocation6 + $0x6e8] sm:$0xff]  ;;  %v796_v15 = vld [vmem:[#allocation6 + $0x710] sm:$0xff] }
 0x1d6   :  { %3792 = vmatprep.subr.bf16.mxu1 %v3791_v19  ;;  %3952 = vmatprep.subr.bf16.mxu0 %v3951_v20  ;;  %v3811_v26 = vpack.c.bf16 %v796_v15, %v791_v42  ;;  %v833_v42 = vld [vmem:[#allocation6 + $0x838] sm:$0xff]  ;;  %v838_v15 = vld [vmem:[#allocation6 + $0x860] sm:$0xff] }
 0x1d7   :  { %v3987_v23 = vpack.c.bf16 %v838_v15, %v833_v42  ;;  %v875_v42 = vld [vmem:[#allocation6 + $0x988] sm:$0xff] }
 0x1d8   :  { %v5173_v19 = vpop.f32.mrb[0].mxu1 }
 0x1d9   :  { %3794 = vmatpush1.bf16.msra.mxu1 %v3793_v27  ;;  %3954 = vmatpush1.bf16.msra.mxu0 %v3953_v28  ;;  %v492_v20 = vpop.f32.mrb[1].mxu1  ;;  %v3971_v27 = vpack.c.bf16 %v798_v17, %v793_v16  ;;  %v792_v28 = vld [vmem:[#allocation6 + $0x6f0] sm:$0xff] }
 0x1da   :  { %3796 = vmatprep.subr.bf16.mxu1 %v3795_v31  ;;  %3956 = vmatprep.subr.bf16.mxu0 %v3955_v32  ;;  %v493_v25 = vadd.f32 %v492_v20, %v343_v9  ;;  %v806_v31 = vld [vmem:[#allocation6 + $0x760] sm:$0xff]  ;;  %v803_v32 = vld [vmem:[#allocation6 + $0x748] sm:$0xff]  ;;  %v3973_v36 = vpack.c.bf16 %v797_v29, %v792_v28  ;;  %v3983_v9 = vpack.c.bf16 %v828_v2, %v823_v1  ;;  %v848_v29 = vld [vmem:[#allocation6 + $0x8b0] sm:$0xff] }
 0x1db   :  { %v830_v20 = vld [vmem:[#allocation6 + $0x820] sm:$0xff]  ;;  %v843_v28 = vld [vmem:[#allocation6 + $0x888] sm:$0xff] }
 0x1dc   :  { %v5175_v34 = vmax.f32 %v493_v25, 0.0  ;;  %v837_v25 = vld [vmem:[#allocation6 + $0x858] sm:$0xff] }
 0x1dd   :  { %3798 = vmatpush1.bf16.msra.mxu1 %v3797_v39  ;;  %3958 = vmatpush1.bf16.msra.mxu0 %v3957_v40  ;;  %v3815_v39 = vpack.c.bf16 %v806_v31, %v801_v30  ;;  %v3975_v40 = vpack.c.bf16 %v808_v33, %v803_v32  ;;  %v3989_v31 = vpack.c.bf16 %v837_v25, %v832_v24  ;;  %v840_v32 = vld [vmem:[#allocation6 + $0x870] sm:$0xff]  ;;  %v845_v33 = vld [vmem:[#allocation6 + $0x898] sm:$0xff] }
 0x1de   :  { %3800 = vmatprep.subr.bf16.mxu1 %v3799_v43  ;;  %3960 = vmatprep.subr.bf16.mxu0 %v3959_v44  ;;  %v811_v43 = vld [vmem:[#allocation6 + $0x788] sm:$0xff]  ;;  %v816_v44 = vld [vmem:[#allocation6 + $0x7b0] sm:$0xff] }
 0x1df   :  { %1132 = vmatprep.mubr.f32.mxu1 %v5175_v34  ;;  %1345 = vmatprep.mubr.f32.mxu0 %v5175_v34  ;;  %v888_v24 = vld [vmem:[#allocation6 + $0x9f0] sm:$0xff] }
 0x1e1   :  { %3802 = vmatpush1.bf16.msra.mxu1 %v3801_v52  ;;  %3962 = vmatpush1.bf16.msra.mxu0 %v3961_v53  ;;  %v3819_v53 = vpack.c.bf16 %v816_v44, %v811_v43  ;;  %v3833_v43 = vpack.c.bf16 %v845_v33, %v840_v32  ;;  %v3993_v44 = vpack.c.bf16 %v847_v38, %v842_v37  ;;  %v882_v32 = vld [vmem:[#allocation6 + $0x9c0] sm:$0xff]  ;;  %v887_v33 = vld [vmem:[#allocation6 + $0x9e8] sm:$0xff]  ;;  %v893_v37 = vld [vmem:[#allocation6 + $0xa18] sm:$0xff] }
 0x1e2   :  { %3804 = vmatprep.subr.bf16.mxu1 %v3803_v57  ;;  %3964 = vmatprep.subr.bf16.mxu0 %v3963_v58  ;;  %v817_v57 = vld [vmem:[#allocation6 + $0x7b8] sm:$0xff]  ;;  %v898_v38 = vld [vmem:[#allocation6 + $0xa40] sm:$0xff] }
 0x1e3   :  { %v821_v58 = vld [vmem:[#allocation6 + $0x7d8] sm:$0xff] }
 0x1e4   :  { %v3823_v8 = vpack.c.bf16 %v826_v0, %v821_v58  ;;  %v3997_v58 = vpack.c.bf16 %v857_v51, %v852_v50  ;;  %v865_v0 = vld [vmem:[#allocation6 + $0x938] sm:$0xff]  ;;  %v906_v50 = vld [vmem:[#allocation6 + $0xa80] sm:$0xff]  ;;  %v903_v51 = vld [vmem:[#allocation6 + $0xa68] sm:$0xff] }
 0x1e5   :  { %3806 = vmatpush1.bf16.msra.mxu1 %v3805_v5  ;;  %3966 = vmatpush1.bf16.msra.mxu0 %v3965_v6  ;;  %v3981_v5 = vpack.c.bf16 %v817_v57, %v812_v55  ;;  %v820_v6 = vld [vmem:[#allocation6 + $0x7d0] sm:$0xff]  ;;  %v3837_v57 = vpack.c.bf16 %v855_v46, %v850_v45  ;;  %v4011_v45 = vpack.c.bf16 %v898_v38, %v893_v37  ;;  %v930_v38 = vld [vmem:[#allocation6 + $0xb40] sm:$0xff] }
 0x1e6   :  { %3808 = vmatprep.subr.bf16.mxu1 %v3807_v10  ;;  %3968 = vmatprep.subr.bf16.mxu0 %v3967_v11  ;;  %v822_v10 = vld [vmem:[#allocation6 + $0x7e0] sm:$0xff]  ;;  %v827_v11 = vld [vmem:[#allocation6 + $0x808] sm:$0xff]  ;;  %v3825_v16 = vpack.c.bf16 %v825_v7, %v820_v6  ;;  %v868_v55 = vld [vmem:[#allocation6 + $0x950] sm:$0xff] }
 0x1e7   :  { %v3985_v17 = vpack.c.bf16 %v827_v11, %v822_v10  ;;  %v871_v6 = vld [vmem:[#allocation6 + $0x968] sm:$0xff]  ;;  %v876_v7 = vld [vmem:[#allocation6 + $0x990] sm:$0xff]  ;;  %v5182_v10 = vsub.s32 2, %v5146_v60 }
 0x1e8   :  { %v3843_v15 = vpack.c.bf16 %v876_v7, %v871_v6  ;;  %v892_v46 = vld [vmem:[#allocation6 + $0xa10] sm:$0xff]  ;;  %v918_v6 = vld [vmem:[#allocation6 + $0xae0] sm:$0xff] }
 0x1e9   :  { %3810 = vmatpush1.bf16.msra.mxu1 %v3809_v21  ;;  %3970 = vmatpush1.bf16.msra.mxu0 %v3969_v22  ;;  %v835_v21 = vld [vmem:[#allocation6 + $0x848] sm:$0xff]  ;;  %v3827_v22 = vpack.c.bf16 %v836_v13, %v831_v12  ;;  %v870_v13 = vld [vmem:[#allocation6 + $0x960] sm:$0xff]  ;;  %v339_v25 = vrot.slane %v5151_v62, %v5182_v10 }
 0x1ea   :  { %3812 = vmatprep.subr.bf16.mxu1 %v3811_v26  ;;  %3972 = vmatprep.subr.bf16.mxu0 %v3971_v27  ;;  %v841_v26 = vld [vmem:[#allocation6 + $0x878] sm:$0xff]  ;;  %v846_v27 = vld [vmem:[#allocation6 + $0x8a0] sm:$0xff]  ;;  %v3829_v30 = vpack.c.bf16 %v835_v21, %v830_v20 }
 0x1eb   :  { %v877_v20 = vld [vmem:[#allocation6 + $0x998] sm:$0xff] }
 0x1ec   :  { %v881_v21 = vld [vmem:[#allocation6 + $0x9b8] sm:$0xff] }
 0x1ed   :  { %3814 = vmatpush1.bf16.msra.mxu1 %v3813_v35  ;;  %3974 = vmatpush1.bf16.msra.mxu0 %v3973_v36  ;;  %v3142_v52 = vpop.f32.mrb[2].mxu0  ;;  %v3831_v35 = vpack.c.bf16 %v846_v27, %v841_v26  ;;  %v3991_v36 = vpack.c.bf16 %v848_v29, %v843_v28  ;;  %v3845_v26 = vpack.c.bf16 %v875_v42, %v870_v13  ;;  %v880_v28 = vld [vmem:[#allocation6 + $0x9b0] sm:$0xff]  ;;  %v885_v29 = vld [vmem:[#allocation6 + $0x9d8] sm:$0xff] }
 0x1ee   :  { %3816 = vmatprep.subr.bf16.mxu1 %v3815_v39  ;;  %3976 = vmatprep.subr.bf16.mxu0 %v3975_v40  ;;  %v3143_v59 = vpop.f32.mrb[3].mxu0  ;;  %v851_v39 = vld [vmem:[#allocation6 + $0x8c8] sm:$0xff]  ;;  %v856_v40 = vld [vmem:[#allocation6 + $0x8f0] sm:$0xff] }
 0x1ef   :  { %v5179_v3 = vadd.f32 %v3143_v59, %v3142_v52  ;;  %v861_v52 = vld [vmem:[#allocation6 + $0x918] sm:$0xff]  ;;  %v860_v59 = vld [vmem:[#allocation6 + $0x910] sm:$0xff] }
 0x1f0   :  { %v3841_v11 = vpack.c.bf16 %v865_v0, %v860_v59  ;;  %v902_v0 = vld [vmem:[#allocation6 + $0xa60] sm:$0xff]  ;;  %v912_v42 = vld [vmem:[#allocation6 + $0xab0] sm:$0xff] }
 0x1f1   :  { %3818 = vmatpush1.bf16.msra.mxu1 %v3817_v47  ;;  %3978 = vmatpush1.bf16.msra.mxu0 %v3977_v48  ;;  %v3835_v47 = vpack.c.bf16 %v856_v40, %v851_v39  ;;  %v3995_v48 = vpack.c.bf16 %v858_v41, %v853_v49  ;;  %v491_v39 = vadd.f32 %v5173_v19, %v339_v25  ;;  %v890_v41 = vld [vmem:[#allocation6 + $0xa00] sm:$0xff]  ;;  %v920_v25 = vld [vmem:[#allocation6 + $0xaf0] sm:$0xff] }
 0x1f2   :  { %3820 = vmatprep.subr.bf16.mxu1 %v3819_v53  ;;  %3980 = vmatprep.subr.bf16.mxu0 %v3979_v54  ;;  %v866_v53 = vld [vmem:[#allocation6 + $0x940] sm:$0xff]  ;;  %v863_v54 = vld [vmem:[#allocation6 + $0x928] sm:$0xff]  ;;  %v3849_v40 = vpack.c.bf16 %v885_v29, %v880_v28  ;;  %v4009_v49 = vpack.c.bf16 %v887_v33, %v882_v32  ;;  %v936_v32 = vld [vmem:[#allocation6 + $0xb70] sm:$0xff] }
 0x1f3   :  { %v3839_v1 = vpack.c.bf16 %v866_v53, %v861_v52  ;;  %v3999_v2 = vpack.c.bf16 %v868_v55, %v863_v54  ;;  %v908_v52 = vld [vmem:[#allocation6 + $0xa90] sm:$0xff]  ;;  %v5187_v53 = vmax.f32 %v491_v39, 0.0  ;;  %v922_v29 = vld [vmem:[#allocation6 + $0xb00] sm:$0xff]  ;;  %v933_v33 = vld [vmem:[#allocation6 + $0xb58] sm:$0xff] }
 0x1f4   :  { %v900_v55 = vld [vmem:[#allocation6 + $0xa50] sm:$0xff]  ;;  %v4015_v59 = vpack.c.bf16 %v908_v52, %v903_v51  ;;  %v935_v39 = vld [vmem:[#allocation6 + $0xb68] sm:$0xff]  ;;  %v945_v52 = vld [vmem:[#allocation6 + $0xbb8] sm:$0xff] }
 0x1f5   :  { %3822 = vmatpush1.bf16.msra.mxu1 %v3821_v4  ;;  %3982 = vmatpush1.bf16.msra.mxu0 %v3981_v5  ;;  %v862_v4 = vld [vmem:[#allocation6 + $0x920] sm:$0xff]  ;;  %v867_v5 = vld [vmem:[#allocation6 + $0x948] sm:$0xff]  ;;  %v940_v51 = vld [vmem:[#allocation6 + $0xb90] sm:$0xff] }
 0x1f6   :  { %3824 = vmatprep.subr.bf16.mxu1 %v3823_v8  ;;  %3984 = vmatprep.subr.bf16.mxu0 %v3983_v9  ;;  %v873_v8 = vld [vmem:[#allocation6 + $0x978] sm:$0xff]  ;;  %v878_v9 = vld [vmem:[#allocation6 + $0x9a0] sm:$0xff]  ;;  %v4001_v12 = vpack.c.bf16 %v867_v5, %v862_v4  ;;  %v916_v4 = vld [vmem:[#allocation6 + $0xad0] sm:$0xff] }
 0x1f7   :  { %v913_v5 = vld [vmem:[#allocation6 + $0xab8] sm:$0xff] }
 0x1f8   :  { %v4019_v13 = vpack.c.bf16 %v918_v6, %v913_v5  ;;  %v950_v6 = vld [vmem:[#allocation6 + $0xbe0] sm:$0xff] }
 0x1f9   :  { %3826 = vmatpush1.bf16.msra.mxu1 %v3825_v16  ;;  %3986 = vmatpush1.bf16.msra.mxu0 %v3985_v17  ;;  %v4003_v16 = vpack.c.bf16 %v878_v9, %v873_v8  ;;  %v872_v17 = vld [vmem:[#allocation6 + $0x970] sm:$0xff]  ;;  %v910_v9 = vld [vmem:[#allocation6 + $0xaa0] sm:$0xff] }
 0x1fa   :  { %3828 = vmatprep.subr.bf16.mxu1 %v3827_v22  ;;  %3988 = vmatprep.subr.bf16.mxu0 %v3987_v23  ;;  %v886_v22 = vld [vmem:[#allocation6 + $0x9e0] sm:$0xff]  ;;  %v883_v23 = vld [vmem:[#allocation6 + $0x9c8] sm:$0xff]  ;;  %v4005_v27 = vpack.c.bf16 %v877_v20, %v872_v17 }
 0x1fb   :  { %v926_v17 = vld [vmem:[#allocation6 + $0xb20] sm:$0xff]  ;;  %v923_v20 = vld [vmem:[#allocation6 + $0xb08] sm:$0xff] }
 0x1fd   :  { %3830 = vmatpush1.bf16.msra.mxu1 %v3829_v30  ;;  %3990 = vmatpush1.bf16.msra.mxu0 %v3989_v31  ;;  %v3847_v30 = vpack.c.bf16 %v886_v22, %v881_v21  ;;  %v4007_v31 = vpack.c.bf16 %v888_v24, %v883_v23  ;;  %v928_v21 = vld [vmem:[#allocation6 + $0xb30] sm:$0xff]  ;;  %v4938_v22 = vmov 0.0  }
 0x1fe   :  { %3832 = vmatprep.subr.bf16.mxu1 %v3831_v35  ;;  %3992 = vmatprep.subr.bf16.mxu0 %v3991_v36  ;;  %v891_v35 = vld [vmem:[#allocation6 + $0xa08] sm:$0xff]  ;;  %v896_v36 = vld [vmem:[#allocation6 + $0xa30] sm:$0xff]  ;;  %v4023_v28 = vpack.c.bf16 %v928_v21, %v923_v20 }
 0x1ff   :  { %v960_v21 = vld [vmem:[#allocation6 + $0xc30] sm:$0xff] }
 0x201   :  { %3834 = vmatpush1.bf16.msra.mxu1 %v3833_v43  ;;  %3994 = vmatpush1.bf16.msra.mxu0 %v3993_v44  ;;  %v895_v43 = vld [vmem:[#allocation6 + $0xa28] sm:$0xff]  ;;  %v3851_v44 = vpack.c.bf16 %v896_v36, %v891_v35  ;;  %v938_v35 = vld [vmem:[#allocation6 + $0xb80] sm:$0xff] }
 0x202   :  { %3836 = vmatprep.subr.bf16.mxu1 %v3835_v47  ;;  %3996 = vmatprep.subr.bf16.mxu0 %v3995_v48  ;;  %v897_v47 = vld [vmem:[#allocation6 + $0xa38] sm:$0xff]  ;;  %v3853_v19 = vpack.c.bf16 %v895_v43, %v890_v41  ;;  %v932_v41 = vld [vmem:[#allocation6 + $0xb50] sm:$0xff] }
 0x203   :  { %v901_v48 = vld [vmem:[#allocation6 + $0xa58] sm:$0xff]  ;;  %v4013_v54 = vpack.c.bf16 %v897_v47, %v892_v46  ;;  %v943_v46 = vld [vmem:[#allocation6 + $0xba8] sm:$0xff]  ;;  %v948_v47 = vld [vmem:[#allocation6 + $0xbd0] sm:$0xff] }
 0x204   :  { %v937_v43 = vld [vmem:[#allocation6 + $0xb78] sm:$0xff] }
 0x205   :  { %3838 = vmatpush1.bf16.msra.mxu1 %v3837_v57  ;;  %3998 = vmatpush1.bf16.msra.mxu0 %v3997_v58  ;;  %v905_v57 = vld [vmem:[#allocation6 + $0xa78] sm:$0xff]  ;;  %v3855_v58 = vpack.c.bf16 %v906_v50, %v901_v48  ;;  %v3869_v48 = vpack.c.bf16 %v935_v39, %v930_v38  ;;  %v4029_v50 = vpack.c.bf16 %v937_v43, %v932_v41  ;;  %v579_v38 = vld [vmem:[#allocation6 + $0x48] sm:$0xff]  ;;  %v734_v39 = vld [vmem:[#allocation6 + $0x520] sm:$0xff] }
 0x206   :  { %3840 = vmatprep.subr.bf16.mxu1 %v3839_v1  ;;  %4000 = vmatprep.subr.bf16.mxu0 %v3999_v2  ;;  %v907_v1 = vld [vmem:[#allocation6 + $0xa88] sm:$0xff]  ;;  %v3857_v7 = vpack.c.bf16 %v905_v57, %v900_v55  ;;  %v942_v55 = vld [vmem:[#allocation6 + $0xba0] sm:$0xff]  ;;  %v669_v43 = vld [vmem:[#allocation6 + $0x318] sm:$0xff] }
 0x207   :  { %v911_v2 = vld [vmem:[#allocation6 + $0xaa8] sm:$0xff]  ;;  %v4017_v8 = vpack.c.bf16 %v907_v1, %v902_v0  ;;  %v953_v0 = vld [vmem:[#allocation6 + $0xbf8] sm:$0xff]  ;;  %v958_v1 = vld [vmem:[#allocation6 + $0xc20] sm:$0xff] }
 0x208   :  { %v947_v57 = vld [vmem:[#allocation6 + $0xbc8] sm:$0xff] }
 0x209   :  { %3842 = vmatpush1.bf16.msra.mxu1 %v3841_v11  ;;  %4002 = vmatpush1.bf16.msra.mxu0 %v4001_v12  ;;  %v915_v11 = vld [vmem:[#allocation6 + $0xac8] sm:$0xff]  ;;  %v3859_v12 = vpack.c.bf16 %v916_v4, %v911_v2  ;;  %v5194_v2 = vsub.s32 4, %v5146_v60  ;;  %v3873_v4 = vpack.c.bf16 %v945_v52, %v940_v51  ;;  %v4033_v5 = vpack.c.bf16 %v947_v57, %v942_v55  ;;  %v834_v57 = vld [vmem:[#allocation6 + $0x840] sm:$0xff] }
 0x20a   :  { %3844 = vmatprep.subr.bf16.mxu1 %v3843_v15  ;;  %4004 = vmatprep.subr.bf16.mxu0 %v4003_v16  ;;  %v917_v15 = vld [vmem:[#allocation6 + $0xad8] sm:$0xff]  ;;  %v3861_v23 = vpack.c.bf16 %v915_v11, %v910_v9  ;;  %v4035_v9 = vpack.c.bf16 %v958_v1, %v953_v0  ;;  %v952_v11 = vld [vmem:[#allocation6 + $0xbf0] sm:$0xff]  ;;  %v679_v55 = vld [vmem:[#allocation6 + $0x368] sm:$0xff] }
 0x20b   :  { %v921_v16 = vld [vmem:[#allocation6 + $0xaf8] sm:$0xff]  ;;  %v4021_v24 = vpack.c.bf16 %v917_v15, %v912_v42  ;;  %v966_v42 = vld [vmem:[#allocation6 + $0xc60] sm:$0xff]  ;;  %v963_v15 = vld [vmem:[#allocation6 + $0xc48] sm:$0xff]  ;;  %v347_v60 = vrot.slane %v5151_v62, %v5194_v2 }
 0x20d   :  { %3846 = vmatpush1.bf16.msra.mxu1 %v3845_v26  ;;  %4006 = vmatpush1.bf16.msra.mxu0 %v4005_v27  ;;  %v925_v26 = vld [vmem:[#allocation6 + $0xb18] sm:$0xff]  ;;  %v3863_v27 = vpack.c.bf16 %v926_v17, %v921_v16  ;;  %v968_v16 = vld [vmem:[#allocation6 + $0xc70] sm:$0xff] }
 0x20e   :  { %3848 = vmatprep.subr.bf16.mxu1 %v3847_v30  ;;  %4008 = vmatprep.subr.bf16.mxu0 %v4007_v31  ;;  %v927_v30 = vld [vmem:[#allocation6 + $0xb28] sm:$0xff]  ;;  %v3865_v36 = vpack.c.bf16 %v925_v26, %v920_v25  ;;  %v4039_v25 = vpack.c.bf16 %v968_v16, %v963_v15  ;;  %v962_v26 = vld [vmem:[#allocation6 + $0xc40] sm:$0xff]  ;;  %v609_v16 = vld [vmem:[#allocation6 + $0x138] sm:$0xff] }
 0x20f   :  { %v931_v31 = vld [vmem:[#allocation6 + $0xb48] sm:$0xff]  ;;  %v4025_v37 = vpack.c.bf16 %v927_v30, %v922_v29  ;;  %v814_v30 = vld [vmem:[#allocation6 + $0x7a0] sm:$0xff] }
 0x210   :  { %v659_v29 = vld [vmem:[#allocation6 + $0x2c8] sm:$0xff] }
 0x211   :  { %3850 = vmatpush1.bf16.msra.mxu1 %v3849_v40  ;;  %4010 = vmatpush1.bf16.msra.mxu0 %v4009_v49  ;;  %v3867_v40 = vpack.c.bf16 %v936_v32, %v931_v31  ;;  %v4027_v49 = vpack.c.bf16 %v938_v35, %v933_v33  ;;  %v819_v31 = vld [vmem:[#allocation6 + $0x7c8] sm:$0xff]  ;;  %v562_v32 = vadd.f32 %v5179_v3, %v347_v60  ;;  %v764_v60 = vld [vmem:[#allocation6 + $0x610] sm:$0xff] }
 0x212   :  { %3852 = vmatprep.subr.bf16.mxu1 %v3851_v44  ;;  %4012 = vmatprep.subr.bf16.mxu0 %v4011_v45  ;;  %v941_v44 = vld [vmem:[#allocation6 + $0xb98] sm:$0xff]  ;;  %v946_v45 = vld [vmem:[#allocation6 + $0xbc0] sm:$0xff] }
 0x213   :  { %v5199_v41 = vmax.f32 %v562_v32, 0.0 }
 0x214   :  { %1133 = vmatmul.mubr.f32.vlgmr.msra.gmra.mrb[2].mxu1 %v5187_v53  ;;  %1346 = vmatmul.mubr.f32.vlgmr.msra.gmra.mrb[4].mxu0 %v5187_v53 }
 0x215   :  { %3854 = vmatpush1.bf16.msra.mxu1 %v3853_v19  ;;  %4014 = vmatpush1.bf16.msra.mxu0 %v4013_v54  ;;  %v3871_v19 = vpack.c.bf16 %v946_v45, %v941_v44  ;;  %v4031_v54 = vpack.c.bf16 %v948_v47, %v943_v46  ;;  %v824_v44 = vld [vmem:[#allocation6 + $0x7f0] sm:$0xff]  ;;  %v829_v45 = vld [vmem:[#allocation6 + $0x818] sm:$0xff] }
 0x216   :  { %3856 = vmatprep.subr.bf16.mxu1 %v3855_v58  ;;  %4016 = vmatprep.subr.bf16.mxu0 %v4015_v59  ;;  %v951_v58 = vld [vmem:[#allocation6 + $0xbe8] sm:$0xff]  ;;  %v956_v59 = vld [vmem:[#allocation6 + $0xc10] sm:$0xff]  ;;  %v4079_v52 = vpack.c.bf16 %v829_v45, %v824_v44 }
 0x217   :  { %1203 = vmatprep.mubr.f32.mxu1 %v4938_v22  ;;  %1416 = vmatprep.mubr.f32.mxu0 %v4938_v22  ;;  %v584_v47 = vld [vmem:[#allocation6 + $0x70] sm:$0xff] }
 0x218   :  { %v784_v44 = vld [vmem:[#allocation6 + $0x6b0] sm:$0xff] }
 0x219   :  { %3858 = vmatpush1.bf16.msra.mxu1 %v3857_v7  ;;  %4018 = vmatpush1.bf16.msra.mxu0 %v4017_v8  ;;  %v955_v7 = vld [vmem:[#allocation6 + $0xc08] sm:$0xff]  ;;  %v3875_v8 = vpack.c.bf16 %v956_v59, %v951_v58 }
 0x21a   :  { %3860 = vmatprep.subr.bf16.mxu1 %v3859_v12  ;;  %4020 = vmatprep.subr.bf16.mxu0 %v4019_v13  ;;  %v957_v12 = vld [vmem:[#allocation6 + $0xc18] sm:$0xff]  ;;  %v3877_v17 = vpack.c.bf16 %v955_v7, %v950_v6  ;;  %v839_v58 = vld [vmem:[#allocation6 + $0x868] sm:$0xff]  ;;  %v754_v6 = vld [vmem:[#allocation6 + $0x5c0] sm:$0xff] }
 0x21b   :  { %v961_v13 = vld [vmem:[#allocation6 + $0xc38] sm:$0xff]  ;;  %v4037_v20 = vpack.c.bf16 %v957_v12, %v952_v11  ;;  %v4083_v7 = vpack.c.bf16 %v839_v58, %v834_v57  ;;  %v844_v12 = vld [vmem:[#allocation6 + $0x890] sm:$0xff]  ;;  %v794_v57 = vld [vmem:[#allocation6 + $0x700] sm:$0xff] }
 0x21c   :  { %v689_v11 = vld [vmem:[#allocation6 + $0x3b8] sm:$0xff] }
 0x21d   :  { %3862 = vmatpush1.bf16.msra.mxu1 %v3861_v23  ;;  %4022 = vmatpush1.bf16.msra.mxu0 %v4021_v24  ;;  %v965_v23 = vld [vmem:[#allocation6 + $0xc58] sm:$0xff]  ;;  %v3879_v24 = vpack.c.bf16 %v966_v42, %v961_v13 }
 0x21e   :  { %3864 = vmatprep.subr.bf16.mxu1 %v3863_v27  ;;  %4024 = vmatprep.subr.bf16.mxu0 %v4023_v28  ;;  %v967_v27 = vld [vmem:[#allocation6 + $0xc68] sm:$0xff]  ;;  %v654_v28 = vld [vmem:[#allocation6 + $0x2a0] sm:$0xff]  ;;  %v3881_v62 = vpack.c.bf16 %v965_v23, %v960_v21  ;;  %v849_v13 = vld [vmem:[#allocation6 + $0x8b8] sm:$0xff] }
 0x21f   :  { %v4041_v33 = vpack.c.bf16 %v967_v27, %v962_v26  ;;  %v4043_v35 = vpack.c.bf16 %v659_v29, %v654_v28  ;;  %v694_v21 = vld [vmem:[#allocation6 + $0x3e0] sm:$0xff]  ;;  %v699_v23 = vld [vmem:[#allocation6 + $0x408] sm:$0xff] }
 0x220   :  { %v4059_v28 = vpack.c.bf16 %v699_v23, %v694_v21  ;;  %v614_v29 = vld [vmem:[#allocation6 + $0x160] sm:$0xff]  ;;  %v1643_v23 = vld [vmem:[#allocation9 + $0x28] sm:$0xff] }
 0x221   :  { %3866 = vmatpush1.bf16.msra.mxu1 %v3865_v36  ;;  %4026 = vmatpush1.bf16.msra.mxu0 %v4025_v37  ;;  %v4075_v36 = vpack.c.bf16 %v819_v31, %v814_v30  ;;  %v574_v37 = vld [vmem:[#allocation6 + $0x20] sm:$0xff]  ;;  %v619_v30 = vld [vmem:[#allocation6 + $0x188] sm:$0xff] }
 0x222   :  { %3868 = vmatprep.subr.bf16.mxu1 %v3867_v40  ;;  %4028 = vmatprep.subr.bf16.mxu0 %v4027_v49  ;;  %v739_v40 = vld [vmem:[#allocation6 + $0x548] sm:$0xff]  ;;  %v664_v49 = vld [vmem:[#allocation6 + $0x2f0] sm:$0xff]  ;;  %v4045_v3 = vpack.c.bf16 %v579_v38, %v574_v37  ;;  %v774_v31 = vld [vmem:[#allocation6 + $0x660] sm:$0xff]  ;;  %v4061_v38 = vpack.c.bf16 %v619_v30, %v614_v29 }
 0x223   :  { %v4077_v46 = vpack.c.bf16 %v739_v40, %v734_v39  ;;  %v4047_v51 = vpack.c.bf16 %v669_v43, %v664_v49  ;;  %v869_v37 = vld [vmem:[#allocation6 + $0x958] sm:$0xff]  ;;  %v624_v49 = vld [vmem:[#allocation6 + $0x1b0] sm:$0xff]  ;;  %v1638_v21 = vld [vmem:[#allocation9] sm:$0xff] }
 0x224   :  { %v629_v43 = vld [vmem:[#allocation6 + $0x1d8] sm:$0xff]  ;;  %v4133_v30 = vpack.c.bf16 %v1643_v23, %v1638_v21 }
 0x225   :  { %3870 = vmatpush1.bf16.msra.mxu1 %v3869_v48  ;;  %4030 = vmatpush1.bf16.msra.mxu0 %v4029_v50  ;;  %v589_v48 = vld [vmem:[#allocation6 + $0x98] sm:$0xff]  ;;  %v744_v50 = vld [vmem:[#allocation6 + $0x570] sm:$0xff] }
 0x226   :  { %3872 = vmatprep.subr.bf16.mxu1 %v3871_v19  ;;  %4032 = vmatprep.subr.bf16.mxu0 %v4031_v54  ;;  %v749_v19 = vld [vmem:[#allocation6 + $0x598] sm:$0xff]  ;;  %v674_v54 = vld [vmem:[#allocation6 + $0x340] sm:$0xff]  ;;  %v4049_v59 = vpack.c.bf16 %v589_v48, %v584_v47  ;;  %v719_v47 = vld [vmem:[#allocation6 + $0x4a8] sm:$0xff] }
 0x227   :  { %v4081_v0 = vpack.c.bf16 %v749_v19, %v744_v50  ;;  %v4051_v1 = vpack.c.bf16 %v679_v55, %v674_v54  ;;  %v874_v48 = vld [vmem:[#allocation6 + $0x980] sm:$0xff]  ;;  %v879_v50 = vld [vmem:[#allocation6 + $0x9a8] sm:$0xff]  ;;  %v909_v29 = vld [vmem:[#allocation6 + $0xa98] sm:$0xff] }
 0x228   :  { %v634_v54 = vld [vmem:[#allocation6 + $0x200] sm:$0xff]  ;;  %v639_v55 = vld [vmem:[#allocation6 + $0x228] sm:$0xff]  ;;  %v4099_v58 = vpack.c.bf16 %v879_v50, %v874_v48  ;;  %v1668_v48 = vld [vmem:[#allocation9 + $0xf0] sm:$0xff] }
 0x229   :  { %3874 = vmatpush1.bf16.msra.mxu1 %v3873_v4  ;;  %4034 = vmatpush1.bf16.msra.mxu0 %v4033_v5  ;;  %v594_v4 = vld [vmem:[#allocation6 + $0xc0] sm:$0xff]  ;;  %v599_v5 = vld [vmem:[#allocation6 + $0xe8] sm:$0xff] }
 0x22a   :  { %3876 = vmatprep.subr.bf16.mxu1 %v3875_v8  ;;  %4036 = vmatprep.subr.bf16.mxu0 %v4035_v9  ;;  %v759_v8 = vld [vmem:[#allocation6 + $0x5e8] sm:$0xff]  ;;  %v684_v9 = vld [vmem:[#allocation6 + $0x390] sm:$0xff]  ;;  %v4053_v42 = vpack.c.bf16 %v599_v5, %v594_v4  ;;  %v889_v5 = vld [vmem:[#allocation6 + $0x9f8] sm:$0xff] }
 0x22b   :  { %v4055_v15 = vpack.c.bf16 %v689_v11, %v684_v9  ;;  %v884_v4 = vld [vmem:[#allocation6 + $0x9d0] sm:$0xff]  ;;  %v649_v11 = vld [vmem:[#allocation6 + $0x278] sm:$0xff] }
 0x22c   :  { %v644_v9 = vld [vmem:[#allocation6 + $0x250] sm:$0xff]  ;;  %v1673_v50 = vld [vmem:[#allocation9 + $0x118] sm:$0xff] }
 0x22d   :  { %3878 = vmatpush1.bf16.msra.mxu1 %v3877_v17  ;;  %4038 = vmatpush1.bf16.msra.mxu0 %v4037_v20  ;;  %v4087_v17 = vpack.c.bf16 %v849_v13, %v844_v12  ;;  %v769_v20 = vld [vmem:[#allocation6 + $0x638] sm:$0xff]  ;;  %v4103_v12 = vpack.c.bf16 %v889_v5, %v884_v4  ;;  %v804_v13 = vld [vmem:[#allocation6 + $0x750] sm:$0xff]  ;;  %v1694_v5 = vld [vmem:[#allocation9 + $0x1c0] sm:$0xff] }
 0x22e   :  { %3880 = vmatprep.subr.bf16.mxu1 %v3879_v24  ;;  %4040 = vmatprep.subr.bf16.mxu0 %v4039_v25  ;;  %v854_v24 = vld [vmem:[#allocation6 + $0x8e0] sm:$0xff]  ;;  %v859_v25 = vld [vmem:[#allocation6 + $0x908] sm:$0xff]  ;;  %v4089_v27 = vpack.c.bf16 %v769_v20, %v764_v60 }
 0x22f   :  { %v4091_v32 = vpack.c.bf16 %v859_v25, %v854_v24  ;;  %v894_v60 = vld [vmem:[#allocation6 + $0xa20] sm:$0xff] }
 0x230   :  { %v1649_v25 = vld [vmem:[#allocation9 + $0x58] sm:$0xff] }
 0x231   :  { %3882 = vmatpush1.bf16.msra.mxu1 %v3881_v62  ;;  %4042 = vmatpush1.bf16.msra.mxu0 %v4041_v33  ;;  %v779_v62 = vld [vmem:[#allocation6 + $0x688] sm:$0xff]  ;;  %v704_v33 = vld [vmem:[#allocation6 + $0x430] sm:$0xff]  ;;  %v1689_v4 = vld [vmem:[#allocation9 + $0x198] sm:$0xff] }
 0x232   :  { %4044 = vmatprep.subr.bf16.mxu1 %v4043_v35  ;;  %4076 = vmatprep.subr.bf16.mxu0 %v4075_v36  ;;  %v709_v35 = vld [vmem:[#allocation6 + $0x458] sm:$0xff]  ;;  %v864_v36 = vld [vmem:[#allocation6 + $0x930] sm:$0xff]  ;;  %v4093_v39 = vpack.c.bf16 %v779_v62, %v774_v31 }
 0x233   :  { %v4063_v40 = vpack.c.bf16 %v709_v35, %v704_v33  ;;  %v4095_v45 = vpack.c.bf16 %v869_v37, %v864_v36  ;;  %v1653_v62 = vld [vmem:[#allocation9 + $0x78] sm:$0xff]  ;;  %v1659_v35 = vld [vmem:[#allocation9 + $0xa8] sm:$0xff]  ;;  %v1664_v36 = vld [vmem:[#allocation9 + $0xd0] sm:$0xff] }
 0x234   :  { %1204 = vmatmul.mubr.f32.vlgmr.msra.gmra.mrb[2].mxu1 %v5199_v41  ;;  %1417 = vmatmul.mubr.f32.vlgmr.msra.gmra.mrb[4].mxu0 %v5199_v41  ;;  %v914_v37 = vld [vmem:[#allocation6 + $0xac0] sm:$0xff] }
 0x235   :  { %4046 = vmatpush3.bf16.msra.mxu1 %v4045_v3  ;;  %1487 = vmatprep.mubr.f32.mxu1 %v5160_v14  ;;  %v4085_v14 = vpack.c.bf16 %v759_v8, %v754_v6  ;;  %v789_v3 = vld [vmem:[#allocation6 + $0x6d8] sm:$0xff]  ;;  %v4069_v6 = vpack.c.bf16 %v639_v55, %v634_v54  ;;  %v934_v54 = vld [vmem:[#allocation6 + $0xb60] sm:$0xff]  ;;  %v939_v55 = vld [vmem:[#allocation6 + $0xb88] sm:$0xff] }
 0x236   :  { %4078 = vmatpush3.bf16.msra.mxu0 %v4077_v46  ;;  %1557 = vmatprep.mubr.f32.mxu0 %v5175_v34  ;;  %v604_v34 = vld [vmem:[#allocation6 + $0x110] sm:$0xff]  ;;  %v714_v46 = vld [vmem:[#allocation6 + $0x480] sm:$0xff] }
 0x237   :  { %4048 = vmatprep.subr.bf16.mxu1 %v4047_v51  ;;  %4080 = vmatprep.subr.bf16.mxu0 %v4079_v52  ;;  %v4057_v26 = vpack.c.bf16 %v609_v16, %v604_v34  ;;  %v4065_v51 = vpack.c.bf16 %v629_v43, %v624_v49  ;;  %v4097_v52 = vpack.c.bf16 %v789_v3, %v784_v44  ;;  %v1663_v49 = vld [vmem:[#allocation9 + $0xc8] sm:$0xff]  ;;  %v1669_v43 = vld [vmem:[#allocation9 + $0xf8] sm:$0xff]  ;;  %v1674_v44 = vld [vmem:[#allocation9 + $0x120] sm:$0xff] }
 0x238   :  { %v4067_v19 = vpack.c.bf16 %v719_v47, %v714_v46  ;;  %v4073_v34 = vpack.c.bf16 %v649_v11, %v644_v9  ;;  %v929_v3 = vld [vmem:[#allocation6 + $0xb38] sm:$0xff]  ;;  %v4143_v47 = vpack.c.bf16 %v1674_v44, %v1669_v43  ;;  %v4151_v9 = vpack.c.bf16 %v1694_v5, %v1689_v4  ;;  %v1718_v43 = vld [vmem:[#allocation9 + $0x280] sm:$0xff]  ;;  %v1723_v44 = vld [vmem:[#allocation9 + $0x2a8] sm:$0xff] }
 0x239   :  { %4050 = vmatpush3.bf16.msra.mxu1 %v4049_v59  ;;  %v799_v59 = vld [vmem:[#allocation6 + $0x728] sm:$0xff]  ;;  %v1688_v11 = vld [vmem:[#allocation9 + $0x190] sm:$0xff]  ;;  %v1709_v23 = vld [vmem:[#allocation9 + $0x238] sm:$0xff] }
 0x23a   :  { %4082 = vmatpush3.bf16.msra.mxu0 %v4081_v0  ;;  %4052 = vmatprep.subr.bf16.mxu1 %v4051_v1  ;;  %v724_v0 = vld [vmem:[#allocation6 + $0x4d0] sm:$0xff]  ;;  %v729_v1 = vld [vmem:[#allocation6 + $0x4f8] sm:$0xff] }
 0x23b   :  { %4084 = vmatprep.subr.bf16.mxu0 %v4083_v7  ;;  %v4101_v7 = vpack.c.bf16 %v799_v59, %v794_v57  ;;  %v4071_v8 = vpack.c.bf16 %v729_v1, %v724_v0  ;;  %v4145_v57 = vpack.c.bf16 %v1673_v50, %v1668_v48  ;;  %v1678_v59 = vld [vmem:[#allocation9 + $0x140] sm:$0xff]  ;;  %v1683_v0 = vld [vmem:[#allocation9 + $0x168] sm:$0xff]  ;;  %v4120_v1 = vpack.c.bf16 %v939_v55, %v934_v54  ;;  %v1728_v55 = vld [vmem:[#allocation9 + $0x2d0] sm:$0xff] }
 0x23c   :  { %v1650_v48 = vld [vmem:[#allocation9 + $0x60] sm:$0xff]  ;;  %v1655_v50 = vld [vmem:[#allocation9 + $0x88] sm:$0xff]  ;;  %v1660_v4 = vld [vmem:[#allocation9 + $0xb0] sm:$0xff] }
 0x23d   :  { %4054 = vmatpush3.bf16.msra.mxu1 %v4053_v42  ;;  %v809_v42 = vld [vmem:[#allocation6 + $0x778] sm:$0xff] }
 0x23e   :  { %4086 = vmatpush3.bf16.msra.mxu0 %v4085_v14  ;;  %4056 = vmatprep.subr.bf16.mxu1 %v4055_v15  ;;  %v1639_v14 = vld [vmem:[#allocation9 + $0x8] sm:$0xff]  ;;  %v1644_v15 = vld [vmem:[#allocation9 + $0x30] sm:$0xff]  ;;  %v4105_v16 = vpack.c.bf16 %v809_v42, %v804_v13  ;;  %v1665_v5 = vld [vmem:[#allocation9 + $0xd8] sm:$0xff] }
 0x23f   :  { %4088 = vmatprep.subr.bf16.mxu0 %v4087_v17  ;;  %v899_v17 = vld [vmem:[#allocation6 + $0xa48] sm:$0xff]  ;;  %v4131_v20 = vpack.c.bf16 %v1644_v15, %v1639_v14  ;;  %v1704_v14 = vld [vmem:[#allocation9 + $0x210] sm:$0xff]  ;;  %v954_v15 = vld [vmem:[#allocation6 + $0xc00] sm:$0xff] }
 0x240   :  { %v4108_v24 = vpack.c.bf16 %v899_v17, %v894_v60  ;;  %v1699_v42 = vld [vmem:[#allocation9 + $0x1e8] sm:$0xff]  ;;  %v1698_v17 = vld [vmem:[#allocation9 + $0x1e0] sm:$0xff] }
 0x241   :  { %4058 = vmatpush3.bf16.msra.mxu1 %v4057_v26  ;;  %v1654_v26 = vld [vmem:[#allocation9 + $0x80] sm:$0xff]  ;;  %v4155_v60 = vpack.c.bf16 %v1704_v14, %v1699_v42 }
 0x242   :  { %4090 = vmatpush3.bf16.msra.mxu0 %v4089_v27  ;;  %4060 = vmatprep.subr.bf16.mxu1 %v4059_v28  ;;  %v4939_v27 = vmov 0.0|0.0   ;;  %v904_v28 = vld [vmem:[#allocation6 + $0xa70] sm:$0xff]  ;;  %v4135_v31 = vpack.c.bf16 %v1654_v26, %v1649_v25  ;;  %v969_v26 = vld [vmem:[#allocation6 + $0xc78] sm:$0xff]  ;;  %v1754_v42 = vld [vmem:[#allocation9 + $0x3a0] sm:$0xff] }
 0x243   :  { %4092 = vmatprep.subr.bf16.mxu0 %v4091_v32  ;;  %v1648_v32 = vld [vmem:[#allocation9 + $0x50] sm:$0xff]  ;;  %v4111_v33 = vpack.c.bf16 %v909_v29, %v904_v28  ;;  %v1641_v28 = vld [vmem:[#allocation9 + $0x18] sm:$0xff]  ;;  %v1646_v29 = vld [vmem:[#allocation9 + $0x40] sm:$0xff] }
 0x244   :  { %v964_v25 = vld [vmem:[#allocation6 + $0xc50] sm:$0xff] }
 0x245   :  { %4062 = vmatpush3.bf16.msra.mxu1 %v4061_v38  ;;  %v919_v38 = vld [vmem:[#allocation6 + $0xae8] sm:$0xff] }
 0x246   :  { %4094 = vmatpush3.bf16.msra.mxu0 %v4093_v39  ;;  %4064 = vmatprep.subr.bf16.mxu1 %v4063_v40  ;;  %v4137_v39 = vpack.c.bf16 %v1653_v62, %v1648_v32  ;;  %v1658_v40 = vld [vmem:[#allocation9 + $0xa0] sm:$0xff]  ;;  %v1708_v32 = vld [vmem:[#allocation9 + $0x230] sm:$0xff]  ;;  %v1713_v62 = vld [vmem:[#allocation9 + $0x258] sm:$0xff] }
 0x247   :  { %4096 = vmatprep.subr.bf16.mxu0 %v4095_v45  ;;  %v924_v45 = vld [vmem:[#allocation6 + $0xb10] sm:$0xff]  ;;  %v4141_v46 = vpack.c.bf16 %v1663_v49, %v1658_v40  ;;  %v4161_v49 = vpack.c.bf16 %v1713_v62, %v1708_v32 }
 0x248   :  { %v1656_v40 = vld [vmem:[#allocation9 + $0x90] sm:$0xff] }
 0x249   :  { %4066 = vmatpush3.bf16.msra.mxu1 %v4065_v51  ;;  %v4117_v51 = vpack.c.bf16 %v929_v3, %v924_v45  ;;  %v1729_v3 = vld [vmem:[#allocation9 + $0x2d8] sm:$0xff]  ;;  %v1696_v32 = vld [vmem:[#allocation9 + $0x1d0] sm:$0xff] }
 0x24a   :  { %4098 = vmatpush3.bf16.msra.mxu0 %v4097_v52  ;;  %4068 = vmatprep.subr.bf16.mxu1 %v4067_v19  ;;  %v1679_v52 = vld [vmem:[#allocation9 + $0x148] sm:$0xff]  ;;  %v1684_v19 = vld [vmem:[#allocation9 + $0x170] sm:$0xff] }
 0x24b   :  { %4100 = vmatprep.subr.bf16.mxu0 %v4099_v58  ;;  %v4147_v58 = vpack.c.bf16 %v1684_v19, %v1679_v52  ;;  %v1666_v52 = vld [vmem:[#allocation9 + $0xe0] sm:$0xff]  ;;  %v4165_v19 = vpack.c.bf16 %v1723_v44, %v1718_v43 }
 0x24c   :  { %v1706_v43 = vld [vmem:[#allocation9 + $0x220] sm:$0xff] }
 0x24d   :  { %4070 = vmatpush3.bf16.msra.mxu1 %v4069_v6  ;;  %v944_v6 = vld [vmem:[#allocation6 + $0xbb0] sm:$0xff] }
 0x24e   :  { %4102 = vmatpush3.bf16.msra.mxu0 %v4101_v7  ;;  %4072 = vmatprep.subr.bf16.mxu1 %v4071_v8  ;;  %v949_v7 = vld [vmem:[#allocation6 + $0xbd8] sm:$0xff]  ;;  %v4149_v8 = vpack.c.bf16 %v1683_v0, %v1678_v59  ;;  %v1739_v59 = vld [vmem:[#allocation9 + $0x328] sm:$0xff] }
 0x24f   :  { %4104 = vmatprep.subr.bf16.mxu0 %v4103_v12  ;;  %v1693_v12 = vld [vmem:[#allocation9 + $0x1b8] sm:$0xff]  ;;  %v4123_v13 = vpack.c.bf16 %v949_v7, %v944_v6  ;;  %v1744_v0 = vld [vmem:[#allocation9 + $0x350] sm:$0xff]  ;;  %v1671_v6 = vld [vmem:[#allocation9 + $0x108] sm:$0xff] }
 0x250   :  { %v1676_v7 = vld [vmem:[#allocation9 + $0x130] sm:$0xff] }
 0x251   :  { %4074 = vmatpush3.bf16.msra.mxu1 %v4073_v34  ;;  %v959_v34 = vld [vmem:[#allocation6 + $0xc28] sm:$0xff]  ;;  %v4303_v14 = vpack.c.bf16 %v1676_v7, %v1671_v6 }
 0x252   :  { %4106 = vmatpush3.bf16.msra.mxu0 %v4105_v16  ;;  %4107 = vmatprep.subr.bf16.mxu1 %v4939_v27  ;;  %v4153_v16 = vpack.c.bf16 %v1693_v12, %v1688_v11  ;;  %v4126_v21 = vpack.c.bf16 %v959_v34, %v954_v15  ;;  %v1738_v11 = vld [vmem:[#allocation9 + $0x320] sm:$0xff]  ;;  %v4301_v12 = vpack.c.bf16 %v1665_v5, %v1660_v4  ;;  %v1675_v34 = vld [vmem:[#allocation9 + $0x128] sm:$0xff]  ;;  %v1789_v4 = vld [vmem:[#allocation9 + $0x4b8] sm:$0xff] }
 0x253   :  { %4132 = vmatprep.subr.bf16.mxu0 %v4131_v20  ;;  %v1703_v20 = vld [vmem:[#allocation9 + $0x208] sm:$0xff]  ;;  %v1670_v15 = vld [vmem:[#allocation9 + $0x100] sm:$0xff] }
 0x254   :  { %1488 = vmatmul.mubr.f32.vlgmr.msra.gmra.mrb[4].mxu1 %v5162_v18  ;;  %v4139_v18 = vpack.c.bf16 %v1664_v36, %v1659_v35  ;;  %v1719_v35 = vld [vmem:[#allocation9 + $0x288] sm:$0xff]  ;;  %v1724_v36 = vld [vmem:[#allocation9 + $0x2b0] sm:$0xff]  ;;  %v1794_v5 = vld [vmem:[#allocation9 + $0x4e0] sm:$0xff] }
 0x255   :  { %1558 = vmatmul.mubr.f32.vlgmr.msra.gmra.mrb[6].mxu0 %v5187_v53  ;;  %4109 = vmatpush3.bf16.msra.mxu1 %v4108_v24  ;;  %v4114_v53 = vpack.c.bf16 %v919_v38, %v914_v37  ;;  %v1714_v24 = vld [vmem:[#allocation9 + $0x260] sm:$0xff]  ;;  %v4291_v37 = vpack.c.bf16 %v1646_v29, %v1641_v28  ;;  %v1640_v38 = vld [vmem:[#allocation9 + $0x10] sm:$0xff] }
 0x256   :  { %4110 = vmatprep.subr.bf16.mxu1 %v4939_v27  ;;  %3455 = vmatprep.mubr.msk.f32.mxu1 %vm4940_vm0, %v4938_v22  ;;  %v1680_v29 = vld [vmem:[#allocation9 + $0x150] sm:$0xff]  ;;  %v1710_v7 = vld [vmem:[#allocation9 + $0x240] sm:$0xff] }
 0x257   :  { %4134 = vmatpush1.bf16.msra.mxu0 %v4133_v30  ;;  %v4157_v30 = vpack.c.bf16 %v1703_v20, %v1698_v17 }
 0x258   :  { %4136 = vmatprep.subr.bf16.mxu0 %v4135_v31  ;;  %v4159_v31 = vpack.c.bf16 %v1714_v24, %v1709_v23  ;;  %v1753_v23 = vld [vmem:[#allocation9 + $0x398] sm:$0xff]  ;;  %v4305_v24 = vpack.c.bf16 %v1675_v34, %v1670_v15  ;;  %v1799_v15 = vld [vmem:[#allocation9 + $0x508] sm:$0xff]  ;;  %v1804_v34 = vld [vmem:[#allocation9 + $0x530] sm:$0xff] }
 0x259   :  { %4112 = vmatpush3.bf16.msra.mxu1 %v4111_v33  ;;  %v4129_v33 = vpack.c.bf16 %v969_v26, %v964_v25  ;;  %v1759_v25 = vld [vmem:[#allocation9 + $0x3c8] sm:$0xff]  ;;  %v1764_v26 = vld [vmem:[#allocation9 + $0x3f0] sm:$0xff] }
 0x25a   :  { %4113 = vmatprep.subr.bf16.mxu1 %v4939_v27 }
 0x25b   :  { %4138 = vmatpush1.bf16.msra.mxu0 %v4137_v39  ;;  %v1645_v39 = vld [vmem:[#allocation9 + $0x38] sm:$0xff] }
 0x25c   :  { %4140 = vmatprep.subr.bf16.mxu0 %v4139_v18  ;;  %v1651_v18 = vld [vmem:[#allocation9 + $0x68] sm:$0xff]  ;;  %v4293_v45 = vpack.c.bf16 %v1645_v39, %v1640_v38  ;;  %v1769_v38 = vld [vmem:[#allocation9 + $0x418] sm:$0xff]  ;;  %v1774_v39 = vld [vmem:[#allocation9 + $0x440] sm:$0xff] }
 0x25d   :  { %4115 = vmatpush3.bf16.msra.mxu1 %v4114_v53  ;;  %v4163_v53 = vpack.c.bf16 %v1724_v36, %v1719_v35  ;;  %v1758_v35 = vld [vmem:[#allocation9 + $0x3c0] sm:$0xff]  ;;  %v1763_v36 = vld [vmem:[#allocation9 + $0x3e8] sm:$0xff] }
 0x25e   :  { %4116 = vmatprep.subr.bf16.mxu1 %v4939_v27  ;;  %v4181_v44 = vpack.c.bf16 %v1763_v36, %v1758_v35  ;;  %v1745_v35 = vld [vmem:[#allocation9 + $0x358] sm:$0xff]  ;;  %v1751_v36 = vld [vmem:[#allocation9 + $0x388] sm:$0xff] }
 0x25f   :  { %4142 = vmatpush1.bf16.msra.mxu0 %v4141_v46  ;;  %v1734_v46 = vld [vmem:[#allocation9 + $0x300] sm:$0xff] }
 0x260   :  { %4144 = vmatprep.subr.bf16.mxu0 %v4143_v47  ;;  %v4295_v47 = vpack.c.bf16 %v1656_v40, %v1651_v18  ;;  %v4167_v54 = vpack.c.bf16 %v1734_v46, %v1729_v3  ;;  %v1690_v40 = vld [vmem:[#allocation9 + $0x1a0] sm:$0xff]  ;;  %v1768_v3 = vld [vmem:[#allocation9 + $0x410] sm:$0xff]  ;;  %v1773_v46 = vld [vmem:[#allocation9 + $0x438] sm:$0xff] }
 0x261   :  { %4118 = vmatpush3.bf16.msra.mxu1 %v4117_v51  ;;  %v1661_v51 = vld [vmem:[#allocation9 + $0xb8] sm:$0xff] }
 0x262   :  { %4119 = vmatprep.subr.bf16.mxu1 %v4939_v27 }
 0x263   :  { %4146 = vmatpush1.bf16.msra.mxu0 %v4145_v57  ;;  %v1733_v57 = vld [vmem:[#allocation9 + $0x2f8] sm:$0xff] }
 0x264   :  { %4148 = vmatprep.subr.bf16.mxu0 %v4147_v58  ;;  %v4297_v58 = vpack.c.bf16 %v1655_v50, %v1650_v48  ;;  %v1779_v48 = vld [vmem:[#allocation9 + $0x468] sm:$0xff]  ;;  %v1784_v50 = vld [vmem:[#allocation9 + $0x490] sm:$0xff] }
 0x265   :  { %4121 = vmatpush3.bf16.msra.mxu1 %v4120_v1  ;;  %v4299_v1 = vpack.c.bf16 %v1666_v52, %v1661_v51  ;;  %v1700_v52 = vld [vmem:[#allocation9 + $0x1f0] sm:$0xff] }
 0x266   :  { %4122 = vmatprep.subr.bf16.mxu1 %v4939_v27 }
 0x267   :  { %4150 = vmatpush1.bf16.msra.mxu0 %v4149_v8  ;;  %v4169_v8 = vpack.c.bf16 %v1733_v57, %v1728_v55  ;;  %v1716_v55 = vld [vmem:[#allocation9 + $0x270] sm:$0xff]  ;;  %v4185_v57 = vpack.c.bf16 %v1773_v46, %v1768_v3  ;;  %v1765_v3 = vld [vmem:[#allocation9 + $0x3f8] sm:$0xff]  ;;  %v1771_v46 = vld [vmem:[#allocation9 + $0x428] sm:$0xff] }
 0x268   :  { %4152 = vmatprep.subr.bf16.mxu0 %v4151_v9  ;;  %v4171_v9 = vpack.c.bf16 %v1744_v0, %v1739_v59  ;;  %v1778_v59 = vld [vmem:[#allocation9 + $0x460] sm:$0xff]  ;;  %v1783_v0 = vld [vmem:[#allocation9 + $0x488] sm:$0xff] }
 0x269   :  { %4124 = vmatpush3.bf16.msra.mxu1 %v4123_v13  ;;  %v1749_v13 = vld [vmem:[#allocation9 + $0x378] sm:$0xff] }
 0x26a   :  { %4125 = vmatprep.subr.bf16.mxu1 %v4939_v27  ;;  %v4175_v20 = vpack.c.bf16 %v1754_v42, %v1749_v13  ;;  %v1788_v13 = vld [vmem:[#allocation9 + $0x4b0] sm:$0xff]  ;;  %v1793_v42 = vld [vmem:[#allocation9 + $0x4d8] sm:$0xff] }
 0x26b   :  { %4154 = vmatpush1.bf16.msra.mxu0 %v4153_v16  ;;  %v1681_v16 = vld [vmem:[#allocation9 + $0x158] sm:$0xff] }
 0x26c   :  { %4156 = vmatprep.subr.bf16.mxu0 %v4155_v60  ;;  %v1686_v60 = vld [vmem:[#allocation9 + $0x180] sm:$0xff] }
 0x26d   :  { %4127 = vmatpush3.bf16.msra.mxu1 %v4126_v21  ;;  %v1748_v21 = vld [vmem:[#allocation9 + $0x370] sm:$0xff]  ;;  %v4307_v28 = vpack.c.bf16 %v1686_v60, %v1681_v16 }
 0x26e   :  { %4128 = vmatprep.subr.bf16.mxu1 %v4939_v27  ;;  %v4177_v62 = vpack.c.bf16 %v1753_v23, %v1748_v21  ;;  %v1720_v60 = vld [vmem:[#allocation9 + $0x290] sm:$0xff]  ;;  %v4193_v23 = vpack.c.bf16 %v1793_v42, %v1788_v13 }
 0x26f   :  { %4158 = vmatpush1.bf16.msra.mxu0 %v4157_v30  ;;  %v1685_v30 = vld [vmem:[#allocation9 + $0x178] sm:$0xff]  ;;  %v1736_v21 = vld [vmem:[#allocation9 + $0x310] sm:$0xff] }
 0x270   :  { %4160 = vmatprep.subr.bf16.mxu0 %v4159_v31  ;;  %v1691_v31 = vld [vmem:[#allocation9 + $0x1a8] sm:$0xff] }
 0x271   :  { %4130 = vmatpush3.bf16.msra.mxu1 %v4129_v33  ;;  %v4179_v33 = vpack.c.bf16 %v1764_v26, %v1759_v25  ;;  %v4311_v18 = vpack.c.bf16 %v1696_v32, %v1691_v31  ;;  %v1746_v31 = vld [vmem:[#allocation9 + $0x360] sm:$0xff] }
 0x272   :  { %4292 = vmatprep.subr.bf16.mxu1 %v4291_v37  ;;  %v4309_v37 = vpack.c.bf16 %v1685_v30, %v1680_v29  ;;  %v1735_v29 = vld [vmem:[#allocation9 + $0x308] sm:$0xff]  ;;  %v1741_v30 = vld [vmem:[#allocation9 + $0x338] sm:$0xff] }
 0x273   :  { %4162 = vmatpush1.bf16.msra.mxu0 %v4161_v49  ;;  %v1695_v49 = vld [vmem:[#allocation9 + $0x1c8] sm:$0xff] }
 0x274   :  { %3456 = vmatmul.mubr.f32.vlgmr.msra.gmra.mrb[6].mxu1 %v5199_v41  ;;  %4164 = vmatprep.subr.bf16.mxu0 %v4163_v53  ;;  %v1743_v41 = vld [vmem:[#allocation9 + $0x348] sm:$0xff]  ;;  %v1701_v53 = vld [vmem:[#allocation9 + $0x1f8] sm:$0xff] }
 0x275   :  { %4294 = vmatpush1.bf16.msra.mxu1 %v4293_v45  ;;  %v4173_v17 = vpack.c.bf16 %v1743_v41, %v1738_v11  ;;  %v4183_v45 = vpack.c.bf16 %v1774_v39, %v1769_v38  ;;  %v4315_v51 = vpack.c.bf16 %v1706_v43, %v1701_v53  ;;  %v1726_v11 = vld [vmem:[#allocation9 + $0x2c0] sm:$0xff]  ;;  %v4189_v41 = vpack.c.bf16 %v1783_v0, %v1778_v59  ;;  %v1785_v59 = vld [vmem:[#allocation9 + $0x498] sm:$0xff]  ;;  %v1791_v0 = vld [vmem:[#allocation9 + $0x4c8] sm:$0xff] }
 0x276   :  { %4296 = vmatprep.subr.bf16.mxu1 %v4295_v47  ;;  %v4313_v47 = vpack.c.bf16 %v1695_v49, %v1690_v40  ;;  %v1755_v40 = vld [vmem:[#allocation9 + $0x3a8] sm:$0xff]  ;;  %v1761_v49 = vld [vmem:[#allocation9 + $0x3d8] sm:$0xff]  ;;  %v1766_v53 = vld [vmem:[#allocation9 + $0x400] sm:$0xff] }
 0x277   :  { %4166 = vmatpush1.bf16.msra.mxu0 %v4165_v19  ;;  %v1705_v19 = vld [vmem:[#allocation9 + $0x218] sm:$0xff] }
 0x278   :  { %4168 = vmatprep.subr.bf16.mxu0 %v4167_v54  ;;  %v1711_v54 = vld [vmem:[#allocation9 + $0x248] sm:$0xff] }
 0x279   :  { %4298 = vmatpush1.bf16.msra.mxu1 %v4297_v58  ;;  %v4187_v58 = vpack.c.bf16 %v1784_v50, %v1779_v48  ;;  %v4319_v6 = vpack.c.bf16 %v1716_v55, %v1711_v54  ;;  %v1786_v54 = vld [vmem:[#allocation9 + $0x4a0] sm:$0xff] }
 0x27a   :  { %4300 = vmatprep.subr.bf16.mxu1 %v4299_v1  ;;  %v4317_v1 = vpack.c.bf16 %v1705_v19, %v1700_v52  ;;  %v1775_v52 = vld [vmem:[#allocation9 + $0x448] sm:$0xff]  ;;  %v1781_v19 = vld [vmem:[#allocation9 + $0x478] sm:$0xff] }
 0x27b   :  { %4170 = vmatpush1.bf16.msra.mxu0 %v4169_v8  ;;  %v1715_v8 = vld [vmem:[#allocation9 + $0x268] sm:$0xff] }
 0x27c   :  { %4172 = vmatprep.subr.bf16.mxu0 %v4171_v9  ;;  %v1721_v9 = vld [vmem:[#allocation9 + $0x298] sm:$0xff] }
 0x27d   :  { %4302 = vmatpush1.bf16.msra.mxu1 %v4301_v12  ;;  %v4191_v12 = vpack.c.bf16 %v1794_v5, %v1789_v4  ;;  %v4323_v16 = vpack.c.bf16 %v1726_v11, %v1721_v9  ;;  %v1806_v9 = vld [vmem:[#allocation9 + $0x540] sm:$0xff] }
 0x27e   :  { %4304 = vmatprep.subr.bf16.mxu1 %v4303_v14  ;;  %v4321_v14 = vpack.c.bf16 %v1715_v8, %v1710_v7  ;;  %v1795_v7 = vld [vmem:[#allocation9 + $0x4e8] sm:$0xff]  ;;  %v1801_v8 = vld [vmem:[#allocation9 + $0x518] sm:$0xff] }
 0x27f   :  { %4174 = vmatpush1.bf16.msra.mxu0 %v4173_v17  ;;  %v1725_v17 = vld [vmem:[#allocation9 + $0x2b8] sm:$0xff] }
 0x280   :  { %4176 = vmatprep.subr.bf16.mxu0 %v4175_v20  ;;  %v1731_v20 = vld [vmem:[#allocation9 + $0x2e8] sm:$0xff]  ;;  %v4325_v25 = vpack.c.bf16 %v1725_v17, %v1720_v60 }
 0x281   :  { %4306 = vmatpush1.bf16.msra.mxu1 %v4305_v24  ;;  %v4195_v24 = vpack.c.bf16 %v1804_v34, %v1799_v15  ;;  %v4327_v26 = vpack.c.bf16 %v1736_v21, %v1731_v20  ;;  %v1803_v21 = vld [vmem:[#allocation9 + $0x528] sm:$0xff] }
 0x282   :  { %4308 = vmatprep.subr.bf16.mxu1 %v4307_v28  ;;  %v1730_v28 = vld [vmem:[#allocation9 + $0x2e0] sm:$0xff] }
 0x283   :  { %4178 = vmatpush1.bf16.msra.mxu0 %v4177_v62  ;;  %v4329_v32 = vpack.c.bf16 %v1735_v29, %v1730_v28  ;;  %v4331_v62 = vpack.c.bf16 %v1746_v31, %v1741_v30  ;;  %v1814_v29 = vld [vmem:[#allocation9 + $0x580] sm:$0xff]  ;;  %v1811_v30 = vld [vmem:[#allocation9 + $0x568] sm:$0xff]  ;;  %v1816_v31 = vld [vmem:[#allocation9 + $0x590] sm:$0xff] }
 0x284   :  { %4180 = vmatprep.subr.bf16.mxu0 %v4179_v33  ;;  %v1740_v33 = vld [vmem:[#allocation9 + $0x330] sm:$0xff] }
 0x285   :  { %4310 = vmatpush1.bf16.msra.mxu1 %v4309_v37  ;;  %v1756_v37 = vld [vmem:[#allocation9 + $0x3b0] sm:$0xff]  ;;  %v4333_v38 = vpack.c.bf16 %v1745_v35, %v1740_v33 }
 0x286   :  { %4312 = vmatprep.subr.bf16.mxu1 %v4311_v18  ;;  %v4335_v39 = vpack.c.bf16 %v1756_v37, %v1751_v36  ;;  %v1750_v18 = vld [vmem:[#allocation9 + $0x380] sm:$0xff]  ;;  %v1808_v35 = vld [vmem:[#allocation9 + $0x550] sm:$0xff]  ;;  %v1813_v36 = vld [vmem:[#allocation9 + $0x578] sm:$0xff] }
 0x287   :  { %4182 = vmatpush1.bf16.msra.mxu0 %v4181_v44  ;;  %v4337_v43 = vpack.c.bf16 %v1755_v40, %v1750_v18  ;;  %v4339_v44 = vpack.c.bf16 %v1766_v53, %v1761_v49  ;;  %v1819_v18 = vld [vmem:[#allocation9 + $0x5a8] sm:$0xff]  ;;  %v4359_v49 = vpack.c.bf16 %v1816_v31, %v1811_v30  ;;  %v1824_v53 = vld [vmem:[#allocation9 + $0x5d0] sm:$0xff]  ;;  %v1853_v31 = vld [vmem:[#allocation9 + $0x6b8] sm:$0xff] }
 0x288   :  { %4184 = vmatprep.subr.bf16.mxu0 %v4183_v45  ;;  %v1760_v45 = vld [vmem:[#allocation9 + $0x3d0] sm:$0xff] }
 0x289   :  { %4314 = vmatpush1.bf16.msra.mxu1 %v4313_v47  ;;  %v1776_v47 = vld [vmem:[#allocation9 + $0x450] sm:$0xff]  ;;  %v4341_v48 = vpack.c.bf16 %v1765_v3, %v1760_v45  ;;  %v4201_v3 = vpack.c.bf16 %v1813_v36, %v1808_v35  ;;  %v1850_v35 = vld [vmem:[#allocation9 + $0x6a0] sm:$0xff]  ;;  %v1855_v36 = vld [vmem:[#allocation9 + $0x6c8] sm:$0xff] }
 0x28a   :  { %4316 = vmatprep.subr.bf16.mxu1 %v4315_v51  ;;  %v4343_v50 = vpack.c.bf16 %v1776_v47, %v1771_v46  ;;  %v1770_v51 = vld [vmem:[#allocation9 + $0x420] sm:$0xff]  ;;  %v1848_v30 = vld [vmem:[#allocation9 + $0x690] sm:$0xff] }
 0x28b   :  { %4186 = vmatpush1.bf16.msra.mxu0 %v4185_v57  ;;  %v4345_v55 = vpack.c.bf16 %v1775_v52, %v1770_v51  ;;  %v4347_v57 = vpack.c.bf16 %v1786_v54, %v1781_v19  ;;  %v1818_v47 = vld [vmem:[#allocation9 + $0x5a0] sm:$0xff]  ;;  %v1820_v52 = vld [vmem:[#allocation9 + $0x5b0] sm:$0xff]  ;;  %v1825_v19 = vld [vmem:[#allocation9 + $0x5d8] sm:$0xff] }
 0x28c   :  { %4188 = vmatprep.subr.bf16.mxu0 %v4187_v58  ;;  %v1780_v58 = vld [vmem:[#allocation9 + $0x470] sm:$0xff]  ;;  %v1829_v54 = vld [vmem:[#allocation9 + $0x5f8] sm:$0xff] }
 0x28d   :  { %4318 = vmatpush1.bf16.msra.mxu1 %v4317_v1  ;;  %v1796_v1 = vld [vmem:[#allocation9 + $0x4f0] sm:$0xff]  ;;  %v4349_v4 = vpack.c.bf16 %v1785_v59, %v1780_v58 }
 0x28e   :  { %4320 = vmatprep.subr.bf16.mxu1 %v4319_v6  ;;  %v4351_v5 = vpack.c.bf16 %v1796_v1, %v1791_v0  ;;  %v1790_v6 = vld [vmem:[#allocation9 + $0x4c0] sm:$0xff]  ;;  %v1836_v58 = vld [vmem:[#allocation9 + $0x630] sm:$0xff]  ;;  %v4365_v0 = vpack.c.bf16 %v1825_v19, %v1820_v52  ;;  %v1871_v52 = vld [vmem:[#allocation9 + $0x748] sm:$0xff] }
 0x28f   :  { %4190 = vmatpush1.bf16.msra.mxu0 %v4189_v41  ;;  %v4353_v11 = vpack.c.bf16 %v1795_v7, %v1790_v6  ;;  %v4355_v41 = vpack.c.bf16 %v1806_v9, %v1801_v8  ;;  %v1828_v1 = vld [vmem:[#allocation9 + $0x5f0] sm:$0xff]  ;;  %v1830_v7 = vld [vmem:[#allocation9 + $0x600] sm:$0xff]  ;;  %v1835_v8 = vld [vmem:[#allocation9 + $0x628] sm:$0xff] }
 0x290   :  { %4192 = vmatprep.subr.bf16.mxu0 %v4191_v12  ;;  %v5218_v12 = vld [vmem:[#allocation7] sm:$0x1f]  ;;  %v1839_v9 = vld [vmem:[#allocation9 + $0x648] sm:$0xff]  ;;  %v1876_v19 = vld [vmem:[#allocation9 + $0x770] sm:$0xff] }
 0x291   :  { %4322 = vmatpush1.bf16.msra.mxu1 %v4321_v14  ;;  %v975_v13 = vrot.slane %v5218_v12, %v5149_v61  ;;  %v979_v42 = vrot.slane %v5218_v12, %v5154_v63  ;;  %v987_v14 = vrot.slane %v5218_v12, %v5169_v56 }
 0x292   :  { %4324 = vmatprep.subr.bf16.mxu1 %v4323_v16  ;;  %v1798_v16 = vld [vmem:[#allocation9 + $0x500] sm:$0xff] }
 0x293   :  { %4194 = vmatpush1.bf16.msra.mxu0 %v4193_v23  ;;  %v1800_v23 = vld [vmem:[#allocation9 + $0x510] sm:$0xff] }
 0x294   :  { %4196 = vmatprep.subr.bf16.mxu0 %v4195_v24  ;;  %v1805_v24 = vld [vmem:[#allocation9 + $0x538] sm:$0xff] }
 0x295   :  { %4326 = vmatpush1.bf16.msra.mxu1 %v4325_v25  ;;  %v4357_v33 = vpack.c.bf16 %v1805_v24, %v1800_v23  ;;  %v1849_v23 = vld [vmem:[#allocation9 + $0x698] sm:$0xff]  ;;  %v1854_v24 = vld [vmem:[#allocation9 + $0x6c0] sm:$0xff] }
 0x296   :  { %4328 = vmatprep.subr.bf16.mxu1 %v4327_v26  ;;  %v1809_v26 = vld [vmem:[#allocation9 + $0x558] sm:$0xff] }
 0x297   :  { %v4199_v40 = vpack.c.bf16 %v1814_v29, %v1809_v26  ;;  %v1856_v26 = vld [vmem:[#allocation9 + $0x6d0] sm:$0xff] }
 0x299   :  { %4330 = vmatpush1.bf16.msra.mxu1 %v4329_v32 }
 0x29a   :  { %4332 = vmatprep.subr.bf16.mxu1 %v4331_v62  ;;  %v4197_v62 = vpack.c.bf16 %v1803_v21, %v1798_v16  ;;  %v1843_v16 = vld [vmem:[#allocation9 + $0x668] sm:$0xff]  ;;  %v1845_v21 = vld [vmem:[#allocation9 + $0x678] sm:$0xff] }
 0x29d   :  { %4334 = vmatpush1.bf16.msra.mxu1 %v4333_v38  ;;  %v1810_v38 = vld [vmem:[#allocation9 + $0x560] sm:$0xff] }
 0x29e   :  { %4336 = vmatprep.subr.bf16.mxu1 %v4335_v39  ;;  %v1815_v39 = vld [vmem:[#allocation9 + $0x588] sm:$0xff] }
 0x29f   :  { %v4361_v46 = vpack.c.bf16 %v1815_v39, %v1810_v38  ;;  %v1859_v38 = vld [vmem:[#allocation9 + $0x6e8] sm:$0xff]  ;;  %v1864_v39 = vld [vmem:[#allocation9 + $0x710] sm:$0xff] }
 0x2a1   :  { %4338 = vmatpush1.bf16.msra.mxu1 %v4337_v43  ;;  %v1821_v43 = vld [vmem:[#allocation9 + $0x5b8] sm:$0xff] }
 0x2a2   :  { %4340 = vmatprep.subr.bf16.mxu1 %v4339_v44  ;;  %v1826_v44 = vld [vmem:[#allocation9 + $0x5e0] sm:$0xff] }
 0x2a3   :  { %v4363_v51 = vpack.c.bf16 %v1826_v44, %v1821_v43  ;;  %v1858_v43 = vld [vmem:[#allocation9 + $0x6e0] sm:$0xff]  ;;  %v1863_v44 = vld [vmem:[#allocation9 + $0x708] sm:$0xff] }
 0x2a5   :  { %4342 = vmatpush1.bf16.msra.mxu1 %v4341_v48  ;;  %v1823_v48 = vld [vmem:[#allocation9 + $0x5c8] sm:$0xff] }
 0x2a6   :  { %4344 = vmatprep.subr.bf16.mxu1 %v4343_v50  ;;  %v4203_v50 = vpack.c.bf16 %v1824_v53, %v1819_v18  ;;  %v4205_v59 = vpack.c.bf16 %v1823_v48, %v1818_v47  ;;  %v1861_v18 = vld [vmem:[#allocation9 + $0x6f8] sm:$0xff]  ;;  %v4377_v53 = vpack.c.bf16 %v1855_v36, %v1850_v35  ;;  %v1860_v47 = vld [vmem:[#allocation9 + $0x6f0] sm:$0xff] }
 0x2a7   :  { %v1865_v48 = vld [vmem:[#allocation9 + $0x718] sm:$0xff]  ;;  %v1888_v35 = vld [vmem:[#allocation9 + $0x7d0] sm:$0xff] }
 0x2a8   :  { %v1893_v36 = vld [vmem:[#allocation9 + $0x7f8] sm:$0xff] }
 0x2a9   :  { %4346 = vmatpush1.bf16.msra.mxu1 %v4345_v55  ;;  %v1834_v55 = vld [vmem:[#allocation9 + $0x620] sm:$0xff] }
 0x2aa   :  { %4348 = vmatprep.subr.bf16.mxu1 %v4347_v57  ;;  %v1831_v57 = vld [vmem:[#allocation9 + $0x608] sm:$0xff] }
 0x2ab   :  { %v4367_v6 = vpack.c.bf16 %v1836_v58, %v1831_v57  ;;  %v1868_v57 = vld [vmem:[#allocation9 + $0x730] sm:$0xff]  ;;  %v1873_v58 = vld [vmem:[#allocation9 + $0x758] sm:$0xff] }
 0x2ad   :  { %4350 = vmatpush1.bf16.msra.mxu1 %v4349_v4  ;;  %v1833_v4 = vld [vmem:[#allocation9 + $0x618] sm:$0xff] }
 0x2ae   :  { %4352 = vmatprep.subr.bf16.mxu1 %v4351_v5  ;;  %v4207_v5 = vpack.c.bf16 %v1834_v55, %v1829_v54  ;;  %v4221_v54 = vpack.c.bf16 %v1863_v44, %v1858_v43  ;;  %v4381_v55 = vpack.c.bf16 %v1865_v48, %v1860_v47  ;;  %v1901_v43 = vld [vmem:[#allocation9 + $0x838] sm:$0xff]  ;;  %v1906_v44 = vld [vmem:[#allocation9 + $0x860] sm:$0xff] }
 0x2af   :  { %v1898_v48 = vld [vmem:[#allocation9 + $0x820] sm:$0xff] }
 0x2b1   :  { %4354 = vmatpush1.bf16.msra.mxu1 %v4353_v11  ;;  %v1844_v11 = vld [vmem:[#allocation9 + $0x670] sm:$0xff] }
 0x2b2   :  { %4356 = vmatprep.subr.bf16.mxu1 %v4355_v41  ;;  %v1841_v41 = vld [vmem:[#allocation9 + $0x658] sm:$0xff] }
 0x307   :  { %v1205_v15 = vpop.f32.mrb[2].mxu1  ;;  %v5226_v34 = vpop.f32.mrb[4].mxu0 }
 0x308   :  { %v4651_v60 = vadd.f32 %v1205_v15, %v975_v13  ;;  %v1207_v17 = vpop.f32.mrb[3].mxu1  ;;  %v1420_v20 = vpop.f32.mrb[5].mxu0  ;;  %v1846_v13 = vld [vmem:[#allocation9 + $0x680] sm:$0xff] }
 0x309   :  { %v4652_v25 = vadd.f32 %v1207_v17, %v979_v42  ;;  %v4654_v28 = vadd.f32 %v1420_v20, %v987_v14  ;;  %v4209_v42 = vpack.c.bf16 %v1833_v4, %v1828_v1  ;;  %v4369_v14 = vpack.c.bf16 %v1835_v8, %v1830_v7  ;;  %v1838_v15 = vld [vmem:[#allocation9 + $0x640] sm:$0xff]  ;;  %v1840_v20 = vld [vmem:[#allocation9 + $0x650] sm:$0xff]  ;;  %v1875_v4 = vld [vmem:[#allocation9 + $0x768] sm:$0xff] }
 0x30a   :  { %v5230_v37 = vmax.f32 %v4651_v60, 0.0  ;;  %v4211_v60 = vpack.c.bf16 %v1844_v11, %v1839_v9  ;;  %v4371_v17 = vpack.c.bf16 %v1846_v13, %v1841_v41  ;;  %v4373_v29 = vpack.c.bf16 %v1845_v21, %v1840_v20  ;;  %v1870_v1 = vld [vmem:[#allocation9 + $0x740] sm:$0xff]  ;;  %v1881_v7 = vld [vmem:[#allocation9 + $0x798] sm:$0xff]  ;;  %v1880_v20 = vld [vmem:[#allocation9 + $0x790] sm:$0xff] }
 0x30b   :  { %v5228_v32 = vmax.f32 %v4652_v25, 0.0  ;;  %v5234_v45 = vmax.f32 %v4654_v28, 0.0  ;;  %v1851_v25 = vld [vmem:[#allocation9 + $0x6a8] sm:$0xff]  ;;  %v4213_v28 = vpack.c.bf16 %v1843_v16, %v1838_v15  ;;  %v1886_v8 = vld [vmem:[#allocation9 + $0x7c0] sm:$0xff]  ;;  %v991_v11 = vrot.slane %v5218_v12, %v5194_v2  ;;  %v1885_v21 = vld [vmem:[#allocation9 + $0x7b8] sm:$0xff] }
 0x30c   :  { %v4225_v41 = vpack.c.bf16 %v1873_v58, %v1868_v57  ;;  %v4385_v13 = vpack.c.bf16 %v1875_v4, %v1870_v1  ;;  %v1914_v57 = vld [vmem:[#allocation9 + $0x8a0] sm:$0xff]  ;;  %v1911_v58 = vld [vmem:[#allocation9 + $0x888] sm:$0xff]  ;;  %v1908_v4 = vld [vmem:[#allocation9 + $0x870] sm:$0xff] }
 0x30d   :  { %2129 = vmatprep.mubr.f32.mxu0 %v5228_v32  ;;  %2342 = vmatprep.mubr.f32.mxu1 %v5228_v32 }
 0x30e   :  { %2130 = vmatmul.mubr.f32.vlgmr.msra.gmra.mrb[8].mxu0 %v5230_v37  ;;  %2343 = vmatmul.mubr.f32.vlgmr.msra.gmra.mrb[8].mxu1 %v5230_v37 }
 0x30f   :  { %4198 = vmatpush1.bf16.msra.mxu0 %v4197_v62  ;;  %4358 = vmatpush1.bf16.msra.mxu1 %v4357_v33  ;;  %v4215_v62 = vpack.c.bf16 %v1854_v24, %v1849_v23  ;;  %v4375_v33 = vpack.c.bf16 %v1856_v26, %v1851_v25  ;;  %v1889_v23 = vld [vmem:[#allocation9 + $0x7d8] sm:$0xff]  ;;  %v1894_v26 = vld [vmem:[#allocation9 + $0x800] sm:$0xff] }
 0x310   :  { %2200 = vmatprep.mubr.f32.mxu0 %v5234_v45  ;;  %2413 = vmatprep.mubr.f32.mxu1 %v5234_v45 }
 0x311   :  { %4200 = vmatprep.subr.bf16.mxu0 %v4199_v40  ;;  %4360 = vmatprep.subr.bf16.mxu1 %v4359_v49  ;;  %v1866_v40 = vld [vmem:[#allocation9 + $0x720] sm:$0xff]  ;;  %v4217_v49 = vpack.c.bf16 %v1853_v31, %v1848_v30 }
 0x313   :  { %4202 = vmatpush1.bf16.msra.mxu0 %v4201_v3  ;;  %4362 = vmatpush1.bf16.msra.mxu1 %v4361_v46  ;;  %v4219_v3 = vpack.c.bf16 %v1864_v39, %v1859_v38  ;;  %v4379_v46 = vpack.c.bf16 %v1866_v40, %v1861_v18  ;;  %v4231_v38 = vpack.c.bf16 %v1894_v26, %v1889_v23  ;;  %v1890_v18 = vld [vmem:[#allocation9 + $0x7e0] sm:$0xff]  ;;  %v1895_v40 = vld [vmem:[#allocation9 + $0x808] sm:$0xff]  ;;  %v1925_v23 = vld [vmem:[#allocation9 + $0x8f8] sm:$0xff] }
 0x314   :  { %4204 = vmatprep.subr.bf16.mxu0 %v4203_v50  ;;  %4364 = vmatprep.subr.bf16.mxu1 %v4363_v51  ;;  %v1869_v50 = vld [vmem:[#allocation9 + $0x738] sm:$0xff]  ;;  %v1874_v51 = vld [vmem:[#allocation9 + $0x760] sm:$0xff]  ;;  %v4393_v47 = vpack.c.bf16 %v1895_v40, %v1890_v18  ;;  %v1931_v26 = vld [vmem:[#allocation9 + $0x928] sm:$0xff] }
 0x315   :  { %v1944_v18 = vld [vmem:[#allocation9 + $0x990] sm:$0xff]  ;;  %v1941_v40 = vld [vmem:[#allocation9 + $0x978] sm:$0xff] }
 0x317   :  { %4206 = vmatpush1.bf16.msra.mxu0 %v4205_v59  ;;  %4366 = vmatpush1.bf16.msra.mxu1 %v4365_v0  ;;  %v4223_v59 = vpack.c.bf16 %v1874_v51, %v1869_v50  ;;  %v4383_v0 = vpack.c.bf16 %v1876_v19, %v1871_v52  ;;  %v1903_v50 = vld [vmem:[#allocation9 + $0x848] sm:$0xff]  ;;  %v4395_v52 = vpack.c.bf16 %v1906_v44, %v1901_v43  ;;  %v1900_v19 = vld [vmem:[#allocation9 + $0x830] sm:$0xff]  ;;  %v1938_v44 = vld [vmem:[#allocation9 + $0x960] sm:$0xff] }
 0x318   :  { %4208 = vmatprep.subr.bf16.mxu0 %v4207_v5  ;;  %4368 = vmatprep.subr.bf16.mxu1 %v4367_v6  ;;  %v1879_v5 = vld [vmem:[#allocation9 + $0x788] sm:$0xff]  ;;  %v1884_v6 = vld [vmem:[#allocation9 + $0x7b0] sm:$0xff] }
 0x31b   :  { %4210 = vmatpush1.bf16.msra.mxu0 %v4209_v42  ;;  %4370 = vmatpush1.bf16.msra.mxu1 %v4369_v14  ;;  %v1878_v42 = vld [vmem:[#allocation9 + $0x780] sm:$0xff]  ;;  %v1883_v14 = vld [vmem:[#allocation9 + $0x7a8] sm:$0xff] }
 0x31c   :  { %4212 = vmatprep.subr.bf16.mxu0 %v4211_v60  ;;  %4372 = vmatprep.subr.bf16.mxu1 %v4371_v17  ;;  %v4227_v60 = vpack.c.bf16 %v1884_v6, %v1879_v5  ;;  %v4387_v17 = vpack.c.bf16 %v1886_v8, %v1881_v7  ;;  %v1913_v5 = vld [vmem:[#allocation9 + $0x898] sm:$0xff]  ;;  %v1910_v8 = vld [vmem:[#allocation9 + $0x880] sm:$0xff] }
 0x31f   :  { %4214 = vmatpush1.bf16.msra.mxu0 %v4213_v28  ;;  %4374 = vmatpush1.bf16.msra.mxu1 %v4373_v29  ;;  %v1891_v28 = vld [vmem:[#allocation9 + $0x7e8] sm:$0xff]  ;;  %v1896_v29 = vld [vmem:[#allocation9 + $0x810] sm:$0xff] }
 0x320   :  { %4216 = vmatprep.subr.bf16.mxu0 %v4215_v62  ;;  %4376 = vmatprep.subr.bf16.mxu1 %v4375_v33  ;;  %v4229_v62 = vpack.c.bf16 %v1883_v14, %v1878_v42  ;;  %v4389_v33 = vpack.c.bf16 %v1885_v21, %v1880_v20  ;;  %v4391_v39 = vpack.c.bf16 %v1896_v29, %v1891_v28  ;;  %v1926_v42 = vld [vmem:[#allocation9 + $0x900] sm:$0xff]  ;;  %v1920_v21 = vld [vmem:[#allocation9 + $0x8d0] sm:$0xff] }
 0x321   :  { %v4241_v14 = vpack.c.bf16 %v1913_v5, %v1908_v4  ;;  %v1936_v28 = vld [vmem:[#allocation9 + $0x950] sm:$0xff]  ;;  %v983_v4 = vrot.slane %v5218_v12, %v5182_v10 }
 0x323   :  { %4218 = vmatpush1.bf16.msra.mxu0 %v4217_v49  ;;  %4378 = vmatpush1.bf16.msra.mxu1 %v4377_v53  ;;  %v1899_v49 = vld [vmem:[#allocation9 + $0x828] sm:$0xff]  ;;  %v1904_v53 = vld [vmem:[#allocation9 + $0x850] sm:$0xff] }
 0x324   :  { %4220 = vmatprep.subr.bf16.mxu0 %v4219_v3  ;;  %4380 = vmatprep.subr.bf16.mxu1 %v4379_v46  ;;  %v4233_v46 = vpack.c.bf16 %v1893_v36, %v1888_v35  ;;  %v4235_v51 = vpack.c.bf16 %v1904_v53, %v1899_v49  ;;  %v4407_v35 = vpack.c.bf16 %v1936_v28, %v1931_v26  ;;  %v1930_v36 = vld [vmem:[#allocation9 + $0x920] sm:$0xff]  ;;  %v1971_v28 = vld [vmem:[#allocation9 + $0xa68] sm:$0xff] }
 0x325   :  { %v1946_v49 = vld [vmem:[#allocation9 + $0x9a0] sm:$0xff] }
 0x326   :  { %v1974_v26 = vld [vmem:[#allocation9 + $0xa80] sm:$0xff] }
 0x327   :  { %4222 = vmatpush1.bf16.msra.mxu0 %v4221_v54  ;;  %4382 = vmatpush1.bf16.msra.mxu1 %v4381_v55  ;;  %v3177_v9 = vpop.f32.mrb[4].mxu1  ;;  %v1905_v54 = vld [vmem:[#allocation9 + $0x858] sm:$0xff] }
 0x328   :  { %v3212_v15 = vpop.f32.mrb[6].mxu0  ;;  %v3178_v16 = vpop.f32.mrb[5].mxu1  ;;  %4224 = vmatprep.subr.bf16.mxu0 %v4223_v59  ;;  %4384 = vmatprep.subr.bf16.mxu1 %v4383_v0  ;;  %v1909_v55 = vld [vmem:[#allocation9 + $0x878] sm:$0xff]  ;;  %v1916_v59 = vld [vmem:[#allocation9 + $0x8b0] sm:$0xff]  ;;  %v4237_v0 = vpack.c.bf16 %v1903_v50, %v1898_v48  ;;  %v4397_v1 = vpack.c.bf16 %v1905_v54, %v1900_v19  ;;  %v4411_v48 = vpack.c.bf16 %v1946_v49, %v1941_v40  ;;  %v1954_v19 = vld [vmem:[#allocation9 + $0x9e0] sm:$0xff] }
 0x329   :  { %v3179_v24 = vadd.f32 %v3178_v16, %v3177_v9  ;;  %v3213_v25 = vpop.f32.mrb[7].mxu0  ;;  %v4239_v6 = vpack.c.bf16 %v1914_v57, %v1909_v55  ;;  %v4399_v7 = vpack.c.bf16 %v1916_v59, %v1911_v58  ;;  %v1915_v9 = vld [vmem:[#allocation9 + $0x8a8] sm:$0xff]  ;;  %v1918_v16 = vld [vmem:[#allocation9 + $0x8c0] sm:$0xff]  ;;  %v1940_v50 = vld [vmem:[#allocation9 + $0x970] sm:$0xff] }
 0x32a   :  { %v3214_v30 = vadd.f32 %v3213_v25, %v3212_v15  ;;  %v4401_v15 = vpack.c.bf16 %v1915_v9, %v1910_v8  ;;  %v1934_v25 = vld [vmem:[#allocation9 + $0x940] sm:$0xff]  ;;  %v1951_v54 = vld [vmem:[#allocation9 + $0x9c8] sm:$0xff]  ;;  %v1956_v55 = vld [vmem:[#allocation9 + $0x9f0] sm:$0xff] }
 0x32b   :  { %v1490_v31 = vadd.f32 %v3179_v24, %v991_v11  ;;  %4226 = vmatpush1.bf16.msra.mxu0 %v4225_v41  ;;  %4386 = vmatpush1.bf16.msra.mxu1 %v4385_v13  ;;  %v1919_v11 = vld [vmem:[#allocation9 + $0x8c8] sm:$0xff]  ;;  %v1924_v41 = vld [vmem:[#allocation9 + $0x8f0] sm:$0xff]  ;;  %v1921_v13 = vld [vmem:[#allocation9 + $0x8d8] sm:$0xff] }
 0x32c   :  { %4228 = vmatprep.subr.bf16.mxu0 %v4227_v60  ;;  %4388 = vmatprep.subr.bf16.mxu1 %v4387_v17  ;;  %v1923_v60 = vld [vmem:[#allocation9 + $0x8e8] sm:$0xff]  ;;  %v4243_v17 = vpack.c.bf16 %v1924_v41, %v1919_v11  ;;  %v4403_v20 = vpack.c.bf16 %v1926_v42, %v1921_v13  ;;  %v1929_v24 = vld [vmem:[#allocation9 + $0x918] sm:$0xff]  ;;  %v1948_v59 = vld [vmem:[#allocation9 + $0x9b0] sm:$0xff] }
 0x32d   :  { %v5242_v3 = vadd.f32 %v3214_v30, %v1490_v31  ;;  %v4245_v29 = vpack.c.bf16 %v1923_v60, %v1918_v16  ;;  %v4405_v30 = vpack.c.bf16 %v1925_v23, %v1920_v21  ;;  %v1928_v31 = vld [vmem:[#allocation9 + $0x910] sm:$0xff]  ;;  %v1959_v8 = vld [vmem:[#allocation9 + $0xa08] sm:$0xff]  ;;  %v1961_v11 = vld [vmem:[#allocation9 + $0xa18] sm:$0xff] }
 0x32e   :  { %v1964_v9 = vld [vmem:[#allocation9 + $0xa30] sm:$0xff]  ;;  %v1966_v41 = vld [vmem:[#allocation9 + $0xa40] sm:$0xff]  ;;  %v1963_v60 = vld [vmem:[#allocation9 + $0xa28] sm:$0xff] }
 0x32f   :  { %4230 = vmatpush1.bf16.msra.mxu0 %v4229_v62  ;;  %4390 = vmatpush1.bf16.msra.mxu1 %v4389_v33  ;;  %v1933_v62 = vld [vmem:[#allocation9 + $0x938] sm:$0xff]  ;;  %v4247_v33 = vpack.c.bf16 %v1934_v25, %v1929_v24  ;;  %v1958_v16 = vld [vmem:[#allocation9 + $0xa00] sm:$0xff]  ;;  %v4419_v21 = vpack.c.bf16 %v1966_v41, %v1961_v11  ;;  %v1960_v23 = vld [vmem:[#allocation9 + $0xa10] sm:$0xff] }
 0x330   :  { %4232 = vmatprep.subr.bf16.mxu0 %v4231_v38  ;;  %4392 = vmatprep.subr.bf16.mxu1 %v4391_v39  ;;  %v1935_v38 = vld [vmem:[#allocation9 + $0x948] sm:$0xff]  ;;  %v4249_v53 = vpack.c.bf16 %v1933_v62, %v1928_v31  ;;  %v1965_v24 = vld [vmem:[#allocation9 + $0xa38] sm:$0xff]  ;;  %v1968_v62 = vld [vmem:[#allocation9 + $0xa50] sm:$0xff] }
 0x331   :  { %v1939_v39 = vld [vmem:[#allocation9 + $0x968] sm:$0xff]  ;;  %v4409_v43 = vpack.c.bf16 %v1935_v38, %v1930_v36  ;;  %v1969_v25 = vld [vmem:[#allocation9 + $0xa58] sm:$0xff]  ;;  %v4421_v31 = vpack.c.bf16 %v1965_v24, %v1960_v23  ;;  %v1970_v36 = vld [vmem:[#allocation9 + $0xa60] sm:$0xff] }
 0x332   :  { %v1975_v38 = vld [vmem:[#allocation9 + $0xa88] sm:$0xff]  ;;  %v1981_v40 = vld [vmem:[#allocation9 + $0xab8] sm:$0xff]  ;;  %v1986_v49 = vld [vmem:[#allocation9 + $0xae0] sm:$0xff] }
 0x333   :  { %4234 = vmatpush1.bf16.msra.mxu0 %v4233_v46  ;;  %4394 = vmatpush1.bf16.msra.mxu1 %v4393_v47  ;;  %v1943_v46 = vld [vmem:[#allocation9 + $0x988] sm:$0xff]  ;;  %v4251_v47 = vpack.c.bf16 %v1944_v18, %v1939_v39  ;;  %v1984_v18 = vld [vmem:[#allocation9 + $0xad0] sm:$0xff]  ;;  %v2006_v11 = vld [vmem:[#allocation9 + $0xb80] sm:$0xff] }
 0x334   :  { %4236 = vmatprep.subr.bf16.mxu0 %v4235_v51  ;;  %4396 = vmatprep.subr.bf16.mxu1 %v4395_v52  ;;  %v1945_v51 = vld [vmem:[#allocation9 + $0x998] sm:$0xff]  ;;  %v4253_v57 = vpack.c.bf16 %v1943_v46, %v1938_v44  ;;  %v1979_v39 = vld [vmem:[#allocation9 + $0xaa8] sm:$0xff]  ;;  %v1978_v44 = vld [vmem:[#allocation9 + $0xaa0] sm:$0xff] }
 0x335   :  { %v1949_v52 = vld [vmem:[#allocation9 + $0x9b8] sm:$0xff]  ;;  %v4413_v58 = vpack.c.bf16 %v1945_v51, %v1940_v50  ;;  %v1983_v46 = vld [vmem:[#allocation9 + $0xac8] sm:$0xff]  ;;  %v1980_v50 = vld [vmem:[#allocation9 + $0xab0] sm:$0xff] }
 0x336   :  { %v4255_v5 = vpack.c.bf16 %v1954_v19, %v1949_v52  ;;  %v1985_v51 = vld [vmem:[#allocation9 + $0xad8] sm:$0xff]  ;;  %v1994_v19 = vld [vmem:[#allocation9 + $0xb20] sm:$0xff]  ;;  %v2011_v23 = vld [vmem:[#allocation9 + $0xba8] sm:$0xff] }
 0x337   :  { %4238 = vmatpush1.bf16.msra.mxu0 %v4237_v0  ;;  %4398 = vmatpush1.bf16.msra.mxu1 %v4397_v1  ;;  %v1953_v0 = vld [vmem:[#allocation9 + $0x9d8] sm:$0xff]  ;;  %v1950_v1 = vld [vmem:[#allocation9 + $0x9c0] sm:$0xff]  ;;  %v2016_v24 = vld [vmem:[#allocation9 + $0xbd0] sm:$0xff] }
 0x338   :  { %4240 = vmatprep.subr.bf16.mxu0 %v4239_v6  ;;  %4400 = vmatprep.subr.bf16.mxu1 %v4399_v7  ;;  %v4415_v6 = vpack.c.bf16 %v1956_v55, %v1951_v54  ;;  %v1955_v7 = vld [vmem:[#allocation9 + $0x9e8] sm:$0xff]  ;;  %v4257_v42 = vpack.c.bf16 %v1953_v0, %v1948_v59  ;;  %v1989_v52 = vld [vmem:[#allocation9 + $0xaf8] sm:$0xff]  ;;  %v1996_v55 = vld [vmem:[#allocation9 + $0xb30] sm:$0xff] }
 0x339   :  { %v1991_v54 = vld [vmem:[#allocation9 + $0xb08] sm:$0xff]  ;;  %v1988_v59 = vld [vmem:[#allocation9 + $0xaf0] sm:$0xff]  ;;  %v1993_v0 = vld [vmem:[#allocation9 + $0xb18] sm:$0xff] }
 0x33a   :  { %v4273_v41 = vpack.c.bf16 %v1993_v0, %v1988_v59  ;;  %v2030_v59 = vld [vmem:[#allocation9 + $0xc40] sm:$0xff]  ;;  %v2035_v0 = vld [vmem:[#allocation9 + $0xc68] sm:$0xff] }
 0x33b   :  { %4242 = vmatpush1.bf16.msra.mxu0 %v4241_v14  ;;  %4402 = vmatpush1.bf16.msra.mxu1 %v4401_v15  ;;  %v4417_v14 = vpack.c.bf16 %v1955_v7, %v1950_v1  ;;  %v4259_v15 = vpack.c.bf16 %v1964_v9, %v1959_v8  ;;  %v4271_v1 = vpack.c.bf16 %v1994_v19, %v1989_v52  ;;  %v1999_v7 = vld [vmem:[#allocation9 + $0xb48] sm:$0xff]  ;;  %v2004_v8 = vld [vmem:[#allocation9 + $0xb70] sm:$0xff]  ;;  %v2001_v9 = vld [vmem:[#allocation9 + $0xb58] sm:$0xff] }
 0x33c   :  { %4244 = vmatprep.subr.bf16.mxu0 %v4243_v17  ;;  %4404 = vmatprep.subr.bf16.mxu1 %v4403_v20  ;;  %v4653_v17 = vadd.f32 %v5226_v34, %v983_v4  ;;  %v4431_v4 = vpack.c.bf16 %v1996_v55, %v1991_v54  ;;  %v2028_v54 = vld [vmem:[#allocation9 + $0xc30] sm:$0xff]  ;;  %v2033_v55 = vld [vmem:[#allocation9 + $0xc58] sm:$0xff] }
 0x33e   :  { %v5250_v34 = vmax.f32 %v4653_v17, 0.0  ;;  %v2005_v17 = vld [vmem:[#allocation9 + $0xb78] sm:$0xff] }
 0x33f   :  { %4246 = vmatpush1.bf16.msra.mxu0 %v4245_v29  ;;  %4406 = vmatpush1.bf16.msra.mxu1 %v4405_v30  ;;  %v1976_v29 = vld [vmem:[#allocation9 + $0xa90] sm:$0xff]  ;;  %v4261_v30 = vpack.c.bf16 %v1963_v60, %v1958_v16  ;;  %v4435_v16 = vpack.c.bf16 %v2006_v11, %v2001_v9 }
 0x340   :  { %4248 = vmatprep.subr.bf16.mxu0 %v4247_v33  ;;  %4408 = vmatprep.subr.bf16.mxu1 %v4407_v35  ;;  %v1973_v33 = vld [vmem:[#allocation9 + $0xa78] sm:$0xff]  ;;  %v4423_v35 = vpack.c.bf16 %v1976_v29, %v1971_v28  ;;  %v2000_v60 = vld [vmem:[#allocation9 + $0xb50] sm:$0xff] }
 0x341   :  { %v2008_v28 = vld [vmem:[#allocation9 + $0xb90] sm:$0xff]  ;;  %v2013_v29 = vld [vmem:[#allocation9 + $0xbb8] sm:$0xff] }
 0x343   :  { %4250 = vmatpush1.bf16.msra.mxu0 %v4249_v53  ;;  %4410 = vmatpush1.bf16.msra.mxu1 %v4409_v43  ;;  %v4265_v53 = vpack.c.bf16 %v1973_v33, %v1968_v62  ;;  %v4425_v43 = vpack.c.bf16 %v1975_v38, %v1970_v36  ;;  %v2010_v62 = vld [vmem:[#allocation9 + $0xba0] sm:$0xff]  ;;  %v2015_v33 = vld [vmem:[#allocation9 + $0xbc8] sm:$0xff]  ;;  %v2021_v36 = vld [vmem:[#allocation9 + $0xbf8] sm:$0xff] }
 0x344   :  { %4252 = vmatprep.subr.bf16.mxu0 %v4251_v47  ;;  %4412 = vmatprep.subr.bf16.mxu1 %v4411_v48  ;;  %v4267_v47 = vpack.c.bf16 %v1984_v18, %v1979_v39  ;;  %v4427_v48 = vpack.c.bf16 %v1986_v49, %v1981_v40  ;;  %v2026_v38 = vld [vmem:[#allocation9 + $0xc20] sm:$0xff]  ;;  %v4281_v39 = vpack.c.bf16 %v2013_v29, %v2008_v28  ;;  %v2023_v49 = vld [vmem:[#allocation9 + $0xc08] sm:$0xff] }
 0x345   :  { %v4441_v18 = vpack.c.bf16 %v2015_v33, %v2010_v62  ;;  %v2018_v40 = vld [vmem:[#allocation9 + $0xbe0] sm:$0xff]  ;;  %v1747_v62 = vld [vmem:[#allocation9 + $0x368] sm:$0xff] }
 0x346   :  { %v4285_v52 = vpack.c.bf16 %v2023_v49, %v2018_v40  ;;  %v1902_v33 = vld [vmem:[#allocation9 + $0x840] sm:$0xff]  ;;  %v1827_v49 = vld [vmem:[#allocation9 + $0x5e8] sm:$0xff] }
 0x347   :  { %4254 = vmatpush1.bf16.msra.mxu0 %v4253_v57  ;;  %4414 = vmatpush1.bf16.msra.mxu1 %v4413_v58  ;;  %v1629_v13 = vpop.f32.mrb[6].mxu1  ;;  %v4269_v57 = vpack.c.bf16 %v1983_v46, %v1978_v44  ;;  %v4429_v58 = vpack.c.bf16 %v1985_v51, %v1980_v50  ;;  %v2020_v44 = vld [vmem:[#allocation9 + $0xbf0] sm:$0xff]  ;;  %v2025_v46 = vld [vmem:[#allocation9 + $0xc18] sm:$0xff]  ;;  %v2031_v50 = vld [vmem:[#allocation9 + $0xc48] sm:$0xff] }
 0x348   :  { %v5248_v12 = vadd.f32 %v1629_v13, %v5242_v3  ;;  %v3457_v20 = vpop.f32.mrb[7].mxu1  ;;  %4256 = vmatprep.subr.bf16.mxu0 %v4255_v5  ;;  %4416 = vmatprep.subr.bf16.mxu1 %v4415_v6  ;;  %v4263_v3 = vpack.c.bf16 %v1974_v26, %v1969_v25  ;;  %v1990_v5 = vld [vmem:[#allocation9 + $0xb00] sm:$0xff]  ;;  %v1995_v6 = vld [vmem:[#allocation9 + $0xb28] sm:$0xff]  ;;  %v4437_v26 = vpack.c.bf16 %v2005_v17, %v2000_v60  ;;  %v2036_v51 = vld [vmem:[#allocation9 + $0xc70] sm:$0xff] }
 0x349   :  { %v4433_v13 = vpack.c.bf16 %v1995_v6, %v1990_v5  ;;  %v2009_v20 = vld [vmem:[#allocation9 + $0xb98] sm:$0xff]  ;;  %v4445_v19 = vpack.c.bf16 %v2025_v46, %v2020_v44  ;;  %v1882_v5 = vld [vmem:[#allocation9 + $0x7a0] sm:$0xff]  ;;  %v1887_v6 = vld [vmem:[#allocation9 + $0x7c8] sm:$0xff] }
 0x34a   :  { %v4483_v11 = vpack.c.bf16 %v1887_v6, %v1882_v5  ;;  %v1892_v60 = vld [vmem:[#allocation9 + $0x7f0] sm:$0xff]  ;;  %v1897_v17 = vld [vmem:[#allocation9 + $0x818] sm:$0xff]  ;;  %v1687_v5 = vld [vmem:[#allocation9 + $0x188] sm:$0xff] }
 0x34b   :  { %4258 = vmatpush1.bf16.msra.mxu0 %v4257_v42  ;;  %4418 = vmatpush1.bf16.msra.mxu1 %v4417_v14  ;;  %v1998_v42 = vld [vmem:[#allocation9 + $0xb40] sm:$0xff]  ;;  %v2003_v14 = vld [vmem:[#allocation9 + $0xb68] sm:$0xff]  ;;  %v4487_v29 = vpack.c.bf16 %v1897_v17, %v1892_v60  ;;  %v1912_v44 = vld [vmem:[#allocation9 + $0x890] sm:$0xff] }
 0x34c   :  { %4260 = vmatprep.subr.bf16.mxu0 %v4259_v15  ;;  %4420 = vmatprep.subr.bf16.mxu1 %v4419_v21  ;;  %v4275_v15 = vpack.c.bf16 %v2004_v8, %v1999_v7  ;;  %v2014_v21 = vld [vmem:[#allocation9 + $0xbc0] sm:$0xff]  ;;  %v4277_v25 = vpack.c.bf16 %v2003_v14, %v1998_v42  ;;  %v4289_v7 = vpack.c.bf16 %v2033_v55, %v2028_v54  ;;  %v1807_v14 = vld [vmem:[#allocation9 + $0x548] sm:$0xff]  ;;  %v1917_v46 = vld [vmem:[#allocation9 + $0x8b8] sm:$0xff] }
 0x34d   :  { %v4449_v8 = vpack.c.bf16 %v2035_v0, %v2030_v59  ;;  %v1802_v42 = vld [vmem:[#allocation9 + $0x520] sm:$0xff]  ;;  %v1767_v55 = vld [vmem:[#allocation9 + $0x408] sm:$0xff]  ;;  %v1697_v60 = vld [vmem:[#allocation9 + $0x1d8] sm:$0xff] }
 0x34e   :  { %2201 = vmatmul.mubr.f32.vlgmr.msra.gmra.mrb[8].mxu0 %v5250_v34  ;;  %2414 = vmatmul.mubr.f32.vlgmr.msra.gmra.mrb[8].mxu1 %v5250_v34  ;;  %v1762_v54 = vld [vmem:[#allocation9 + $0x3e0] sm:$0xff]  ;;  %v1852_v17 = vld [vmem:[#allocation9 + $0x6b0] sm:$0xff] }
 0x34f   :  { %4262 = vmatpush1.bf16.msra.mxu0 %v4261_v30  ;;  %4422 = vmatpush1.bf16.msra.mxu1 %v4421_v31  ;;  %v4279_v30 = vpack.c.bf16 %v2014_v21, %v2009_v20  ;;  %v4439_v31 = vpack.c.bf16 %v2016_v24, %v2011_v23  ;;  %v5257_v21 = vmax.f32 %v5248_v12, 0.0  ;;  %v4485_v23 = vpack.c.bf16 %v1807_v14, %v1802_v42  ;;  %v1652_v24 = vld [vmem:[#allocation9 + $0x70] sm:$0xff]  ;;  %v1842_v6 = vld [vmem:[#allocation9 + $0x660] sm:$0xff] }
 0x350   :  { %4264 = vmatprep.subr.bf16.mxu0 %v4263_v3  ;;  %4424 = vmatprep.subr.bf16.mxu1 %v4423_v35  ;;  %v2019_v3 = vld [vmem:[#allocation9 + $0xbe8] sm:$0xff]  ;;  %v2024_v35 = vld [vmem:[#allocation9 + $0xc10] sm:$0xff] }
 0x351   :  { %2271 = vmatprep.mubr.f32.mxu0 %v4938_v22  ;;  %2484 = vmatprep.mubr.f32.mxu1 %v4938_v22 }
 0x353   :  { %4266 = vmatpush1.bf16.msra.mxu0 %v4265_v53  ;;  %4426 = vmatpush1.bf16.msra.mxu1 %v4425_v43  ;;  %v4283_v53 = vpack.c.bf16 %v2024_v35, %v2019_v3  ;;  %v4443_v43 = vpack.c.bf16 %v2026_v38, %v2021_v36  ;;  %v1907_v3 = vld [vmem:[#allocation9 + $0x868] sm:$0xff]  ;;  %v1662_v38 = vld [vmem:[#allocation9 + $0xc0] sm:$0xff] }
 0x354   :  { %4268 = vmatprep.subr.bf16.mxu0 %v4267_v47  ;;  %4428 = vmatprep.subr.bf16.mxu1 %v4427_v48  ;;  %v2029_v47 = vld [vmem:[#allocation9 + $0xc38] sm:$0xff]  ;;  %v2034_v48 = vld [vmem:[#allocation9 + $0xc60] sm:$0xff]  ;;  %v4491_v40 = vpack.c.bf16 %v1907_v3, %v1902_v33  ;;  %v1707_v33 = vld [vmem:[#allocation9 + $0x228] sm:$0xff] }
 0x355   :  { %v1862_v3 = vld [vmem:[#allocation9 + $0x700] sm:$0xff] }
 0x357   :  { %4270 = vmatpush1.bf16.msra.mxu0 %v4269_v57  ;;  %4430 = vmatpush1.bf16.msra.mxu1 %v4429_v58  ;;  %v4287_v57 = vpack.c.bf16 %v2034_v48, %v2029_v47  ;;  %v4447_v58 = vpack.c.bf16 %v2036_v51, %v2031_v50  ;;  %v1677_v50 = vld [vmem:[#allocation9 + $0x138] sm:$0xff]  ;;  %v1832_v51 = vld [vmem:[#allocation9 + $0x610] sm:$0xff] }
 0x358   :  { %4272 = vmatprep.subr.bf16.mxu0 %v4271_v1  ;;  %4432 = vmatprep.subr.bf16.mxu1 %v4431_v4  ;;  %v1722_v1 = vld [vmem:[#allocation9 + $0x2a0] sm:$0xff]  ;;  %v1727_v4 = vld [vmem:[#allocation9 + $0x2c8] sm:$0xff] }
 0x359   :  { %v4451_v9 = vpack.c.bf16 %v1727_v4, %v1722_v1  ;;  %v4467_v1 = vpack.c.bf16 %v1767_v55, %v1762_v54  ;;  %v1682_v4 = vld [vmem:[#allocation9 + $0x160] sm:$0xff] }
 0x35a   :  { %v4469_v42 = vpack.c.bf16 %v1687_v5, %v1682_v4  ;;  %v2706_v55 = vld [vmem:[#allocation12] sm:$0xff]  ;;  %v1977_v4 = vld [vmem:[#allocation9 + $0xa98] sm:$0xff] }
 0x35b   :  { %4274 = vmatpush1.bf16.msra.mxu0 %v4273_v41  ;;  %4434 = vmatpush1.bf16.msra.mxu1 %v4433_v13  ;;  %v1642_v41 = vld [vmem:[#allocation9 + $0x20] sm:$0xff]  ;;  %v1647_v13 = vld [vmem:[#allocation9 + $0x48] sm:$0xff] }
 0x35c   :  { %4276 = vmatprep.subr.bf16.mxu0 %v4275_v15  ;;  %4436 = vmatprep.subr.bf16.mxu1 %v4435_v16  ;;  %v1732_v15 = vld [vmem:[#allocation9 + $0x2f0] sm:$0xff]  ;;  %v1737_v16 = vld [vmem:[#allocation9 + $0x318] sm:$0xff]  ;;  %v4453_v20 = vpack.c.bf16 %v1647_v13, %v1642_v41 }
 0x35d   :  { %v4455_v28 = vpack.c.bf16 %v1737_v16, %v1732_v15  ;;  %v1932_v41 = vld [vmem:[#allocation9 + $0x930] sm:$0xff]  ;;  %v1937_v13 = vld [vmem:[#allocation9 + $0x958] sm:$0xff] }
 0x35e   :  { %v1692_v16 = vld [vmem:[#allocation9 + $0x1b0] sm:$0xff] }
 0x35f   :  { %4278 = vmatpush1.bf16.msra.mxu0 %v4277_v25  ;;  %4438 = vmatpush1.bf16.msra.mxu1 %v4437_v26  ;;  %v1657_v25 = vld [vmem:[#allocation9 + $0x98] sm:$0xff]  ;;  %v1812_v26 = vld [vmem:[#allocation9 + $0x570] sm:$0xff] }
 0x360   :  { %4280 = vmatprep.subr.bf16.mxu0 %v4279_v30  ;;  %4440 = vmatprep.subr.bf16.mxu1 %v4439_v31  ;;  %v1817_v30 = vld [vmem:[#allocation9 + $0x598] sm:$0xff]  ;;  %v1742_v31 = vld [vmem:[#allocation9 + $0x340] sm:$0xff]  ;;  %v4457_v12 = vpack.c.bf16 %v1657_v25, %v1652_v24  ;;  %v1787_v25 = vld [vmem:[#allocation9 + $0x4a8] sm:$0xff] }
 0x361   :  { %v4489_v35 = vpack.c.bf16 %v1817_v30, %v1812_v26  ;;  %v4459_v36 = vpack.c.bf16 %v1747_v62, %v1742_v31  ;;  %v1782_v24 = vld [vmem:[#allocation9 + $0x480] sm:$0xff] }
 0x362   :  { %v1942_v26 = vld [vmem:[#allocation9 + $0x980] sm:$0xff]  ;;  %v4475_v31 = vpack.c.bf16 %v1787_v25, %v1782_v24 }
 0x363   :  { %4282 = vmatpush1.bf16.msra.mxu0 %v4281_v39  ;;  %4442 = vmatpush1.bf16.msra.mxu1 %v4441_v18  ;;  %v1667_v39 = vld [vmem:[#allocation9 + $0xe8] sm:$0xff]  ;;  %v1822_v18 = vld [vmem:[#allocation9 + $0x5c0] sm:$0xff] }
 0x364   :  { %4284 = vmatprep.subr.bf16.mxu0 %v4283_v53  ;;  %4444 = vmatprep.subr.bf16.mxu1 %v4443_v43  ;;  %v1752_v53 = vld [vmem:[#allocation9 + $0x390] sm:$0xff]  ;;  %v1757_v43 = vld [vmem:[#allocation9 + $0x3b8] sm:$0xff]  ;;  %v4461_v47 = vpack.c.bf16 %v1667_v39, %v1662_v38  ;;  %v1702_v62 = vld [vmem:[#allocation9 + $0x200] sm:$0xff] }
 0x365   :  { %v4463_v48 = vpack.c.bf16 %v1757_v43, %v1752_v53  ;;  %v1797_v38 = vld [vmem:[#allocation9 + $0x4f8] sm:$0xff]  ;;  %v1952_v39 = vld [vmem:[#allocation9 + $0x9d0] sm:$0xff] }
 0x366   :  { %v1712_v43 = vld [vmem:[#allocation9 + $0x250] sm:$0xff] }
 0x367   :  { %4286 = vmatpush1.bf16.msra.mxu0 %v4285_v52  ;;  %4446 = vmatpush1.bf16.msra.mxu1 %v4445_v19  ;;  %v4495_v52 = vpack.c.bf16 %v1917_v46, %v1912_v44  ;;  %v1837_v19 = vld [vmem:[#allocation9 + $0x638] sm:$0xff] }
 0x368   :  { %4288 = vmatprep.subr.bf16.mxu0 %v4287_v57  ;;  %4448 = vmatprep.subr.bf16.mxu1 %v4447_v58  ;;  %v1922_v57 = vld [vmem:[#allocation9 + $0x8e0] sm:$0xff]  ;;  %v1927_v58 = vld [vmem:[#allocation9 + $0x908] sm:$0xff]  ;;  %v4497_v0 = vpack.c.bf16 %v1837_v19, %v1832_v51  ;;  %v1717_v44 = vld [vmem:[#allocation9 + $0x278] sm:$0xff] }
 0x369   :  { %v1967_v19 = vld [vmem:[#allocation9 + $0xa48] sm:$0xff] }
 0x36b   :  { %4290 = vmatpush1.bf16.msra.mxu0 %v4289_v7  ;;  %4450 = vmatpush1.bf16.msra.mxu1 %v4449_v8  ;;  %v4499_v7 = vpack.c.bf16 %v1927_v58, %v1922_v57  ;;  %v1847_v8 = vld [vmem:[#allocation9 + $0x688] sm:$0xff] }
 0x36c   :  { %4452 = vmatprep.subr.bf16.mxu0 %v4451_v9  ;;  %4484 = vmatprep.subr.bf16.mxu1 %v4483_v11  ;;  %v1772_v9 = vld [vmem:[#allocation9 + $0x430] sm:$0xff]  ;;  %v1777_v11 = vld [vmem:[#allocation9 + $0x458] sm:$0xff]  ;;  %v4501_v14 = vpack.c.bf16 %v1847_v8, %v1842_v6 }
 0x36d   :  { %v4471_v15 = vpack.c.bf16 %v1777_v11, %v1772_v9  ;;  %v2707_v57 = vld [vmem:[#allocation12 + $0x8] sm:$0xff]  ;;  %v2709_v8 = vld [vmem:[#allocation12 + $0x18] sm:$0xff]  ;;  %v2726_v11 = vld [vmem:[#allocation12 + $0xa0] sm:$0xff] }
 0x36e   :  { %2272 = vmatmul.mubr.f32.vlgmr.msra.gmra.mrb[8].mxu0 %v5257_v21  ;;  %2485 = vmatmul.mubr.f32.vlgmr.msra.gmra.mrb[8].mxu1 %v5257_v21  ;;  %v4541_v5 = vpack.c.bf16 %v2707_v57, %v2706_v55  ;;  %v2037_v55 = vld [vmem:[#allocation9 + $0xc78] sm:$0xff]  ;;  %v2754_v57 = vld [vmem:[#allocation12 + $0x180] sm:$0xff] }
 0x36f   :  { %4454 = vmatpush3.bf16.msra.mxu0 %v4453_v20  ;;  %2555 = vmatprep.mubr.f32.mxu0 %v5228_v32  ;;  %v4493_v32 = vpack.c.bf16 %v1827_v49, %v1822_v18  ;;  %v4503_v20 = vpack.c.bf16 %v1937_v13, %v1932_v41  ;;  %v1957_v18 = vld [vmem:[#allocation9 + $0x9f8] sm:$0xff]  ;;  %v2727_v41 = vld [vmem:[#allocation12 + $0xa8] sm:$0xff]  ;;  %v1982_v13 = vld [vmem:[#allocation9 + $0xac0] sm:$0xff] }
 0x370   :  { %4486 = vmatpush3.bf16.msra.mxu1 %v4485_v23  ;;  %2625 = vmatprep.mubr.f32.mxu1 %v5234_v45  ;;  %v1672_v45 = vld [vmem:[#allocation9 + $0x110] sm:$0xff]  ;;  %v1857_v23 = vld [vmem:[#allocation9 + $0x6d8] sm:$0xff]  ;;  %v4511_v46 = vpack.c.bf16 %v1957_v18, %v1952_v39 }
 0x371   :  { %4456 = vmatprep.subr.bf16.mxu0 %v4455_v28  ;;  %4488 = vmatprep.subr.bf16.mxu1 %v4487_v29  ;;  %v4465_v59 = vpack.c.bf16 %v1677_v50, %v1672_v45  ;;  %v1947_v28 = vld [vmem:[#allocation9 + $0x9a8] sm:$0xff]  ;;  %v4473_v29 = vpack.c.bf16 %v1697_v60, %v1692_v16  ;;  %v4505_v30 = vpack.c.bf16 %v1857_v23, %v1852_v17  ;;  %v2729_v17 = vld [vmem:[#allocation12 + $0xb8] sm:$0xff]  ;;  %v2732_v39 = vld [vmem:[#allocation12 + $0xd0] sm:$0xff] }
 0x372   :  { %v2723_v45 = vld [vmem:[#allocation12 + $0x88] sm:$0xff]  ;;  %v4481_v50 = vpack.c.bf16 %v1717_v44, %v1712_v43  ;;  %v1997_v23 = vld [vmem:[#allocation9 + $0xb38] sm:$0xff] }
 0x373   :  { %4458 = vmatpush3.bf16.msra.mxu0 %v4457_v12  ;;  %v4507_v12 = vpack.c.bf16 %v1947_v28, %v1942_v26  ;;  %v2711_v16 = vld [vmem:[#allocation12 + $0x28] sm:$0xff]  ;;  %v2712_v26 = vld [vmem:[#allocation12 + $0x30] sm:$0xff]  ;;  %v2713_v28 = vld [vmem:[#allocation12 + $0x38] sm:$0xff] }
 0x374   :  { %4490 = vmatpush3.bf16.msra.mxu1 %v4489_v35  ;;  %4460 = vmatprep.subr.bf16.mxu0 %v4459_v36  ;;  %v1867_v35 = vld [vmem:[#allocation9 + $0x728] sm:$0xff]  ;;  %v1792_v36 = vld [vmem:[#allocation9 + $0x4d0] sm:$0xff]  ;;  %v2733_v18 = vld [vmem:[#allocation12 + $0xd8] sm:$0xff] }
 0x375   :  { %4492 = vmatprep.subr.bf16.mxu1 %v4491_v40  ;;  %v4477_v40 = vpack.c.bf16 %v1707_v33, %v1702_v62  ;;  %v4509_v49 = vpack.c.bf16 %v1867_v35, %v1862_v3  ;;  %v4479_v53 = vpack.c.bf16 %v1797_v38, %v1792_v36  ;;  %v2002_v62 = vld [vmem:[#allocation9 + $0xb60] sm:$0xff]  ;;  %v2007_v33 = vld [vmem:[#allocation9 + $0xb88] sm:$0xff]  ;;  %v4553_v3 = vpack.c.bf16 %v2713_v28, %v2712_v26  ;;  %v2716_v44 = vld [vmem:[#allocation12 + $0x50] sm:$0xff] }
 0x376   :  { %v2714_v35 = vld [vmem:[#allocation12 + $0x40] sm:$0xff]  ;;  %v2715_v36 = vld [vmem:[#allocation12 + $0x48] sm:$0xff]  ;;  %v4528_v38 = vpack.c.bf16 %v2007_v33, %v2002_v62  ;;  %v4559_v43 = vpack.c.bf16 %v2733_v18, %v2732_v39 }
 0x377   :  { %4462 = vmatpush3.bf16.msra.mxu0 %v4461_v47  ;;  %v1872_v47 = vld [vmem:[#allocation9 + $0x750] sm:$0xff]  ;;  %v2746_v28 = vld [vmem:[#allocation12 + $0x140] sm:$0xff] }
 0x378   :  { %4494 = vmatpush3.bf16.msra.mxu1 %v4493_v32  ;;  %4464 = vmatprep.subr.bf16.mxu0 %v4463_v48  ;;  %v1877_v32 = vld [vmem:[#allocation9 + $0x778] sm:$0xff]  ;;  %v2722_v48 = vld [vmem:[#allocation12 + $0x80] sm:$0xff]  ;;  %v2719_v18 = vld [vmem:[#allocation12 + $0x68] sm:$0xff] }
 0x379   :  { %4496 = vmatprep.subr.bf16.mxu1 %v4495_v52  ;;  %v4513_v51 = vpack.c.bf16 %v1877_v32, %v1872_v47  ;;  %v1962_v52 = vld [vmem:[#allocation9 + $0xa20] sm:$0xff]  ;;  %v4539_v54 = vpack.c.bf16 %v2723_v45, %v2722_v48  ;;  %v2735_v48 = vld [vmem:[#allocation12 + $0xe8] sm:$0xff] }
 0x37a   :  { %v4516_v58 = vpack.c.bf16 %v1967_v19, %v1962_v52  ;;  %v2734_v32 = vld [vmem:[#allocation12 + $0xe0] sm:$0xff] }
 0x37b   :  { %4466 = vmatpush3.bf16.msra.mxu0 %v4465_v59  ;;  %v2724_v59 = vld [vmem:[#allocation12 + $0x90] sm:$0xff]  ;;  %v2022_v45 = vld [vmem:[#allocation9 + $0xc00] sm:$0xff]  ;;  %v4563_v52 = vpack.c.bf16 %v2735_v48, %v2734_v32 }
 0x37c   :  { %4498 = vmatpush3.bf16.msra.mxu1 %v4497_v0  ;;  %4468 = vmatprep.subr.bf16.mxu0 %v4467_v1  ;;  %v2725_v0 = vld [vmem:[#allocation12 + $0x98] sm:$0xff]  ;;  %v1972_v1 = vld [vmem:[#allocation9 + $0xa70] sm:$0xff]  ;;  %v2718_v39 = vld [vmem:[#allocation12 + $0x60] sm:$0xff] }
 0x37d   :  { %4500 = vmatprep.subr.bf16.mxu1 %v4499_v7  ;;  %v4543_v6 = vpack.c.bf16 %v2725_v0, %v2724_v59  ;;  %v2708_v7 = vld [vmem:[#allocation12 + $0x10] sm:$0xff]  ;;  %v4519_v9 = vpack.c.bf16 %v1977_v4, %v1972_v1  ;;  %v2738_v1 = vld [vmem:[#allocation12 + $0x100] sm:$0xff]  ;;  %v2739_v4 = vld [vmem:[#allocation12 + $0x108] sm:$0xff] }
 0x37f   :  { %4470 = vmatpush3.bf16.msra.mxu0 %v4469_v42  ;;  %v1987_v42 = vld [vmem:[#allocation9 + $0xae8] sm:$0xff] }
 0x380   :  { %4502 = vmatpush3.bf16.msra.mxu1 %v4501_v14  ;;  %4472 = vmatprep.subr.bf16.mxu0 %v4471_v15  ;;  %v4545_v14 = vpack.c.bf16 %v2709_v8, %v2708_v7  ;;  %v2710_v15 = vld [vmem:[#allocation12 + $0x20] sm:$0xff]  ;;  %v4522_v60 = vpack.c.bf16 %v1987_v42, %v1982_v13  ;;  %v4573_v7 = vpack.c.bf16 %v2739_v4, %v2738_v1  ;;  %v2759_v13 = vld [vmem:[#allocation12 + $0x1a8] sm:$0xff] }
 0x381   :  { %4504 = vmatprep.subr.bf16.mxu1 %v4503_v20  ;;  %v1992_v20 = vld [vmem:[#allocation9 + $0xb10] sm:$0xff]  ;;  %v4549_v24 = vpack.c.bf16 %v2711_v16, %v2710_v15 }
 0x382   :  { %v2743_v15 = vld [vmem:[#allocation12 + $0x128] sm:$0xff]  ;;  %v2760_v16 = vld [vmem:[#allocation12 + $0x1b0] sm:$0xff] }
 0x383   :  { %4474 = vmatpush3.bf16.msra.mxu0 %v4473_v29  ;;  %v4525_v29 = vpack.c.bf16 %v1997_v23, %v1992_v20  ;;  %v2744_v20 = vld [vmem:[#allocation12 + $0x130] sm:$0xff]  ;;  %v2745_v23 = vld [vmem:[#allocation12 + $0x138] sm:$0xff] }
 0x384   :  { %4506 = vmatpush3.bf16.msra.mxu1 %v4505_v30  ;;  %4476 = vmatprep.subr.bf16.mxu0 %v4475_v31  ;;  %v2730_v30 = vld [vmem:[#allocation12 + $0xc0] sm:$0xff]  ;;  %v2731_v31 = vld [vmem:[#allocation12 + $0xc8] sm:$0xff]  ;;  %v4585_v26 = vpack.c.bf16 %v2745_v23, %v2744_v20  ;;  %v2776_v23 = vld [vmem:[#allocation12 + $0x230] sm:$0xff] }
 0x385   :  { %4508 = vmatprep.subr.bf16.mxu1 %v4507_v12  ;;  %v4555_v12 = vpack.c.bf16 %v2731_v31, %v2730_v30  ;;  %v2764_v30 = vld [vmem:[#allocation12 + $0x1d0] sm:$0xff]  ;;  %v2765_v31 = vld [vmem:[#allocation12 + $0x1d8] sm:$0xff] }
 0x386   :  { %v4591_v33 = vpack.c.bf16 %v2765_v31, %v2764_v30  ;;  %v2781_v30 = vld [vmem:[#allocation12 + $0x258] sm:$0xff]  ;;  %v2782_v31 = vld [vmem:[#allocation12 + $0x260] sm:$0xff] }
 0x387   :  { %4478 = vmatpush3.bf16.msra.mxu0 %v4477_v40  ;;  %v2012_v40 = vld [vmem:[#allocation9 + $0xbb0] sm:$0xff] }
 0x388   :  { %4510 = vmatpush3.bf16.msra.mxu1 %v4509_v49  ;;  %4480 = vmatprep.subr.bf16.mxu0 %v4479_v53  ;;  %v2017_v49 = vld [vmem:[#allocation9 + $0xbd8] sm:$0xff]  ;;  %v4557_v53 = vpack.c.bf16 %v2715_v36, %v2714_v35  ;;  %v2766_v35 = vld [vmem:[#allocation12 + $0x1e0] sm:$0xff]  ;;  %v2767_v36 = vld [vmem:[#allocation12 + $0x1e8] sm:$0xff] }
 0x389   :  { %4512 = vmatprep.subr.bf16.mxu1 %v4511_v46  ;;  %v2717_v46 = vld [vmem:[#allocation12 + $0x58] sm:$0xff]  ;;  %v4531_v47 = vpack.c.bf16 %v2017_v49, %v2012_v40  ;;  %v4595_v40 = vpack.c.bf16 %v2767_v36, %v2766_v35  ;;  %v4565_v49 = vpack.c.bf16 %v2719_v18, %v2718_v39 }
 0x38b   :  { %4482 = vmatpush3.bf16.msra.mxu0 %v4481_v50  ;;  %v2027_v50 = vld [vmem:[#allocation9 + $0xc28] sm:$0xff] }
 0x38c   :  { %4514 = vmatpush3.bf16.msra.mxu1 %v4513_v51  ;;  %4515 = vmatprep.subr.bf16.mxu0 %v4939_v27  ;;  %v4561_v51 = vpack.c.bf16 %v2717_v46, %v2716_v44  ;;  %v4534_v19 = vpack.c.bf16 %v2027_v50, %v2022_v45  ;;  %v2736_v44 = vld [vmem:[#allocation12 + $0xf0] sm:$0xff]  ;;  %v2737_v46 = vld [vmem:[#allocation12 + $0xf8] sm:$0xff] }
 0x38d   :  { %4540 = vmatprep.subr.bf16.mxu1 %v4539_v54  ;;  %v2032_v54 = vld [vmem:[#allocation9 + $0xc50] sm:$0xff]  ;;  %v4567_v48 = vpack.c.bf16 %v2737_v46, %v2736_v44  ;;  %v2769_v45 = vld [vmem:[#allocation12 + $0x1f8] sm:$0xff] }
 0x38e   :  { %2556 = vmatmul.mubr.f32.vlgmr.msra.gmra.mrb[10].mxu0 %v5230_v37  ;;  %v4547_v37 = vpack.c.bf16 %v2727_v41, %v2726_v11  ;;  %v4537_v59 = vpack.c.bf16 %v2037_v55, %v2032_v54  ;;  %v2741_v11 = vld [vmem:[#allocation12 + $0x118] sm:$0xff]  ;;  %v2758_v41 = vld [vmem:[#allocation12 + $0x1a0] sm:$0xff]  ;;  %v2720_v50 = vld [vmem:[#allocation12 + $0x70] sm:$0xff] }
 0x38f   :  { %2626 = vmatmul.mubr.f32.vlgmr.msra.gmra.mrb[10].mxu1 %v5250_v34  ;;  %4517 = vmatpush3.bf16.msra.mxu0 %v4516_v58  ;;  %v2728_v34 = vld [vmem:[#allocation12 + $0xb0] sm:$0xff]  ;;  %v2755_v58 = vld [vmem:[#allocation12 + $0x188] sm:$0xff]  ;;  %v2753_v55 = vld [vmem:[#allocation12 + $0x178] sm:$0xff] }
 0x390   :  { %4518 = vmatprep.subr.bf16.mxu0 %v4939_v27  ;;  %3490 = vmatprep.mubr.msk.f32.mxu0 %vm4940_vm0, %v4938_v22  ;;  %v4551_v25 = vpack.c.bf16 %v2729_v17, %v2728_v34  ;;  %v4571_v0 = vpack.c.bf16 %v2755_v58, %v2754_v57  ;;  %v2752_v54 = vld [vmem:[#allocation12 + $0x170] sm:$0xff]  ;;  %v5278_v58 = vld [vmem:[#allocation10] sm:$0x1f] }
 0x391   :  { %4542 = vmatpush3.bf16.msra.mxu1 %v4541_v5  ;;  %v2756_v5 = vld [vmem:[#allocation12 + $0x190] sm:$0xff]  ;;  %v4601_v57 = vpack.c.bf16 %v2753_v55, %v2752_v54  ;;  %v2047_v1 = vrot.slane %v5278_v58, %v5154_v63  ;;  %v2055_v4 = vrot.slane %v5278_v58, %v5169_v56  ;;  %v2773_v63 = vld [vmem:[#allocation12 + $0x218] sm:$0xff]  ;;  %v2059_v36 = vrot.slane %v5278_v58, %v5194_v2  ;;  %v3008_v54 = vld [vmem:[#allocation15 + $0x20] sm:$0xff] }
 0x392   :  { %4544 = vmatprep.subr.bf16.mxu1 %v4543_v6  ;;  %v2757_v6 = vld [vmem:[#allocation12 + $0x198] sm:$0xff]  ;;  %v3009_v55 = vld [vmem:[#allocation15 + $0x28] sm:$0xff] }
 0x393   :  { %4520 = vmatpush3.bf16.msra.mxu0 %v4519_v9  ;;  %v4575_v8 = vpack.c.bf16 %v2757_v6, %v2756_v5  ;;  %v2740_v9 = vld [vmem:[#allocation12 + $0x110] sm:$0xff] }
 0x394   :  { %4521 = vmatprep.subr.bf16.mxu0 %v4939_v27  ;;  %v4577_v42 = vpack.c.bf16 %v2741_v11, %v2740_v9  ;;  %v3006_v2 = vld [vmem:[#allocation15 + $0x10] sm:$0xff] }
 0x395   :  { %4546 = vmatpush3.bf16.msra.mxu1 %v4545_v14  ;;  %v4579_v14 = vpack.c.bf16 %v2759_v13, %v2758_v41  ;;  %v2770_v41 = vld [vmem:[#allocation12 + $0x200] sm:$0xff]  ;;  %v2771_v13 = vld [vmem:[#allocation12 + $0x208] sm:$0xff] }
 0x396   :  { %4548 = vmatprep.subr.bf16.mxu1 %v4547_v37  ;;  %v2742_v37 = vld [vmem:[#allocation12 + $0x120] sm:$0xff] }
 0x397   :  { %4523 = vmatpush3.bf16.msra.mxu0 %v4522_v60  ;;  %v2761_v60 = vld [vmem:[#allocation12 + $0x1b8] sm:$0xff]  ;;  %v4581_v34 = vpack.c.bf16 %v2743_v15, %v2742_v37  ;;  %v4604_v15 = vpack.c.bf16 %v2771_v13, %v2770_v41 }
 0x398   :  { %4524 = vmatprep.subr.bf16.mxu0 %v4939_v27  ;;  %v4583_v17 = vpack.c.bf16 %v2761_v60, %v2760_v16  ;;  %v2772_v60 = vld [vmem:[#allocation12 + $0x210] sm:$0xff] }
 0x399   :  { %4550 = vmatpush3.bf16.msra.mxu1 %v4549_v24  ;;  %v2762_v24 = vld [vmem:[#allocation12 + $0x1c0] sm:$0xff]  ;;  %v4607_v56 = vpack.c.bf16 %v2773_v63, %v2772_v60  ;;  %v3018_v13 = vld [vmem:[#allocation15 + $0x70] sm:$0xff] }
 0x39a   :  { %4552 = vmatprep.subr.bf16.mxu1 %v4551_v25  ;;  %v2763_v25 = vld [vmem:[#allocation12 + $0x1c8] sm:$0xff] }
 0x39b   :  { %4526 = vmatpush3.bf16.msra.mxu0 %v4525_v29  ;;  %v2747_v29 = vld [vmem:[#allocation12 + $0x148] sm:$0xff] }
 0x39c   :  { %4527 = vmatprep.subr.bf16.mxu0 %v4939_v27  ;;  %v4589_v62 = vpack.c.bf16 %v2747_v29, %v2746_v28  ;;  %v2780_v29 = vld [vmem:[#allocation12 + $0x250] sm:$0xff] }
 0x39d   :  { %4554 = vmatpush3.bf16.msra.mxu1 %v4553_v3  ;;  %v2748_v3 = vld [vmem:[#allocation12 + $0x150] sm:$0xff] }
 0x39e   :  { %4556 = vmatprep.subr.bf16.mxu1 %v4555_v12  ;;  %v2749_v12 = vld [vmem:[#allocation12 + $0x158] sm:$0xff] }
 0x39f   :  { %4529 = vmatpush3.bf16.msra.mxu0 %v4528_v38  ;;  %v4593_v38 = vpack.c.bf16 %v2749_v12, %v2748_v3  ;;  %v2784_v3 = vld [vmem:[#allocation12 + $0x270] sm:$0xff]  ;;  %v2785_v12 = vld [vmem:[#allocation12 + $0x278] sm:$0xff] }
 0x3a0   :  { %4530 = vmatprep.subr.bf16.mxu0 %v4939_v27 }
 0x3a1   :  { %4558 = vmatpush3.bf16.msra.mxu1 %v4557_v53  ;;  %v2750_v53 = vld [vmem:[#allocation12 + $0x160] sm:$0xff] }
 0x3a2   :  { %4560 = vmatprep.subr.bf16.mxu1 %v4559_v43  ;;  %v2751_v43 = vld [vmem:[#allocation12 + $0x168] sm:$0xff] }
 0x3a3   :  { %4532 = vmatpush3.bf16.msra.mxu0 %v4531_v47  ;;  %v2768_v47 = vld [vmem:[#allocation12 + $0x1f0] sm:$0xff]  ;;  %v4597_v32 = vpack.c.bf16 %v2751_v43, %v2750_v53 }
 0x3a4   :  { %4533 = vmatprep.subr.bf16.mxu0 %v4939_v27 }
 0x3a5   :  { %4562 = vmatpush3.bf16.msra.mxu1 %v4561_v51  ;;  %v2721_v51 = vld [vmem:[#allocation12 + $0x78] sm:$0xff] }
 0x3a6   :  { %4564 = vmatprep.subr.bf16.mxu1 %v4563_v52  ;;  %v4599_v52 = vpack.c.bf16 %v2769_v45, %v2768_v47  ;;  %v3004_v45 = vld [vmem:[#allocation15] sm:$0xff] }
 0x3a7   :  { %4535 = vmatpush3.bf16.msra.mxu0 %v4534_v19  ;;  %v4569_v19 = vpack.c.bf16 %v2721_v51, %v2720_v50  ;;  %v3005_v50 = vld [vmem:[#allocation15 + $0x8] sm:$0xff] }
 0x3a8   :  { %4536 = vmatprep.subr.bf16.mxu0 %v4939_v27  ;;  %v4628_v51 = vpack.c.bf16 %v3005_v50, %v3004_v45 }
 0x3a9   :  { %4566 = vmatpush3.bf16.msra.mxu1 %v4565_v49 }
 0x3aa   :  { %4568 = vmatprep.subr.bf16.mxu1 %v4567_v48 }
 0x3ab   :  { %4538 = vmatpush3.bf16.msra.mxu0 %v4537_v59  ;;  %v2043_v59 = vrot.slane %v5278_v58, %v5149_v61 }
 0x3ac   :  { %4572 = vmatprep.subr.bf16.mxu0 %v4571_v0  ;;  %v2051_v0 = vrot.slane %v5278_v58, %v5182_v10  ;;  %v3010_v58 = vld [vmem:[#allocation15 + $0x30] sm:$0xff] }
 0x3ad   :  { %4570 = vmatpush3.bf16.msra.mxu1 %v4569_v19 }
 0x3ae   :  { %3491 = vmatmul.mubr.f32.vlgmr.msra.gmra.mrb[12].mxu0 %v5257_v21  ;;  %v4587_v21 = vpack.c.bf16 %v2763_v25, %v2762_v24  ;;  %4603 = vmatprep.subr.bf16.mxu1 %v4939_v27  ;;  %v2777_v24 = vld [vmem:[#allocation12 + $0x238] sm:$0xff] }
 0x3af   :  { %4574 = vmatpush3.bf16.msra.mxu0 %v4573_v7  ;;  %v4613_v25 = vpack.c.bf16 %v2777_v24, %v2776_v23 }
 0x3b0   :  { %4576 = vmatprep.subr.bf16.mxu0 %v4575_v8 }
 0x3b3   :  { %4578 = vmatpush3.bf16.msra.mxu0 %v4577_v42 }
 0x3b4   :  { %4580 = vmatprep.subr.bf16.mxu0 %v4579_v14 }
 0x3b7   :  { %4582 = vmatpush3.bf16.msra.mxu0 %v4581_v34  ;;  %v2774_v34 = vld [vmem:[#allocation12 + $0x220] sm:$0xff] }
 0x3b8   :  { %4584 = vmatprep.subr.bf16.mxu0 %v4583_v17  ;;  %v2775_v17 = vld [vmem:[#allocation12 + $0x228] sm:$0xff] }
 0x3b9   :  { %v4610_v20 = vpack.c.bf16 %v2775_v17, %v2774_v34 }
 0x3bb   :  { %4586 = vmatpush3.bf16.msra.mxu0 %v4585_v26  ;;  %v2778_v26 = vld [vmem:[#allocation12 + $0x240] sm:$0xff] }
 0x3bc   :  { %4588 = vmatprep.subr.bf16.mxu0 %v4587_v21  ;;  %v2779_v21 = vld [vmem:[#allocation12 + $0x248] sm:$0xff] }
 0x3bd   :  { %v4616_v28 = vpack.c.bf16 %v2779_v21, %v2778_v26 }
 0x3bf   :  { %4590 = vmatpush3.bf16.msra.mxu0 %v4589_v62  ;;  %v2783_v62 = vld [vmem:[#allocation12 + $0x268] sm:$0xff] }
 0x3c0   :  { %4592 = vmatprep.subr.bf16.mxu0 %v4591_v33  ;;  %v4622_v33 = vpack.c.bf16 %v2783_v62, %v2782_v31 }
 0x3c3   :  { %4594 = vmatpush3.bf16.msra.mxu0 %v4593_v38  ;;  %v4625_v38 = vpack.c.bf16 %v2785_v12, %v2784_v3 }
 0x3c4   :  { %4596 = vmatprep.subr.bf16.mxu0 %v4595_v40 }
 0x3c7   :  { %4598 = vmatpush3.bf16.msra.mxu0 %v4597_v32 }
 0x3c8   :  { %4600 = vmatprep.subr.bf16.mxu0 %v4599_v52  ;;  %v3007_v52 = vld [vmem:[#allocation15 + $0x18] sm:$0xff] }
 0x3c9   :  { %v4631_v19 = vpack.c.bf16 %v3007_v52, %v3006_v2 }
 0x3cb   :  { %4602 = vmatpush3.bf16.msra.mxu0 %v4601_v57  ;;  %v4634_v57 = vpack.c.bf16 %v3009_v55, %v3008_v54 }
 0x3cc   :  { %4627 = vmatprep.subr.bf16.mxu0 %v4939_v27 }
 0x441   :  { %v2273_v5 = vpop.f32.mrb[8].mxu0  ;;  %v2486_v6 = vpop.f32.mrb[8].mxu1 }
 0x442   :  { %v4655_v7 = vadd.f32 %v2273_v5, %v2043_v59  ;;  %v4657_v8 = vadd.f32 %v2486_v6, %v2051_v0  ;;  %v2275_v9 = vpop.f32.mrb[9].mxu0  ;;  %v2488_v11 = vpop.f32.mrb[9].mxu1  ;;  %v3011_v59 = vld [vmem:[#allocation15 + $0x38] sm:$0xff]  ;;  %v3014_v6 = vld [vmem:[#allocation15 + $0x50] sm:$0xff] }
 0x443   :  { %v4656_v42 = vadd.f32 %v2275_v9, %v2047_v1  ;;  %v4658_v14 = vadd.f32 %v2488_v11, %v2055_v4  ;;  %v4637_v0 = vpack.c.bf16 %v3011_v59, %v3010_v58  ;;  %v3012_v1 = vld [vmem:[#allocation15 + $0x40] sm:$0xff]  ;;  %v3013_v4 = vld [vmem:[#allocation15 + $0x48] sm:$0xff] }
 0x444   :  { %v2701_v10 = vmax.f32 %v4655_v7, 0.0  ;;  %v2703_v16 = vmax.f32 %v4657_v8, 0.0  ;;  %v4640_v5 = vpack.c.bf16 %v3013_v4, %v3012_v1  ;;  %v3015_v7 = vld [vmem:[#allocation15 + $0x58] sm:$0xff]  ;;  %v3016_v9 = vld [vmem:[#allocation15 + $0x60] sm:$0xff]  ;;  %v3017_v11 = vld [vmem:[#allocation15 + $0x68] sm:$0xff] }
 0x445   :  { %v2702_v61 = vmax.f32 %v4656_v42, 0.0  ;;  %v2704_v37 = vmax.f32 %v4658_v14, 0.0  ;;  %v4643_v8 = vpack.c.bf16 %v3015_v7, %v3014_v6  ;;  %v4646_v41 = vpack.c.bf16 %v3017_v11, %v3016_v9  ;;  %v3019_v42 = vld [vmem:[#allocation15 + $0x78] sm:$0xff] }
 0x446   :  { %v4649_v14 = vpack.c.bf16 %v3019_v42, %v3018_v13 }
 0x447   :  { %2857 = vmatprep.mubr.f32.mxu1 %v2702_v61  ;;  %2927 = vmatprep.mubr.f32.mxu0 %v2704_v37 }
 0x448   :  { %2858 = vmatmul.mubr.f32.vlgmr.msra.gmra.mrb[12].mxu1 %v2701_v10  ;;  %2928 = vmatmul.mubr.f32.vlgmr.msra.gmra.mrb[14].mxu0 %v2703_v16 }
 0x449   :  { %4605 = vmatpush3.bf16.msra.mxu1 %v4604_v15  ;;  %3525 = vmatprep.mubr.msk.f32.mxu1 %vm4940_vm0, %v4938_v22  ;;  %v3108_v15 = vld [vmem:[#allocation13] ss:$0 sm:$0xff] }
 0x44a   :  { %4606 = vmatprep.subr.bf16.mxu1 %v4939_v27  ;;  %3560 = vmatprep.mubr.msk.f32.mxu0 %vm4940_vm0, %v4938_v22  ;;  %v4619_v22 = vpack.c.bf16 %v2781_v30, %v2780_v29 }
 0x44b   :  { %4629 = vmatpush3.bf16.msra.mxu0 %v4628_v51 }
 0x44c   :  { %4630 = vmatprep.subr.bf16.mxu0 %v4939_v27 }
 0x44d   :  { %4608 = vmatpush3.bf16.msra.mxu1 %v4607_v56 }
 0x44e   :  { %4609 = vmatprep.subr.bf16.mxu1 %v4939_v27 }
 0x44f   :  { %4632 = vmatpush3.bf16.msra.mxu0 %v4631_v19 }
 0x450   :  { %4633 = vmatprep.subr.bf16.mxu0 %v4939_v27 }
 0x451   :  { %4611 = vmatpush3.bf16.msra.mxu1 %v4610_v20 }
 0x452   :  { %4612 = vmatprep.subr.bf16.mxu1 %v4939_v27 }
 0x453   :  { %4635 = vmatpush3.bf16.msra.mxu0 %v4634_v57 }
 0x454   :  { %4636 = vmatprep.subr.bf16.mxu0 %v4939_v27 }
 0x455   :  { %4614 = vmatpush3.bf16.msra.mxu1 %v4613_v25  ;;  %v3109_v25 = vld [vmem:[#allocation16] ss:$0 sm:$0xff] }
 0x456   :  { %4615 = vmatprep.subr.bf16.mxu1 %v4939_v27 }
 0x457   :  { %4638 = vmatpush3.bf16.msra.mxu0 %v4637_v0 }
 0x458   :  { %4639 = vmatprep.subr.bf16.mxu0 %v4939_v27 }
 0x459   :  { %4617 = vmatpush3.bf16.msra.mxu1 %v4616_v28 }
 0x45a   :  { %4618 = vmatprep.subr.bf16.mxu1 %v4939_v27 }
 0x45b   :  { %4641 = vmatpush3.bf16.msra.mxu0 %v4640_v5 }
 0x45c   :  { %4642 = vmatprep.subr.bf16.mxu0 %v4939_v27 }
 0x45d   :  { %4620 = vmatpush3.bf16.msra.mxu1 %v4619_v22 }
 0x45e   :  { %4621 = vmatprep.subr.bf16.mxu1 %v4939_v27 }
 0x45f   :  { %4644 = vmatpush3.bf16.msra.mxu0 %v4643_v8 }
 0x460   :  { %4645 = vmatprep.subr.bf16.mxu0 %v4939_v27 }
 0x461   :  { %v3264_v35 = vpop.f32.mrb[10].mxu0  ;;  %4623 = vmatpush3.bf16.msra.mxu1 %v4622_v33 }
 0x462   :  { %v3299_v39 = vpop.f32.mrb[10].mxu1  ;;  %v3265_v18 = vpop.f32.mrb[11].mxu0  ;;  %4624 = vmatprep.subr.bf16.mxu1 %v4939_v27 }
 0x463   :  { %v3266_v40 = vadd.f32 %v3265_v18, %v3264_v35  ;;  %v3300_v49 = vpop.f32.mrb[11].mxu1  ;;  %4647 = vmatpush3.bf16.msra.mxu0 %v4646_v41 }
 0x464   :  { %v3301_v53 = vadd.f32 %v3300_v49, %v3299_v39  ;;  %4648 = vmatprep.subr.bf16.mxu0 %v4939_v27 }
 0x465   :  { %v2558_v43 = vadd.f32 %v3266_v40, %v2059_v36  ;;  %4626 = vmatpush3.bf16.msra.mxu1 %v4625_v38 }
 0x467   :  { %v2628_v44 = vadd.f32 %v3301_v53, %v2558_v43  ;;  %4650 = vmatpush3.bf16.msra.mxu0 %v4649_v14 }
 0x481   :  { %v2697_v46 = vpop.f32.mrb[12].mxu0 }
 0x482   :  { %v2698_v47 = vadd.f32 %v2697_v46, %v2628_v44  ;;  %v3492_v32 = vpop.f32.mrb[13].mxu0 }
 0x484   :  { %v2705_v48 = vmax.f32 %v2698_v47, 0.0 }
 0x486   :  { %3526 = vmatmul.mubr.f32.vlgmr.msra.gmra.mrb[14].mxu1 %v2705_v48 }
 0x51b   :  { %v3351_v61 = vpop.f32.mrb[12].mxu1  ;;  %v3386_v37 = vpop.f32.mrb[14].mxu0 }
 0x51c   :  { %v3352_v10 = vpop.f32.mrb[13].mxu1  ;;  %v3387_v16 = vpop.f32.mrb[15].mxu0 }
 0x51d   :  { %v3353_v60 = vadd.f32 %v3352_v10, %v3351_v61  ;;  %v3388_v63 = vadd.f32 %v3387_v16, %v3386_v37 }
 0x51f   :  { %v2860_v56 = vadd.f32 %v3353_v60, %v3108_v15 }
 0x521   :  { %v2930_v34 = vadd.f32 %v3388_v63, %v2860_v56 }
 0x559   :  { %v2999_v17 = vpop.f32.mrb[14].mxu1 }
 0x55a   :  { %v3000_v20 = vadd.f32 %v2999_v17, %v2930_v34  ;;  %v3527_v23 = vpop.f32.mrb[15].mxu1 }
 0x55c   :  { %v3003_v24 = vmax.f32 %v3000_v20, 0.0 }
 0x55e   :  { %3561 = vmatmul.mubr.f32.vlgmr.msra.gmra.mrb[16].mxu0 %v3003_v24 }
 0x631   :  { %v3093_v27 = vpop.f32.mrb[16].mxu0 }
 0x632   :  { %v3094_v26 = vadd.f32 %v3109_v25, %v3093_v27  ;;  %v3562_v21 = vpop.f32.mrb[17].mxu0 }
 0x634   :  { %3097 = vst [vmem:[%s5322_s11] sm:$0xff] %v3094_v26 }
 0x635   :  { %3102 = vsyncpa [#allocation3], 1 }
 0x636   :  { %3103 = vsyncpa [#allocation5], 1 }
 0x637   :  { %3104 = vsyncpa [#allocation8], 1 }
 0x638   :  { %3105 = vsyncpa [#allocation11], 1 }
 0x639   :  { %3106 = vsyncpa [#allocation14], 1 }
 0x63a   :  { %3107 = vsyncpa [#allocation17], 1 }

</bundles_post_ra>
